<compile_context>
chip_gen: v7x
topology: tpu7x:2x2x1
jax: 0.10.0
libtpu: 0.0.40
codegen_flags: <defaults>
</compile_context>

<pallas_src>
import functools

import jax
import jax.numpy as jnp
import numpy as np
from jax.experimental import pallas as pl
from jax.experimental.pallas import tpu as pltpu

# ----------------------------- configuration --------------------------------
BERT_DIM = 768          # fixed by the module: nn.LSTM(768, hidden_size, ...)
HIDDEN = 32             # hidden_size
NUM_LAYERS = 2          # num_layers (bidirectional)
VOCAB = 50
BATCH = 4
SEQ = 8                 # max sequence length (== max(lengths) in the batch)


# ----------------- fused bidirectional 2-layer LSTM kernel -------------------
def _enc_bilstm_kernel(x_ref, w0_ref, b0_ref, whh0_ref, w1_ref, b1_ref, whh1_ref,
                       mv_ref, mh_ref,
                       out_ref, hn_ref, cn_ref,
                       h_sc, c_sc, l0_sc, gx0_sc, gx1_sc,
                       *, B, H, T):
    """Fused: layer-0 projection -> layer-0 recurrence -> layer-1 projection -> layer-1."""
    # ---- layer-0 input projection (single (TB,768)@(768,8H) MXU matmul) ----
    gx0_sc[...] = (jnp.dot(x_ref[...], w0_ref[...],
                           preferred_element_type=jnp.float32) + b0_ref[...])

    def run_layer(gx_ref, whh_ref, out_dst, layer_idx):
        # h kept block-diagonal: fwd rows valid in cols [0,H), bwd rows in cols [H,2H);
        # the recurrence matmul reads h_sc directly (stacked [W_hh_f ; W_hh_b] RHS).
        h_sc[...] = jnp.zeros_like(h_sc)
        c_sc[...] = jnp.zeros_like(c_sc)
        whh = whh_ref[...]                       # (2H,4H), loaded once per layer
        for s in range(T):                       # static, fully unrolled at trace time
            # gate inputs for this step: fwd rows for time s, bwd rows for time T-1-s
            gf = gx_ref[s * B:(s + 1) * B, 0:4 * H]
            gb = gx_ref[(T - 1 - s) * B:(T - s) * B, 4 * H:8 * H]
            gx = jnp.concatenate([gf, gb], axis=0)              # (2B,4H) = one f32 vreg
            h_bd = h_sc[...]                                    # (2B,2H)
            c_prev = c_sc[...]                                  # (2B,H)
            gates = gx + jnp.dot(h_bd, whh,
                                 preferred_element_type=jnp.float32)
            # single EUP pass: i/f/o columns were pre-scaled by 0.5 on the wrapper side,
            # so sigmoid(z) = 0.5*tanh(z/2) + 0.5; the g column stays plain tanh.
            t = jnp.tanh(gates)
            st = 0.5 * t + 0.5
            i_g = st[:, 0 * H:1 * H]
            f_g = st[:, 1 * H:2 * H]
            g_g = t[:, 2 * H:3 * H]
            o_g = st[:, 3 * H:4 * H]
            c_new = f_g * c_prev + i_g * g_g
            h_new = o_g * jnp.tanh(c_new)                       # (2B,H), 2nd EUP pass
            mv = mv_ref[s]                                      # (2B,H) validity (float)
            mh = mh_ref[s]                                      # (2B,2H) validity*blockdiag
            c_sc[...] = c_prev + mv * (c_new - c_prev)          # frozen at padded steps
            hh = jnp.concatenate([h_new, h_new], axis=1)        # (2B,2H)
            h_sc[...] = h_bd + mh * (hh - h_bd)                 # masked block-diag update
            out_s = mv * h_new                                  # padded positions -> 0
            out_dst[s * B:(s + 1) * B, 0:H] = out_s[0:B]
            out_dst[(T - 1 - s) * B:(T - s) * B, H:2 * H] = out_s[B:2 * B]
        # final states, PyTorch order: index 2*layer + direction
        hn_ref[2 * layer_idx + 0] = h_sc[0:B, 0:H]
        hn_ref[2 * layer_idx + 1] = h_sc[B:2 * B, H:2 * H]
        cn_ref[2 * layer_idx + 0] = c_sc[0:B, :]
        cn_ref[2 * layer_idx + 1] = c_sc[B:2 * B, :]

    # ---- layer 0: recurrence writes fwd||bwd into the shared (TB,2H) scratch ----
    run_layer(gx0_sc, whh0_ref, l0_sc, 0)

    # ---- layer-1 input projection: one (TB,2H)@(2H,8H) matmul, hoisted ----
    gx1_sc[...] = (jnp.dot(l0_sc[...], w1_ref[...],
                           preferred_element_type=jnp.float32) + b1_ref[...])

    # ---- layer 1: writes its masked output rows directly into out_ref ----
    run_layer(gx1_sc, whh1_ref, out_ref, 1)


def encoder_lstm(x2d, kp, mask_v, mask_h, *, B, H, T):
    """Single fused pallas_call for the full 2-layer bidirectional LSTM."""
    TB = T * B
    kernel = functools.partial(_enc_bilstm_kernel, B=B, H=H, T=T)

    def full(shape):
        return pl.BlockSpec(shape, lambda i, _n=len(shape): (0,) * _n)

    grid_spec = pltpu.PrefetchScalarGridSpec(
        num_scalar_prefetch=0,
        grid=(1,),
        in_specs=[
            full((TB, BERT_DIM)),       # x, time-major rows
            full((BERT_DIM, 8 * H)),    # W_ih layer 0, fwd||bwd, gate-scaled
            full((1, 8 * H)),           # fused bias layer 0, gate-scaled
            full((2 * H, 4 * H)),       # W_hh layer 0, [fwd;bwd] stacked, gate-scaled
            full((2 * H, 8 * H)),       # W_ih layer 1, fwd||bwd, gate-scaled
            full((1, 8 * H)),           # fused bias layer 1, gate-scaled
            full((2 * H, 4 * H)),       # W_hh layer 1, [fwd;bwd] stacked, gate-scaled
            full((T, 2 * B, H)),        # validity mask (fwd rows / bwd rows), float
            full((T, 2 * B, 2 * H)),    # validity * block-diagonal mask for h-state
        ],
        out_specs=(
            full((TB, 2 * H)),                      # output (time-major, fwd||bwd)
            full((2 * NUM_LAYERS, B, H)),           # h_n
            full((2 * NUM_LAYERS, B, H)),           # c_n
        ),
        scratch_shapes=[
            pltpu.VMEM((2 * B, 2 * H), jnp.float32),    # block-diagonal h state
            pltpu.VMEM((2 * B, H), jnp.float32),        # c state
            pltpu.VMEM((TB, 2 * H), jnp.float32),       # layer-0 output (fwd||bwd)
            pltpu.VMEM((TB, 8 * H), jnp.float32),       # layer-0 gate inputs
            pltpu.VMEM((TB, 8 * H), jnp.float32),       # layer-1 gate inputs
        ],
    )

    return pl.pallas_call(
        kernel,
        out_shape=(
            jax.ShapeDtypeStruct((TB, 2 * H), jnp.float32),
            jax.ShapeDtypeStruct((2 * NUM_LAYERS, B, H), jnp.float32),
            jax.ShapeDtypeStruct((2 * NUM_LAYERS, B, H), jnp.float32),
        ),
        grid_spec=grid_spec,
        compiler_params=pltpu.CompilerParams(
            dimension_semantics=("arbitrary",)),
    )(x2d, kp["w0"], kp["b0"], kp["whh0"], kp["w1"], kp["b1"], kp["whh1"],
      mask_v, mask_h)


# ------------------------------ BERT stub (glue) ------------------------------
def bert_stub(bp, token_ids, attention_mask):
    """Deterministic stand-in producing last_hidden_state: (B, T, 768)."""
    del attention_mask  # stub has no attention; masking handled downstream by lengths
    B, T = token_ids.shape
    x = bp["tok_emb"][token_ids] + bp["pos_emb"][:T][None, :, :]
    mu = jnp.mean(x, axis=-1, keepdims=True)
    var = jnp.mean((x - mu) ** 2, axis=-1, keepdims=True)
    return (x - mu) * jax.lax.rsqrt(var + 1e-12) * bp["gamma"] + bp["beta"]


# -------------------- one-time kernel-layout weight prep ----------------------
def prepare_encoder_params(params):
    """Concatenate per-direction weights and pre-scale i/f/o gate columns by 0.5
    (sigmoid(z) = 0.5*tanh(z/2)+0.5 trick).  PyTorch gate order: i, f, g, o."""
    H = HIDDEN
    scale4 = jnp.concatenate([jnp.full((2 * H,), 0.5, jnp.float32),   # i, f
                              jnp.ones((H,), jnp.float32),            # g
                              jnp.full((H,), 0.5, jnp.float32)])      # o
    scale8 = jnp.concatenate([scale4, scale4])[None, :]
    scale4 = scale4[None, :]
    p0, p1 = params["lstm"]
    return {
        "bert": params["bert"],
        "w0":   jnp.concatenate([p0["w_ih_f"], p0["w_ih_b"]], axis=1) * scale8,
        "b0":   jnp.concatenate([p0["b_f"], p0["b_b"]], axis=1) * scale8,
        "whh0": jnp.concatenate([p0["w_hh_f"], p0["w_hh_b"]], axis=0) * scale4,
        "w1":   jnp.concatenate([p1["w_ih_f"], p1["w_ih_b"]], axis=1) * scale8,
        "b1":   jnp.concatenate([p1["b_f"], p1["b_b"]], axis=1) * scale8,
        "whh1": jnp.concatenate([p1["w_hh_f"], p1["w_hh_b"]], axis=0) * scale4,
    }


# ------------------------------ full encoder ---------------------------------
def encoder_forward(kparams, token_ids, lengths, attention_mask):
    H = HIDDEN
    embedded = bert_stub(kparams["bert"], token_ids, attention_mask)    # (B,T,768)
    B, T, _ = embedded.shape
    x2d = (jnp.transpose(embedded, (1, 0, 2))
           .astype(jnp.float32).reshape(T * B, BERT_DIM))               # time-major rows

    # Precomputed float masks (no per-step compare / lane-broadcast in the kernel):
    #   mask_v: plain validity per row (fwd rows: t<len; bwd rows: T-1-t<len)
    #   mask_h: validity * block-diagonal pattern for the (2B,2H) h-state update
    lens = lengths.astype(jnp.int32)
    t_idx = jnp.arange(T, dtype=jnp.int32)[:, None]                     # (T,1)
    vf = t_idx < lens[None, :]                                          # (T,B)
    vb = (T - 1 - t_idx) < lens[None, :]                                # (T,B)
    valid = jnp.concatenate([vf, vb], axis=1).astype(jnp.float32)       # (T,2B)
    mask_v = jnp.broadcast_to(valid[:, :, None], (T, 2 * B, H)).astype(jnp.float32)
    r = jnp.arange(2 * B)[:, None]
    c = jnp.arange(2 * H)[None, :]
    diag = ((r < B) == (c < H)).astype(jnp.float32)                     # (2B,2H)
    mask_h = valid[:, :, None] * diag[None, :, :]                       # (T,2B,2H)

    out2d, h_n, c_n = encoder_lstm(x2d, kparams, mask_v, mask_h, B=B, H=H, T=T)

    output = out2d.reshape(T, B, 2 * H).transpose(1, 0, 2)              # (B,T,2H)
    return output, (h_n, c_n)
    # inter-layer dropout is identity at inference


# ---------------------------- pure-JAX reference ------------------------------
def _ref_lstm_dir(x_tbd, w_ih, w_hh, bias, lengths, H, reverse):
    T, B, D = x_tbd.shape
    ts = jnp.arange(T)
    xs, t_act = (x_tbd[::-1], ts[::-1]) if reverse else (x_tbd, ts)
    hi = jax.lax.Precision.HIGHEST

    def step(carry, inp):
        h, c = carry
        x_t, ta = inp
        gates = (jnp.dot(x_t, w_ih, precision=hi)
                 + jnp.dot(h, w_hh, precision=hi) + bias)
        i = jax.nn.sigmoid(gates[:, :H])
        f = jax.nn.sigmoid(gates[:, H:2 * H])
        g = jnp.tanh(gates[:, 2 * H:3 * H])
        o = jax.nn.sigmoid(gates[:, 3 * H:])
        c_new = f * c + i * g
        h_new = o * jnp.tanh(c_new)
        valid = (lengths > ta)[:, None]
        h_u = jnp.where(valid, h_new, h)
        c_u = jnp.where(valid, c_new, c)
        out = jnp.where(valid, h_new, 0.0)
        return (h_u, c_u), out

    init = (jnp.zeros((B, H), jnp.float32), jnp.zeros((B, H), jnp.float32))
    (hN, cN), outs = jax.lax.scan(step, init, (xs, t_act))
    if reverse:
        outs = outs[::-1]
    return outs, hN, cN


def encoder_forward_ref(params, token_ids, lengths, attention_mask):
    embedded = bert_stub(params["bert"], token_ids, attention_mask)
    x = jnp.transpose(embedded, (1, 0, 2)).astype(jnp.float32)
    lens = lengths.astype(jnp.int32)
    h_list, c_list = [], []
    for l in range(NUM_LAYERS):
        p = params["lstm"][l]
        of, hf, cf = _ref_lstm_dir(x, p["w_ih_f"], p["w_hh_f"], p["b_f"][0],
                                   lens, HIDDEN, reverse=False)
        ob, hb, cb = _ref_lstm_dir(x, p["w_ih_b"], p["w_hh_b"], p["b_b"][0],
                                   lens, HIDDEN, reverse=True)
        x = jnp.concatenate([of, ob], axis=-1)
        h_list += [hf, hb]
        c_list += [cf, cb]
    return (jnp.transpose(x, (1, 0, 2)),
            (jnp.stack(h_list, 0), jnp.stack(c_list, 0)))


# --------------------------- parameter construction ---------------------------
def init_params(key):
    ks = jax.random.split(key, 4 + 8 * NUM_LAYERS)
    bert = {
        "tok_emb": 0.02 * jax.random.normal(ks[0], (VOCAB, BERT_DIM), jnp.float32),
        "pos_emb": 0.02 * jax.random.normal(ks[1], (SEQ, BERT_DIM), jnp.float32),
        "gamma": jnp.ones((BERT_DIM,), jnp.float32),
        "beta": jnp.zeros((BERT_DIM,), jnp.float32),
    }
    lstm = []
    bound = 1.0 / np.sqrt(HIDDEN)
    ki = 4
    for l in range(NUM_LAYERS):
        d_in = BERT_DIM if l == 0 else 2 * HIDDEN
        layer = {}
        for d, suf in ((0, "f"), (1, "b")):
            w_ih = jax.random.uniform(ks[ki + 0], (d_in, 4 * HIDDEN), jnp.float32,
                                      -bound, bound)
            w_hh = jax.random.uniform(ks[ki + 1], (HIDDEN, 4 * HIDDEN), jnp.float32,
                                      -bound, bound)
            b_ih = jax.random.uniform(ks[ki + 2], (4 * HIDDEN,), jnp.float32,
                                      -bound, bound)
            b_hh = jax.random.uniform(ks[ki + 3], (4 * HIDDEN,), jnp.float32,
                                      -bound, bound)
            layer[f"w_ih_{suf}"] = w_ih
            layer[f"w_hh_{suf}"] = w_hh
            layer[f"b_{suf}"] = (b_ih + b_hh)[None, :]     # fused bias, (1, 4H)
            ki += 4
        lstm.append(layer)
    return {"bert": bert, "lstm": lstm}


# ----------------------------------- main -------------------------------------
if __name__ == "__main__":
    key = jax.random.PRNGKey(0)
    k_param, k_tok = jax.random.split(key)

    params = init_params(k_param)
    kparams = prepare_encoder_params(params)   # one-time weight re-layout + gate scaling

    token_ids = jax.random.randint(k_tok, (BATCH, SEQ), 0, VOCAB, dtype=jnp.int32)
    lengths = jnp.array([8, 5, 8, 3], dtype=jnp.int32)        # max(lengths) == SEQ
    attention_mask = (jnp.arange(SEQ)[None, :] < lengths[:, None]).astype(jnp.int32)

    out, (h_n, c_n) = jax.jit(encoder_forward)(kparams, token_ids, lengths,
                                               attention_mask)
    jax.block_until_ready(out)
    jax.block_until_ready(h_n)
    jax.block_until_ready(c_n)

    # shape checks (matches PyTorch: output (B,T,2H), h/c (num_layers*2, B, H))
    assert out.shape == (BATCH, SEQ, 2 * HIDDEN)
    assert h_n.shape == (NUM_LAYERS * 2, BATCH, HIDDEN)
    assert c_n.shape == (NUM_LAYERS * 2, BATCH, HIDDEN)

    # correctness against pure-JAX reference (unscaled weights, standard sigmoid/tanh)
    out_r, (h_r, c_r) = jax.jit(encoder_forward_ref)(params, token_ids, lengths,
                                                     attention_mask)
    np.testing.assert_allclose(np.asarray(out), np.asarray(out_r),
                               rtol=2e-3, atol=2e-3)
    np.testing.assert_allclose(np.asarray(h_n), np.asarray(h_r),
                               rtol=2e-3, atol=2e-3)
    np.testing.assert_allclose(np.asarray(c_n), np.asarray(c_r),
                               rtol=2e-3, atol=2e-3)

    print("KERNEL_OK")
</pallas_src>

<mosaic_0001>
module attributes {stable_mosaic.version = 11 : i64} {
  func.func @_enc_bilstm_kernel(%arg0: i32, %arg1: memref<32x768xf32, #tpu.memory_space<vmem>>, %arg2: memref<768x256xf32, #tpu.memory_space<vmem>>, %arg3: memref<1x256xf32, #tpu.memory_space<vmem>>, %arg4: memref<64x128xf32, #tpu.memory_space<vmem>>, %arg5: memref<64x256xf32, #tpu.memory_space<vmem>>, %arg6: memref<1x256xf32, #tpu.memory_space<vmem>>, %arg7: memref<64x128xf32, #tpu.memory_space<vmem>>, %arg8: memref<8x8x32xf32, #tpu.memory_space<vmem>>, %arg9: memref<8x8x64xf32, #tpu.memory_space<vmem>>, %arg10: memref<32x64xf32, #tpu.memory_space<vmem>>, %arg11: memref<4x4x32xf32, #tpu.memory_space<vmem>>, %arg12: memref<4x4x32xf32, #tpu.memory_space<vmem>>, %arg13: memref<8x64xf32, #tpu.memory_space<vmem>>, %arg14: memref<8x32xf32, #tpu.memory_space<vmem>>, %arg15: memref<32x64xf32, #tpu.memory_space<vmem>>, %arg16: memref<32x256xf32, #tpu.memory_space<vmem>>, %arg17: memref<32x256xf32, #tpu.memory_space<vmem>>) attributes {dimension_semantics = [#tpu.dimension_semantics<arbitrary>], iteration_bounds = array<i64: 1>, scalar_prefetch = 0 : i64, scratch_operands = 5 : i64, tpu.core_type = #tpu.core_type<tc>, window_params = [{pipeline_mode = #tpu.pipeline_mode<synchronous>, transform_indices = @transform_0, window_bounds = array<i64: 32, 768>}, {pipeline_mode = #tpu.pipeline_mode<synchronous>, transform_indices = @transform_1, window_bounds = array<i64: 768, 256>}, {pipeline_mode = #tpu.pipeline_mode<synchronous>, transform_indices = @transform_2, window_bounds = array<i64: 1, 256>}, {pipeline_mode = #tpu.pipeline_mode<synchronous>, transform_indices = @transform_3, window_bounds = array<i64: 64, 128>}, {pipeline_mode = #tpu.pipeline_mode<synchronous>, transform_indices = @transform_4, window_bounds = array<i64: 64, 256>}, {pipeline_mode = #tpu.pipeline_mode<synchronous>, transform_indices = @transform_5, window_bounds = array<i64: 1, 256>}, {pipeline_mode = #tpu.pipeline_mode<synchronous>, transform_indices = @transform_6, window_bounds = array<i64: 64, 128>}, {pipeline_mode = #tpu.pipeline_mode<synchronous>, transform_indices = @transform_7, window_bounds = array<i64: 8, 8, 32>}, {pipeline_mode = #tpu.pipeline_mode<synchronous>, transform_indices = @transform_8, window_bounds = array<i64: 8, 8, 64>}, {pipeline_mode = #tpu.pipeline_mode<synchronous>, transform_indices = @transform_9, window_bounds = array<i64: 32, 64>}, {pipeline_mode = #tpu.pipeline_mode<synchronous>, transform_indices = @transform_10, window_bounds = array<i64: 4, 4, 32>}, {pipeline_mode = #tpu.pipeline_mode<synchronous>, transform_indices = @transform_11, window_bounds = array<i64: 4, 4, 32>}]} {
    %c0 = arith.constant 0 : index
    %c0_0 = arith.constant 0 : index
    %0 = vector.load %arg1[%c0, %c0_0] : memref<32x768xf32, #tpu.memory_space<vmem>>, vector<32x768xf32>
    %c0_1 = arith.constant 0 : index
    %c0_2 = arith.constant 0 : index
    %1 = vector.load %arg2[%c0_1, %c0_2] : memref<768x256xf32, #tpu.memory_space<vmem>>, vector<768x256xf32>
    %cst = arith.constant dense<0.000000e+00> : vector<32x256xf32>
    %2 = tpu.matmul %0, %1, %cst {dimension_numbers = #tpu.dot_dimension_numbers<[1], [0], [0], [1], [0, 0, 1, 1], [], []>} : vector<32x768xf32>, vector<768x256xf32>, vector<32x256xf32> -> vector<32x256xf32>
    %c0_3 = arith.constant 0 : index
    %c0_4 = arith.constant 0 : index
    %3 = vector.load %arg3[%c0_3, %c0_4] : memref<1x256xf32, #tpu.memory_space<vmem>>, vector<1x256xf32>
    %4 = vector.broadcast %3 : vector<1x256xf32> to vector<32x256xf32>
    %5 = arith.addf %2, %4 : vector<32x256xf32>
    %c0_5 = arith.constant 0 : index
    %c0_6 = arith.constant 0 : index
    %6 = vector.load %arg16[%c0_5, %c0_6] : memref<32x256xf32, #tpu.memory_space<vmem>>, vector<32x256xf32>
    tpu.vector_store %arg16[%c0_5, %c0_6], %5 {strides = array<i32>} : memref<32x256xf32, #tpu.memory_space<vmem>>, vector<32x256xf32>,
    %cst_7 = arith.constant 0.000000e+00 : f32
    %7 = vector.broadcast %cst_7 : f32 to vector<8x64xf32>
    %c0_8 = arith.constant 0 : index
    %c0_9 = arith.constant 0 : index
    %8 = vector.load %arg13[%c0_8, %c0_9] : memref<8x64xf32, #tpu.memory_space<vmem>>, vector<8x64xf32>
    tpu.vector_store %arg13[%c0_8, %c0_9], %7 {strides = array<i32>} : memref<8x64xf32, #tpu.memory_space<vmem>>, vector<8x64xf32>,
    %cst_10 = arith.constant 0.000000e+00 : f32
    %9 = vector.broadcast %cst_10 : f32 to vector<8x32xf32>
    %c0_11 = arith.constant 0 : index
    %c0_12 = arith.constant 0 : index
    %10 = vector.load %arg14[%c0_11, %c0_12] : memref<8x32xf32, #tpu.memory_space<vmem>>, vector<8x32xf32>
    tpu.vector_store %arg14[%c0_11, %c0_12], %9 {strides = array<i32>} : memref<8x32xf32, #tpu.memory_space<vmem>>, vector<8x32xf32>,
    %c0_13 = arith.constant 0 : index
    %c0_14 = arith.constant 0 : index
    %11 = vector.load %arg4[%c0_13, %c0_14] : memref<64x128xf32, #tpu.memory_space<vmem>>, vector<64x128xf32>
    %c0_15 = arith.constant 0 : index
    %c0_16 = arith.constant 0 : index
    %12 = vector.load %arg16[%c0_15, %c0_16] : memref<32x256xf32, #tpu.memory_space<vmem>>, vector<4x128xf32>
    %c28 = arith.constant 28 : index
    %c128 = arith.constant 128 : index
    %13 = vector.load %arg16[%c28, %c128] : memref<32x256xf32, #tpu.memory_space<vmem>>, vector<4x128xf32>
    %14 = tpu.concatenate %12, %13 in 0 : vector<4x128xf32>, vector<4x128xf32> -> vector<8x128xf32>
    %c0_17 = arith.constant 0 : index
    %c0_18 = arith.constant 0 : index
    %15 = vector.load %arg13[%c0_17, %c0_18] : memref<8x64xf32, #tpu.memory_space<vmem>>, vector<8x64xf32>
    %c0_19 = arith.constant 0 : index
    %c0_20 = arith.constant 0 : index
    %16 = vector.load %arg14[%c0_19, %c0_20] : memref<8x32xf32, #tpu.memory_space<vmem>>, vector<8x32xf32>
    %cst_21 = arith.constant dense<0.000000e+00> : vector<8x128xf32>
    %17 = tpu.matmul %15, %11, %cst_21 {dimension_numbers = #tpu.dot_dimension_numbers<[1], [0], [0], [1], [0, 0, 1, 1], [], []>} : vector<8x64xf32>, vector<64x128xf32>, vector<8x128xf32> -> vector<8x128xf32>
    %18 = arith.addf %14, %17 : vector<8x128xf32>
    %19 = math.tanh %18 : vector<8x128xf32>
    %cst_22 = arith.constant 5.000000e-01 : f32
    %20 = vector.broadcast %cst_22 : f32 to vector<8x128xf32>
    %21 = arith.mulf %20, %19 : vector<8x128xf32>
    %cst_23 = arith.constant 5.000000e-01 : f32
    %22 = vector.broadcast %cst_23 : f32 to vector<8x128xf32>
    %23 = arith.addf %21, %22 : vector<8x128xf32>
    %24 = vector.extract_strided_slice %23 {offsets = [0, 0], sizes = [8, 32], strides = [1, 1]} : vector<8x128xf32> to vector<8x32xf32>
    %25 = vector.extract_strided_slice %23 {offsets = [0, 32], sizes = [8, 32], strides = [1, 1]} : vector<8x128xf32> to vector<8x32xf32>
    %26 = vector.extract_strided_slice %19 {offsets = [0, 64], sizes = [8, 32], strides = [1, 1]} : vector<8x128xf32> to vector<8x32xf32>
    %27 = vector.extract_strided_slice %23 {offsets = [0, 96], sizes = [8, 32], strides = [1, 1]} : vector<8x128xf32> to vector<8x32xf32>
    %28 = arith.mulf %25, %16 : vector<8x32xf32>
    %29 = arith.mulf %24, %26 : vector<8x32xf32>
    %30 = arith.addf %28, %29 : vector<8x32xf32>
    %31 = math.tanh %30 : vector<8x32xf32>
    %32 = arith.mulf %27, %31 : vector<8x32xf32>
    %c0_24 = arith.constant 0 : index
    %c0_25 = arith.constant 0 : index
    %c0_26 = arith.constant 0 : index
    %33 = vector.load %arg8[%c0_24, %c0_25, %c0_26] : memref<8x8x32xf32, #tpu.memory_space<vmem>>, vector<1x8x32xf32>
    %34 = vector.shape_cast %33 : vector<1x8x32xf32> to vector<8x32xf32>
    %c0_27 = arith.constant 0 : index
    %c0_28 = arith.constant 0 : index
    %c0_29 = arith.constant 0 : index
    %35 = vector.load %arg9[%c0_27, %c0_28, %c0_29] : memref<8x8x64xf32, #tpu.memory_space<vmem>>, vector<1x8x64xf32>
    %36 = vector.shape_cast %35 : vector<1x8x64xf32> to vector<8x64xf32>
    %37 = arith.subf %30, %16 : vector<8x32xf32>
    %38 = arith.mulf %34, %37 : vector<8x32xf32>
    %39 = arith.addf %16, %38 : vector<8x32xf32>
    %c0_30 = arith.constant 0 : index
    %c0_31 = arith.constant 0 : index
    %40 = vector.load %arg14[%c0_30, %c0_31] : memref<8x32xf32, #tpu.memory_space<vmem>>, vector<8x32xf32>
    tpu.vector_store %arg14[%c0_30, %c0_31], %39 {strides = array<i32>} : memref<8x32xf32, #tpu.memory_space<vmem>>, vector<8x32xf32>,
    %41 = tpu.concatenate %32, %32 in 1 : vector<8x32xf32>, vector<8x32xf32> -> vector<8x64xf32>
    %42 = arith.subf %41, %15 : vector<8x64xf32>
    %43 = arith.mulf %36, %42 : vector<8x64xf32>
    %44 = arith.addf %15, %43 : vector<8x64xf32>
    %c0_32 = arith.constant 0 : index
    %c0_33 = arith.constant 0 : index
    %45 = vector.load %arg13[%c0_32, %c0_33] : memref<8x64xf32, #tpu.memory_space<vmem>>, vector<8x64xf32>
    tpu.vector_store %arg13[%c0_32, %c0_33], %44 {strides = array<i32>} : memref<8x64xf32, #tpu.memory_space<vmem>>, vector<8x64xf32>,
    %46 = arith.mulf %34, %32 : vector<8x32xf32>
    %47 = vector.extract_strided_slice %46 {offsets = [0, 0], sizes = [4, 32], strides = [1, 1]} : vector<8x32xf32> to vector<4x32xf32>
    %c0_34 = arith.constant 0 : index
    %c0_35 = arith.constant 0 : index
    %48 = vector.load %arg15[%c0_34, %c0_35] : memref<32x64xf32, #tpu.memory_space<vmem>>, vector<4x32xf32>
    tpu.vector_store %arg15[%c0_34, %c0_35], %47 {strides = array<i32>} : memref<32x64xf32, #tpu.memory_space<vmem>>, vector<4x32xf32>,
    %49 = vector.extract_strided_slice %46 {offsets = [4, 0], sizes = [4, 32], strides = [1, 1]} : vector<8x32xf32> to vector<4x32xf32>
    %c28_36 = arith.constant 28 : index
    %c32 = arith.constant 32 : index
    %50 = vector.load %arg15[%c28_36, %c32] : memref<32x64xf32, #tpu.memory_space<vmem>>, vector<4x32xf32>
    tpu.vector_store %arg15[%c28_36, %c32], %49 {strides = array<i32>} : memref<32x64xf32, #tpu.memory_space<vmem>>, vector<4x32xf32>,
    %c4 = arith.constant 4 : index
    %c0_37 = arith.constant 0 : index
    %51 = vector.load %arg16[%c4, %c0_37] : memref<32x256xf32, #tpu.memory_space<vmem>>, vector<4x128xf32>
    %c24 = arith.constant 24 : index
    %c128_38 = arith.constant 128 : index
    %52 = vector.load %arg16[%c24, %c128_38] : memref<32x256xf32, #tpu.memory_space<vmem>>, vector<4x128xf32>
    %53 = tpu.concatenate %51, %52 in 0 : vector<4x128xf32>, vector<4x128xf32> -> vector<8x128xf32>
    %c0_39 = arith.constant 0 : index
    %c0_40 = arith.constant 0 : index
    %54 = vector.load %arg13[%c0_39, %c0_40] : memref<8x64xf32, #tpu.memory_space<vmem>>, vector<8x64xf32>
    %c0_41 = arith.constant 0 : index
    %c0_42 = arith.constant 0 : index
    %55 = vector.load %arg14[%c0_41, %c0_42] : memref<8x32xf32, #tpu.memory_space<vmem>>, vector<8x32xf32>
    %cst_43 = arith.constant dense<0.000000e+00> : vector<8x128xf32>
    %56 = tpu.matmul %54, %11, %cst_43 {dimension_numbers = #tpu.dot_dimension_numbers<[1], [0], [0], [1], [0, 0, 1, 1], [], []>} : vector<8x64xf32>, vector<64x128xf32>, vector<8x128xf32> -> vector<8x128xf32>
    %57 = arith.addf %53, %56 : vector<8x128xf32>
    %58 = math.tanh %57 : vector<8x128xf32>
    %cst_44 = arith.constant 5.000000e-01 : f32
    %59 = vector.broadcast %cst_44 : f32 to vector<8x128xf32>
    %60 = arith.mulf %59, %58 : vector<8x128xf32>
    %cst_45 = arith.constant 5.000000e-01 : f32
    %61 = vector.broadcast %cst_45 : f32 to vector<8x128xf32>
    %62 = arith.addf %60, %61 : vector<8x128xf32>
    %63 = vector.extract_strided_slice %62 {offsets = [0, 0], sizes = [8, 32], strides = [1, 1]} : vector<8x128xf32> to vector<8x32xf32>
    %64 = vector.extract_strided_slice %62 {offsets = [0, 32], sizes = [8, 32], strides = [1, 1]} : vector<8x128xf32> to vector<8x32xf32>
    %65 = vector.extract_strided_slice %58 {offsets = [0, 64], sizes = [8, 32], strides = [1, 1]} : vector<8x128xf32> to vector<8x32xf32>
    %66 = vector.extract_strided_slice %62 {offsets = [0, 96], sizes = [8, 32], strides = [1, 1]} : vector<8x128xf32> to vector<8x32xf32>
    %67 = arith.mulf %64, %55 : vector<8x32xf32>
    %68 = arith.mulf %63, %65 : vector<8x32xf32>
    %69 = arith.addf %67, %68 : vector<8x32xf32>
    %70 = math.tanh %69 : vector<8x32xf32>
    %71 = arith.mulf %66, %70 : vector<8x32xf32>
    %c1 = arith.constant 1 : index
    %c0_46 = arith.constant 0 : index
    %c0_47 = arith.constant 0 : index
    %72 = vector.load %arg8[%c1, %c0_46, %c0_47] : memref<8x8x32xf32, #tpu.memory_space<vmem>>, vector<1x8x32xf32>
    %73 = vector.shape_cast %72 : vector<1x8x32xf32> to vector<8x32xf32>
    %c1_48 = arith.constant 1 : index
    %c0_49 = arith.constant 0 : index
    %c0_50 = arith.constant 0 : index
    %74 = vector.load %arg9[%c1_48, %c0_49, %c0_50] : memref<8x8x64xf32, #tpu.memory_space<vmem>>, vector<1x8x64xf32>
    %75 = vector.shape_cast %74 : vector<1x8x64xf32> to vector<8x64xf32>
    %76 = arith.subf %69, %55 : vector<8x32xf32>
    %77 = arith.mulf %73, %76 : vector<8x32xf32>
    %78 = arith.addf %55, %77 : vector<8x32xf32>
    %c0_51 = arith.constant 0 : index
    %c0_52 = arith.constant 0 : index
    %79 = vector.load %arg14[%c0_51, %c0_52] : memref<8x32xf32, #tpu.memory_space<vmem>>, vector<8x32xf32>
    tpu.vector_store %arg14[%c0_51, %c0_52], %78 {strides = array<i32>} : memref<8x32xf32, #tpu.memory_space<vmem>>, vector<8x32xf32>,
    %80 = tpu.concatenate %71, %71 in 1 : vector<8x32xf32>, vector<8x32xf32> -> vector<8x64xf32>
    %81 = arith.subf %80, %54 : vector<8x64xf32>
    %82 = arith.mulf %75, %81 : vector<8x64xf32>
    %83 = arith.addf %54, %82 : vector<8x64xf32>
    %c0_53 = arith.constant 0 : index
    %c0_54 = arith.constant 0 : index
    %84 = vector.load %arg13[%c0_53, %c0_54] : memref<8x64xf32, #tpu.memory_space<vmem>>, vector<8x64xf32>
    tpu.vector_store %arg13[%c0_53, %c0_54], %83 {strides = array<i32>} : memref<8x64xf32, #tpu.memory_space<vmem>>, vector<8x64xf32>,
    %85 = arith.mulf %73, %71 : vector<8x32xf32>
    %86 = vector.extract_strided_slice %85 {offsets = [0, 0], sizes = [4, 32], strides = [1, 1]} : vector<8x32xf32> to vector<4x32xf32>
    %c4_55 = arith.constant 4 : index
    %c0_56 = arith.constant 0 : index
    %87 = vector.load %arg15[%c4_55, %c0_56] : memref<32x64xf32, #tpu.memory_space<vmem>>, vector<4x32xf32>
    tpu.vector_store %arg15[%c4_55, %c0_56], %86 {strides = array<i32>} : memref<32x64xf32, #tpu.memory_space<vmem>>, vector<4x32xf32>,
    %88 = vector.extract_strided_slice %85 {offsets = [4, 0], sizes = [4, 32], strides = [1, 1]} : vector<8x32xf32> to vector<4x32xf32>
    %c24_57 = arith.constant 24 : index
    %c32_58 = arith.constant 32 : index
    %89 = vector.load %arg15[%c24_57, %c32_58] : memref<32x64xf32, #tpu.memory_space<vmem>>, vector<4x32xf32>
    tpu.vector_store %arg15[%c24_57, %c32_58], %88 {strides = array<i32>} : memref<32x64xf32, #tpu.memory_space<vmem>>, vector<4x32xf32>,
    %c8 = arith.constant 8 : index
    %c0_59 = arith.constant 0 : index
    %90 = vector.load %arg16[%c8, %c0_59] : memref<32x256xf32, #tpu.memory_space<vmem>>, vector<4x128xf32>
    %c20 = arith.constant 20 : index
    %c128_60 = arith.constant 128 : index
    %91 = vector.load %arg16[%c20, %c128_60] : memref<32x256xf32, #tpu.memory_space<vmem>>, vector<4x128xf32>
    %92 = tpu.concatenate %90, %91 in 0 : vector<4x128xf32>, vector<4x128xf32> -> vector<8x128xf32>
    %c0_61 = arith.constant 0 : index
    %c0_62 = arith.constant 0 : index
    %93 = vector.load %arg13[%c0_61, %c0_62] : memref<8x64xf32, #tpu.memory_space<vmem>>, vector<8x64xf32>
    %c0_63 = arith.constant 0 : index
    %c0_64 = arith.constant 0 : index
    %94 = vector.load %arg14[%c0_63, %c0_64] : memref<8x32xf32, #tpu.memory_space<vmem>>, vector<8x32xf32>
    %cst_65 = arith.constant dense<0.000000e+00> : vector<8x128xf32>
    %95 = tpu.matmul %93, %11, %cst_65 {dimension_numbers = #tpu.dot_dimension_numbers<[1], [0], [0], [1], [0, 0, 1, 1], [], []>} : vector<8x64xf32>, vector<64x128xf32>, vector<8x128xf32> -> vector<8x128xf32>
    %96 = arith.addf %92, %95 : vector<8x128xf32>
    %97 = math.tanh %96 : vector<8x128xf32>
    %cst_66 = arith.constant 5.000000e-01 : f32
    %98 = vector.broadcast %cst_66 : f32 to vector<8x128xf32>
    %99 = arith.mulf %98, %97 : vector<8x128xf32>
    %cst_67 = arith.constant 5.000000e-01 : f32
    %100 = vector.broadcast %cst_67 : f32 to vector<8x128xf32>
    %101 = arith.addf %99, %100 : vector<8x128xf32>
    %102 = vector.extract_strided_slice %101 {offsets = [0, 0], sizes = [8, 32], strides = [1, 1]} : vector<8x128xf32> to vector<8x32xf32>
    %103 = vector.extract_strided_slice %101 {offsets = [0, 32], sizes = [8, 32], strides = [1, 1]} : vector<8x128xf32> to vector<8x32xf32>
    %104 = vector.extract_strided_slice %97 {offsets = [0, 64], sizes = [8, 32], strides = [1, 1]} : vector<8x128xf32> to vector<8x32xf32>
    %105 = vector.extract_strided_slice %101 {offsets = [0, 96], sizes = [8, 32], strides = [1, 1]} : vector<8x128xf32> to vector<8x32xf32>
    %106 = arith.mulf %103, %94 : vector<8x32xf32>
    %107 = arith.mulf %102, %104 : vector<8x32xf32>
    %108 = arith.addf %106, %107 : vector<8x32xf32>
    %109 = math.tanh %108 : vector<8x32xf32>
    %110 = arith.mulf %105, %109 : vector<8x32xf32>
    %c2 = arith.constant 2 : index
    %c0_68 = arith.constant 0 : index
    %c0_69 = arith.constant 0 : index
    %111 = vector.load %arg8[%c2, %c0_68, %c0_69] : memref<8x8x32xf32, #tpu.memory_space<vmem>>, vector<1x8x32xf32>
    %112 = vector.shape_cast %111 : vector<1x8x32xf32> to vector<8x32xf32>
    %c2_70 = arith.constant 2 : index
    %c0_71 = arith.constant 0 : index
    %c0_72 = arith.constant 0 : index
    %113 = vector.load %arg9[%c2_70, %c0_71, %c0_72] : memref<8x8x64xf32, #tpu.memory_space<vmem>>, vector<1x8x64xf32>
    %114 = vector.shape_cast %113 : vector<1x8x64xf32> to vector<8x64xf32>
    %115 = arith.subf %108, %94 : vector<8x32xf32>
    %116 = arith.mulf %112, %115 : vector<8x32xf32>
    %117 = arith.addf %94, %116 : vector<8x32xf32>
    %c0_73 = arith.constant 0 : index
    %c0_74 = arith.constant 0 : index
    %118 = vector.load %arg14[%c0_73, %c0_74] : memref<8x32xf32, #tpu.memory_space<vmem>>, vector<8x32xf32>
    tpu.vector_store %arg14[%c0_73, %c0_74], %117 {strides = array<i32>} : memref<8x32xf32, #tpu.memory_space<vmem>>, vector<8x32xf32>,
    %119 = tpu.concatenate %110, %110 in 1 : vector<8x32xf32>, vector<8x32xf32> -> vector<8x64xf32>
    %120 = arith.subf %119, %93 : vector<8x64xf32>
    %121 = arith.mulf %114, %120 : vector<8x64xf32>
    %122 = arith.addf %93, %121 : vector<8x64xf32>
    %c0_75 = arith.constant 0 : index
    %c0_76 = arith.constant 0 : index
    %123 = vector.load %arg13[%c0_75, %c0_76] : memref<8x64xf32, #tpu.memory_space<vmem>>, vector<8x64xf32>
    tpu.vector_store %arg13[%c0_75, %c0_76], %122 {strides = array<i32>} : memref<8x64xf32, #tpu.memory_space<vmem>>, vector<8x64xf32>,
    %124 = arith.mulf %112, %110 : vector<8x32xf32>
    %125 = vector.extract_strided_slice %124 {offsets = [0, 0], sizes = [4, 32], strides = [1, 1]} : vector<8x32xf32> to vector<4x32xf32>
    %c8_77 = arith.constant 8 : index
    %c0_78 = arith.constant 0 : index
    %126 = vector.load %arg15[%c8_77, %c0_78] : memref<32x64xf32, #tpu.memory_space<vmem>>, vector<4x32xf32>
    tpu.vector_store %arg15[%c8_77, %c0_78], %125 {strides = array<i32>} : memref<32x64xf32, #tpu.memory_space<vmem>>, vector<4x32xf32>,
    %127 = vector.extract_strided_slice %124 {offsets = [4, 0], sizes = [4, 32], strides = [1, 1]} : vector<8x32xf32> to vector<4x32xf32>
    %c20_79 = arith.constant 20 : index
    %c32_80 = arith.constant 32 : index
    %128 = vector.load %arg15[%c20_79, %c32_80] : memref<32x64xf32, #tpu.memory_space<vmem>>, vector<4x32xf32>
    tpu.vector_store %arg15[%c20_79, %c32_80], %127 {strides = array<i32>} : memref<32x64xf32, #tpu.memory_space<vmem>>, vector<4x32xf32>,
    %c12 = arith.constant 12 : index
    %c0_81 = arith.constant 0 : index
    %129 = vector.load %arg16[%c12, %c0_81] : memref<32x256xf32, #tpu.memory_space<vmem>>, vector<4x128xf32>
    %c16 = arith.constant 16 : index
    %c128_82 = arith.constant 128 : index
    %130 = vector.load %arg16[%c16, %c128_82] : memref<32x256xf32, #tpu.memory_space<vmem>>, vector<4x128xf32>
    %131 = tpu.concatenate %129, %130 in 0 : vector<4x128xf32>, vector<4x128xf32> -> vector<8x128xf32>
    %c0_83 = arith.constant 0 : index
    %c0_84 = arith.constant 0 : index
    %132 = vector.load %arg13[%c0_83, %c0_84] : memref<8x64xf32, #tpu.memory_space<vmem>>, vector<8x64xf32>
    %c0_85 = arith.constant 0 : index
    %c0_86 = arith.constant 0 : index
    %133 = vector.load %arg14[%c0_85, %c0_86] : memref<8x32xf32, #tpu.memory_space<vmem>>, vector<8x32xf32>
    %cst_87 = arith.constant dense<0.000000e+00> : vector<8x128xf32>
    %134 = tpu.matmul %132, %11, %cst_87 {dimension_numbers = #tpu.dot_dimension_numbers<[1], [0], [0], [1], [0, 0, 1, 1], [], []>} : vector<8x64xf32>, vector<64x128xf32>, vector<8x128xf32> -> vector<8x128xf32>
    %135 = arith.addf %131, %134 : vector<8x128xf32>
    %136 = math.tanh %135 : vector<8x128xf32>
    %cst_88 = arith.constant 5.000000e-01 : f32
    %137 = vector.broadcast %cst_88 : f32 to vector<8x128xf32>
    %138 = arith.mulf %137, %136 : vector<8x128xf32>
    %cst_89 = arith.constant 5.000000e-01 : f32
    %139 = vector.broadcast %cst_89 : f32 to vector<8x128xf32>
    %140 = arith.addf %138, %139 : vector<8x128xf32>
    %141 = vector.extract_strided_slice %140 {offsets = [0, 0], sizes = [8, 32], strides = [1, 1]} : vector<8x128xf32> to vector<8x32xf32>
    %142 = vector.extract_strided_slice %140 {offsets = [0, 32], sizes = [8, 32], strides = [1, 1]} : vector<8x128xf32> to vector<8x32xf32>
    %143 = vector.extract_strided_slice %136 {offsets = [0, 64], sizes = [8, 32], strides = [1, 1]} : vector<8x128xf32> to vector<8x32xf32>
    %144 = vector.extract_strided_slice %140 {offsets = [0, 96], sizes = [8, 32], strides = [1, 1]} : vector<8x128xf32> to vector<8x32xf32>
    %145 = arith.mulf %142, %133 : vector<8x32xf32>
    %146 = arith.mulf %141, %143 : vector<8x32xf32>
    %147 = arith.addf %145, %146 : vector<8x32xf32>
    %148 = math.tanh %147 : vector<8x32xf32>
    %149 = arith.mulf %144, %148 : vector<8x32xf32>
    %c3 = arith.constant 3 : index
    %c0_90 = arith.constant 0 : index
    %c0_91 = arith.constant 0 : index
    %150 = vector.load %arg8[%c3, %c0_90, %c0_91] : memref<8x8x32xf32, #tpu.memory_space<vmem>>, vector<1x8x32xf32>
    %151 = vector.shape_cast %150 : vector<1x8x32xf32> to vector<8x32xf32>
    %c3_92 = arith.constant 3 : index
    %c0_93 = arith.constant 0 : index
    %c0_94 = arith.constant 0 : index
    %152 = vector.load %arg9[%c3_92, %c0_93, %c0_94] : memref<8x8x64xf32, #tpu.memory_space<vmem>>, vector<1x8x64xf32>
    %153 = vector.shape_cast %152 : vector<1x8x64xf32> to vector<8x64xf32>
    %154 = arith.subf %147, %133 : vector<8x32xf32>
    %155 = arith.mulf %151, %154 : vector<8x32xf32>
    %156 = arith.addf %133, %155 : vector<8x32xf32>
    %c0_95 = arith.constant 0 : index
    %c0_96 = arith.constant 0 : index
    %157 = vector.load %arg14[%c0_95, %c0_96] : memref<8x32xf32, #tpu.memory_space<vmem>>, vector<8x32xf32>
    tpu.vector_store %arg14[%c0_95, %c0_96], %156 {strides = array<i32>} : memref<8x32xf32, #tpu.memory_space<vmem>>, vector<8x32xf32>,
    %158 = tpu.concatenate %149, %149 in 1 : vector<8x32xf32>, vector<8x32xf32> -> vector<8x64xf32>
    %159 = arith.subf %158, %132 : vector<8x64xf32>
    %160 = arith.mulf %153, %159 : vector<8x64xf32>
    %161 = arith.addf %132, %160 : vector<8x64xf32>
    %c0_97 = arith.constant 0 : index
    %c0_98 = arith.constant 0 : index
    %162 = vector.load %arg13[%c0_97, %c0_98] : memref<8x64xf32, #tpu.memory_space<vmem>>, vector<8x64xf32>
    tpu.vector_store %arg13[%c0_97, %c0_98], %161 {strides = array<i32>} : memref<8x64xf32, #tpu.memory_space<vmem>>, vector<8x64xf32>,
    %163 = arith.mulf %151, %149 : vector<8x32xf32>
    %164 = vector.extract_strided_slice %163 {offsets = [0, 0], sizes = [4, 32], strides = [1, 1]} : vector<8x32xf32> to vector<4x32xf32>
    %c12_99 = arith.constant 12 : index
    %c0_100 = arith.constant 0 : index
    %165 = vector.load %arg15[%c12_99, %c0_100] : memref<32x64xf32, #tpu.memory_space<vmem>>, vector<4x32xf32>
    tpu.vector_store %arg15[%c12_99, %c0_100], %164 {strides = array<i32>} : memref<32x64xf32, #tpu.memory_space<vmem>>, vector<4x32xf32>,
    %166 = vector.extract_strided_slice %163 {offsets = [4, 0], sizes = [4, 32], strides = [1, 1]} : vector<8x32xf32> to vector<4x32xf32>
    %c16_101 = arith.constant 16 : index
    %c32_102 = arith.constant 32 : index
    %167 = vector.load %arg15[%c16_101, %c32_102] : memref<32x64xf32, #tpu.memory_space<vmem>>, vector<4x32xf32>
    tpu.vector_store %arg15[%c16_101, %c32_102], %166 {strides = array<i32>} : memref<32x64xf32, #tpu.memory_space<vmem>>, vector<4x32xf32>,
    %c16_103 = arith.constant 16 : index
    %c0_104 = arith.constant 0 : index
    %168 = vector.load %arg16[%c16_103, %c0_104] : memref<32x256xf32, #tpu.memory_space<vmem>>, vector<4x128xf32>
    %c12_105 = arith.constant 12 : index
    %c128_106 = arith.constant 128 : index
    %169 = vector.load %arg16[%c12_105, %c128_106] : memref<32x256xf32, #tpu.memory_space<vmem>>, vector<4x128xf32>
    %170 = tpu.concatenate %168, %169 in 0 : vector<4x128xf32>, vector<4x128xf32> -> vector<8x128xf32>
    %c0_107 = arith.constant 0 : index
    %c0_108 = arith.constant 0 : index
    %171 = vector.load %arg13[%c0_107, %c0_108] : memref<8x64xf32, #tpu.memory_space<vmem>>, vector<8x64xf32>
    %c0_109 = arith.constant 0 : index
    %c0_110 = arith.constant 0 : index
    %172 = vector.load %arg14[%c0_109, %c0_110] : memref<8x32xf32, #tpu.memory_space<vmem>>, vector<8x32xf32>
    %cst_111 = arith.constant dense<0.000000e+00> : vector<8x128xf32>
    %173 = tpu.matmul %171, %11, %cst_111 {dimension_numbers = #tpu.dot_dimension_numbers<[1], [0], [0], [1], [0, 0, 1, 1], [], []>} : vector<8x64xf32>, vector<64x128xf32>, vector<8x128xf32> -> vector<8x128xf32>
    %174 = arith.addf %170, %173 : vector<8x128xf32>
    %175 = math.tanh %174 : vector<8x128xf32>
    %cst_112 = arith.constant 5.000000e-01 : f32
    %176 = vector.broadcast %cst_112 : f32 to vector<8x128xf32>
    %177 = arith.mulf %176, %175 : vector<8x128xf32>
    %cst_113 = arith.constant 5.000000e-01 : f32
    %178 = vector.broadcast %cst_113 : f32 to vector<8x128xf32>
    %179 = arith.addf %177, %178 : vector<8x128xf32>
    %180 = vector.extract_strided_slice %179 {offsets = [0, 0], sizes = [8, 32], strides = [1, 1]} : vector<8x128xf32> to vector<8x32xf32>
    %181 = vector.extract_strided_slice %179 {offsets = [0, 32], sizes = [8, 32], strides = [1, 1]} : vector<8x128xf32> to vector<8x32xf32>
    %182 = vector.extract_strided_slice %175 {offsets = [0, 64], sizes = [8, 32], strides = [1, 1]} : vector<8x128xf32> to vector<8x32xf32>
    %183 = vector.extract_strided_slice %179 {offsets = [0, 96], sizes = [8, 32], strides = [1, 1]} : vector<8x128xf32> to vector<8x32xf32>
    %184 = arith.mulf %181, %172 : vector<8x32xf32>
    %185 = arith.mulf %180, %182 : vector<8x32xf32>
    %186 = arith.addf %184, %185 : vector<8x32xf32>
    %187 = math.tanh %186 : vector<8x32xf32>
    %188 = arith.mulf %183, %187 : vector<8x32xf32>
    %c4_114 = arith.constant 4 : index
    %c0_115 = arith.constant 0 : index
    %c0_116 = arith.constant 0 : index
    %189 = vector.load %arg8[%c4_114, %c0_115, %c0_116] : memref<8x8x32xf32, #tpu.memory_space<vmem>>, vector<1x8x32xf32>
    %190 = vector.shape_cast %189 : vector<1x8x32xf32> to vector<8x32xf32>
    %c4_117 = arith.constant 4 : index
    %c0_118 = arith.constant 0 : index
    %c0_119 = arith.constant 0 : index
    %191 = vector.load %arg9[%c4_117, %c0_118, %c0_119] : memref<8x8x64xf32, #tpu.memory_space<vmem>>, vector<1x8x64xf32>
    %192 = vector.shape_cast %191 : vector<1x8x64xf32> to vector<8x64xf32>
    %193 = arith.subf %186, %172 : vector<8x32xf32>
    %194 = arith.mulf %190, %193 : vector<8x32xf32>
    %195 = arith.addf %172, %194 : vector<8x32xf32>
    %c0_120 = arith.constant 0 : index
    %c0_121 = arith.constant 0 : index
    %196 = vector.load %arg14[%c0_120, %c0_121] : memref<8x32xf32, #tpu.memory_space<vmem>>, vector<8x32xf32>
    tpu.vector_store %arg14[%c0_120, %c0_121], %195 {strides = array<i32>} : memref<8x32xf32, #tpu.memory_space<vmem>>, vector<8x32xf32>,
    %197 = tpu.concatenate %188, %188 in 1 : vector<8x32xf32>, vector<8x32xf32> -> vector<8x64xf32>
    %198 = arith.subf %197, %171 : vector<8x64xf32>
    %199 = arith.mulf %192, %198 : vector<8x64xf32>
    %200 = arith.addf %171, %199 : vector<8x64xf32>
    %c0_122 = arith.constant 0 : index
    %c0_123 = arith.constant 0 : index
    %201 = vector.load %arg13[%c0_122, %c0_123] : memref<8x64xf32, #tpu.memory_space<vmem>>, vector<8x64xf32>
    tpu.vector_store %arg13[%c0_122, %c0_123], %200 {strides = array<i32>} : memref<8x64xf32, #tpu.memory_space<vmem>>, vector<8x64xf32>,
    %202 = arith.mulf %190, %188 : vector<8x32xf32>
    %203 = vector.extract_strided_slice %202 {offsets = [0, 0], sizes = [4, 32], strides = [1, 1]} : vector<8x32xf32> to vector<4x32xf32>
    %c16_124 = arith.constant 16 : index
    %c0_125 = arith.constant 0 : index
    %204 = vector.load %arg15[%c16_124, %c0_125] : memref<32x64xf32, #tpu.memory_space<vmem>>, vector<4x32xf32>
    tpu.vector_store %arg15[%c16_124, %c0_125], %203 {strides = array<i32>} : memref<32x64xf32, #tpu.memory_space<vmem>>, vector<4x32xf32>,
    %205 = vector.extract_strided_slice %202 {offsets = [4, 0], sizes = [4, 32], strides = [1, 1]} : vector<8x32xf32> to vector<4x32xf32>
    %c12_126 = arith.constant 12 : index
    %c32_127 = arith.constant 32 : index
    %206 = vector.load %arg15[%c12_126, %c32_127] : memref<32x64xf32, #tpu.memory_space<vmem>>, vector<4x32xf32>
    tpu.vector_store %arg15[%c12_126, %c32_127], %205 {strides = array<i32>} : memref<32x64xf32, #tpu.memory_space<vmem>>, vector<4x32xf32>,
    %c20_128 = arith.constant 20 : index
    %c0_129 = arith.constant 0 : index
    %207 = vector.load %arg16[%c20_128, %c0_129] : memref<32x256xf32, #tpu.memory_space<vmem>>, vector<4x128xf32>
    %c8_130 = arith.constant 8 : index
    %c128_131 = arith.constant 128 : index
    %208 = vector.load %arg16[%c8_130, %c128_131] : memref<32x256xf32, #tpu.memory_space<vmem>>, vector<4x128xf32>
    %209 = tpu.concatenate %207, %208 in 0 : vector<4x128xf32>, vector<4x128xf32> -> vector<8x128xf32>
    %c0_132 = arith.constant 0 : index
    %c0_133 = arith.constant 0 : index
    %210 = vector.load %arg13[%c0_132, %c0_133] : memref<8x64xf32, #tpu.memory_space<vmem>>, vector<8x64xf32>
    %c0_134 = arith.constant 0 : index
    %c0_135 = arith.constant 0 : index
    %211 = vector.load %arg14[%c0_134, %c0_135] : memref<8x32xf32, #tpu.memory_space<vmem>>, vector<8x32xf32>
    %cst_136 = arith.constant dense<0.000000e+00> : vector<8x128xf32>
    %212 = tpu.matmul %210, %11, %cst_136 {dimension_numbers = #tpu.dot_dimension_numbers<[1], [0], [0], [1], [0, 0, 1, 1], [], []>} : vector<8x64xf32>, vector<64x128xf32>, vector<8x128xf32> -> vector<8x128xf32>
    %213 = arith.addf %209, %212 : vector<8x128xf32>
    %214 = math.tanh %213 : vector<8x128xf32>
    %cst_137 = arith.constant 5.000000e-01 : f32
    %215 = vector.broadcast %cst_137 : f32 to vector<8x128xf32>
    %216 = arith.mulf %215, %214 : vector<8x128xf32>
    %cst_138 = arith.constant 5.000000e-01 : f32
    %217 = vector.broadcast %cst_138 : f32 to vector<8x128xf32>
    %218 = arith.addf %216, %217 : vector<8x128xf32>
    %219 = vector.extract_strided_slice %218 {offsets = [0, 0], sizes = [8, 32], strides = [1, 1]} : vector<8x128xf32> to vector<8x32xf32>
    %220 = vector.extract_strided_slice %218 {offsets = [0, 32], sizes = [8, 32], strides = [1, 1]} : vector<8x128xf32> to vector<8x32xf32>
    %221 = vector.extract_strided_slice %214 {offsets = [0, 64], sizes = [8, 32], strides = [1, 1]} : vector<8x128xf32> to vector<8x32xf32>
    %222 = vector.extract_strided_slice %218 {offsets = [0, 96], sizes = [8, 32], strides = [1, 1]} : vector<8x128xf32> to vector<8x32xf32>
    %223 = arith.mulf %220, %211 : vector<8x32xf32>
    %224 = arith.mulf %219, %221 : vector<8x32xf32>
    %225 = arith.addf %223, %224 : vector<8x32xf32>
    %226 = math.tanh %225 : vector<8x32xf32>
    %227 = arith.mulf %222, %226 : vector<8x32xf32>
    %c5 = arith.constant 5 : index
    %c0_139 = arith.constant 0 : index
    %c0_140 = arith.constant 0 : index
    %228 = vector.load %arg8[%c5, %c0_139, %c0_140] : memref<8x8x32xf32, #tpu.memory_space<vmem>>, vector<1x8x32xf32>
    %229 = vector.shape_cast %228 : vector<1x8x32xf32> to vector<8x32xf32>
    %c5_141 = arith.constant 5 : index
    %c0_142 = arith.constant 0 : index
    %c0_143 = arith.constant 0 : index
    %230 = vector.load %arg9[%c5_141, %c0_142, %c0_143] : memref<8x8x64xf32, #tpu.memory_space<vmem>>, vector<1x8x64xf32>
    %231 = vector.shape_cast %230 : vector<1x8x64xf32> to vector<8x64xf32>
    %232 = arith.subf %225, %211 : vector<8x32xf32>
    %233 = arith.mulf %229, %232 : vector<8x32xf32>
    %234 = arith.addf %211, %233 : vector<8x32xf32>
    %c0_144 = arith.constant 0 : index
    %c0_145 = arith.constant 0 : index
    %235 = vector.load %arg14[%c0_144, %c0_145] : memref<8x32xf32, #tpu.memory_space<vmem>>, vector<8x32xf32>
    tpu.vector_store %arg14[%c0_144, %c0_145], %234 {strides = array<i32>} : memref<8x32xf32, #tpu.memory_space<vmem>>, vector<8x32xf32>,
    %236 = tpu.concatenate %227, %227 in 1 : vector<8x32xf32>, vector<8x32xf32> -> vector<8x64xf32>
    %237 = arith.subf %236, %210 : vector<8x64xf32>
    %238 = arith.mulf %231, %237 : vector<8x64xf32>
    %239 = arith.addf %210, %238 : vector<8x64xf32>
    %c0_146 = arith.constant 0 : index
    %c0_147 = arith.constant 0 : index
    %240 = vector.load %arg13[%c0_146, %c0_147] : memref<8x64xf32, #tpu.memory_space<vmem>>, vector<8x64xf32>
    tpu.vector_store %arg13[%c0_146, %c0_147], %239 {strides = array<i32>} : memref<8x64xf32, #tpu.memory_space<vmem>>, vector<8x64xf32>,
    %241 = arith.mulf %229, %227 : vector<8x32xf32>
    %242 = vector.extract_strided_slice %241 {offsets = [0, 0], sizes = [4, 32], strides = [1, 1]} : vector<8x32xf32> to vector<4x32xf32>
    %c20_148 = arith.constant 20 : index
    %c0_149 = arith.constant 0 : index
    %243 = vector.load %arg15[%c20_148, %c0_149] : memref<32x64xf32, #tpu.memory_space<vmem>>, vector<4x32xf32>
    tpu.vector_store %arg15[%c20_148, %c0_149], %242 {strides = array<i32>} : memref<32x64xf32, #tpu.memory_space<vmem>>, vector<4x32xf32>,
    %244 = vector.extract_strided_slice %241 {offsets = [4, 0], sizes = [4, 32], strides = [1, 1]} : vector<8x32xf32> to vector<4x32xf32>
    %c8_150 = arith.constant 8 : index
    %c32_151 = arith.constant 32 : index
    %245 = vector.load %arg15[%c8_150, %c32_151] : memref<32x64xf32, #tpu.memory_space<vmem>>, vector<4x32xf32>
    tpu.vector_store %arg15[%c8_150, %c32_151], %244 {strides = array<i32>} : memref<32x64xf32, #tpu.memory_space<vmem>>, vector<4x32xf32>,
    %c24_152 = arith.constant 24 : index
    %c0_153 = arith.constant 0 : index
    %246 = vector.load %arg16[%c24_152, %c0_153] : memref<32x256xf32, #tpu.memory_space<vmem>>, vector<4x128xf32>
    %c4_154 = arith.constant 4 : index
    %c128_155 = arith.constant 128 : index
    %247 = vector.load %arg16[%c4_154, %c128_155] : memref<32x256xf32, #tpu.memory_space<vmem>>, vector<4x128xf32>
    %248 = tpu.concatenate %246, %247 in 0 : vector<4x128xf32>, vector<4x128xf32> -> vector<8x128xf32>
    %c0_156 = arith.constant 0 : index
    %c0_157 = arith.constant 0 : index
    %249 = vector.load %arg13[%c0_156, %c0_157] : memref<8x64xf32, #tpu.memory_space<vmem>>, vector<8x64xf32>
    %c0_158 = arith.constant 0 : index
    %c0_159 = arith.constant 0 : index
    %250 = vector.load %arg14[%c0_158, %c0_159] : memref<8x32xf32, #tpu.memory_space<vmem>>, vector<8x32xf32>
    %cst_160 = arith.constant dense<0.000000e+00> : vector<8x128xf32>
    %251 = tpu.matmul %249, %11, %cst_160 {dimension_numbers = #tpu.dot_dimension_numbers<[1], [0], [0], [1], [0, 0, 1, 1], [], []>} : vector<8x64xf32>, vector<64x128xf32>, vector<8x128xf32> -> vector<8x128xf32>
    %252 = arith.addf %248, %251 : vector<8x128xf32>
    %253 = math.tanh %252 : vector<8x128xf32>
    %cst_161 = arith.constant 5.000000e-01 : f32
    %254 = vector.broadcast %cst_161 : f32 to vector<8x128xf32>
    %255 = arith.mulf %254, %253 : vector<8x128xf32>
    %cst_162 = arith.constant 5.000000e-01 : f32
    %256 = vector.broadcast %cst_162 : f32 to vector<8x128xf32>
    %257 = arith.addf %255, %256 : vector<8x128xf32>
    %258 = vector.extract_strided_slice %257 {offsets = [0, 0], sizes = [8, 32], strides = [1, 1]} : vector<8x128xf32> to vector<8x32xf32>
    %259 = vector.extract_strided_slice %257 {offsets = [0, 32], sizes = [8, 32], strides = [1, 1]} : vector<8x128xf32> to vector<8x32xf32>
    %260 = vector.extract_strided_slice %253 {offsets = [0, 64], sizes = [8, 32], strides = [1, 1]} : vector<8x128xf32> to vector<8x32xf32>
    %261 = vector.extract_strided_slice %257 {offsets = [0, 96], sizes = [8, 32], strides = [1, 1]} : vector<8x128xf32> to vector<8x32xf32>
    %262 = arith.mulf %259, %250 : vector<8x32xf32>
    %263 = arith.mulf %258, %260 : vector<8x32xf32>
    %264 = arith.addf %262, %263 : vector<8x32xf32>
    %265 = math.tanh %264 : vector<8x32xf32>
    %266 = arith.mulf %261, %265 : vector<8x32xf32>
    %c6 = arith.constant 6 : index
    %c0_163 = arith.constant 0 : index
    %c0_164 = arith.constant 0 : index
    %267 = vector.load %arg8[%c6, %c0_163, %c0_164] : memref<8x8x32xf32, #tpu.memory_space<vmem>>, vector<1x8x32xf32>
    %268 = vector.shape_cast %267 : vector<1x8x32xf32> to vector<8x32xf32>
    %c6_165 = arith.constant 6 : index
    %c0_166 = arith.constant 0 : index
    %c0_167 = arith.constant 0 : index
    %269 = vector.load %arg9[%c6_165, %c0_166, %c0_167] : memref<8x8x64xf32, #tpu.memory_space<vmem>>, vector<1x8x64xf32>
    %270 = vector.shape_cast %269 : vector<1x8x64xf32> to vector<8x64xf32>
    %271 = arith.subf %264, %250 : vector<8x32xf32>
    %272 = arith.mulf %268, %271 : vector<8x32xf32>
    %273 = arith.addf %250, %272 : vector<8x32xf32>
    %c0_168 = arith.constant 0 : index
    %c0_169 = arith.constant 0 : index
    %274 = vector.load %arg14[%c0_168, %c0_169] : memref<8x32xf32, #tpu.memory_space<vmem>>, vector<8x32xf32>
    tpu.vector_store %arg14[%c0_168, %c0_169], %273 {strides = array<i32>} : memref<8x32xf32, #tpu.memory_space<vmem>>, vector<8x32xf32>,
    %275 = tpu.concatenate %266, %266 in 1 : vector<8x32xf32>, vector<8x32xf32> -> vector<8x64xf32>
    %276 = arith.subf %275, %249 : vector<8x64xf32>
    %277 = arith.mulf %270, %276 : vector<8x64xf32>
    %278 = arith.addf %249, %277 : vector<8x64xf32>
    %c0_170 = arith.constant 0 : index
    %c0_171 = arith.constant 0 : index
    %279 = vector.load %arg13[%c0_170, %c0_171] : memref<8x64xf32, #tpu.memory_space<vmem>>, vector<8x64xf32>
    tpu.vector_store %arg13[%c0_170, %c0_171], %278 {strides = array<i32>} : memref<8x64xf32, #tpu.memory_space<vmem>>, vector<8x64xf32>,
    %280 = arith.mulf %268, %266 : vector<8x32xf32>
    %281 = vector.extract_strided_slice %280 {offsets = [0, 0], sizes = [4, 32], strides = [1, 1]} : vector<8x32xf32> to vector<4x32xf32>
    %c24_172 = arith.constant 24 : index
    %c0_173 = arith.constant 0 : index
    %282 = vector.load %arg15[%c24_172, %c0_173] : memref<32x64xf32, #tpu.memory_space<vmem>>, vector<4x32xf32>
    tpu.vector_store %arg15[%c24_172, %c0_173], %281 {strides = array<i32>} : memref<32x64xf32, #tpu.memory_space<vmem>>, vector<4x32xf32>,
    %283 = vector.extract_strided_slice %280 {offsets = [4, 0], sizes = [4, 32], strides = [1, 1]} : vector<8x32xf32> to vector<4x32xf32>
    %c4_174 = arith.constant 4 : index
    %c32_175 = arith.constant 32 : index
    %284 = vector.load %arg15[%c4_174, %c32_175] : memref<32x64xf32, #tpu.memory_space<vmem>>, vector<4x32xf32>
    tpu.vector_store %arg15[%c4_174, %c32_175], %283 {strides = array<i32>} : memref<32x64xf32, #tpu.memory_space<vmem>>, vector<4x32xf32>,
    %c28_176 = arith.constant 28 : index
    %c0_177 = arith.constant 0 : index
    %285 = vector.load %arg16[%c28_176, %c0_177] : memref<32x256xf32, #tpu.memory_space<vmem>>, vector<4x128xf32>
    %c0_178 = arith.constant 0 : index
    %c128_179 = arith.constant 128 : index
    %286 = vector.load %arg16[%c0_178, %c128_179] : memref<32x256xf32, #tpu.memory_space<vmem>>, vector<4x128xf32>
    %287 = tpu.concatenate %285, %286 in 0 : vector<4x128xf32>, vector<4x128xf32> -> vector<8x128xf32>
    %c0_180 = arith.constant 0 : index
    %c0_181 = arith.constant 0 : index
    %288 = vector.load %arg13[%c0_180, %c0_181] : memref<8x64xf32, #tpu.memory_space<vmem>>, vector<8x64xf32>
    %c0_182 = arith.constant 0 : index
    %c0_183 = arith.constant 0 : index
    %289 = vector.load %arg14[%c0_182, %c0_183] : memref<8x32xf32, #tpu.memory_space<vmem>>, vector<8x32xf32>
    %cst_184 = arith.constant dense<0.000000e+00> : vector<8x128xf32>
    %290 = tpu.matmul %288, %11, %cst_184 {dimension_numbers = #tpu.dot_dimension_numbers<[1], [0], [0], [1], [0, 0, 1, 1], [], []>} : vector<8x64xf32>, vector<64x128xf32>, vector<8x128xf32> -> vector<8x128xf32>
    %291 = arith.addf %287, %290 : vector<8x128xf32>
    %292 = math.tanh %291 : vector<8x128xf32>
    %cst_185 = arith.constant 5.000000e-01 : f32
    %293 = vector.broadcast %cst_185 : f32 to vector<8x128xf32>
    %294 = arith.mulf %293, %292 : vector<8x128xf32>
    %cst_186 = arith.constant 5.000000e-01 : f32
    %295 = vector.broadcast %cst_186 : f32 to vector<8x128xf32>
    %296 = arith.addf %294, %295 : vector<8x128xf32>
    %297 = vector.extract_strided_slice %296 {offsets = [0, 0], sizes = [8, 32], strides = [1, 1]} : vector<8x128xf32> to vector<8x32xf32>
    %298 = vector.extract_strided_slice %296 {offsets = [0, 32], sizes = [8, 32], strides = [1, 1]} : vector<8x128xf32> to vector<8x32xf32>
    %299 = vector.extract_strided_slice %292 {offsets = [0, 64], sizes = [8, 32], strides = [1, 1]} : vector<8x128xf32> to vector<8x32xf32>
    %300 = vector.extract_strided_slice %296 {offsets = [0, 96], sizes = [8, 32], strides = [1, 1]} : vector<8x128xf32> to vector<8x32xf32>
    %301 = arith.mulf %298, %289 : vector<8x32xf32>
    %302 = arith.mulf %297, %299 : vector<8x32xf32>
    %303 = arith.addf %301, %302 : vector<8x32xf32>
    %304 = math.tanh %303 : vector<8x32xf32>
    %305 = arith.mulf %300, %304 : vector<8x32xf32>
    %c7 = arith.constant 7 : index
    %c0_187 = arith.constant 0 : index
    %c0_188 = arith.constant 0 : index
    %306 = vector.load %arg8[%c7, %c0_187, %c0_188] : memref<8x8x32xf32, #tpu.memory_space<vmem>>, vector<1x8x32xf32>
    %307 = vector.shape_cast %306 : vector<1x8x32xf32> to vector<8x32xf32>
    %c7_189 = arith.constant 7 : index
    %c0_190 = arith.constant 0 : index
    %c0_191 = arith.constant 0 : index
    %308 = vector.load %arg9[%c7_189, %c0_190, %c0_191] : memref<8x8x64xf32, #tpu.memory_space<vmem>>, vector<1x8x64xf32>
    %309 = vector.shape_cast %308 : vector<1x8x64xf32> to vector<8x64xf32>
    %310 = arith.subf %303, %289 : vector<8x32xf32>
    %311 = arith.mulf %307, %310 : vector<8x32xf32>
    %312 = arith.addf %289, %311 : vector<8x32xf32>
    %c0_192 = arith.constant 0 : index
    %c0_193 = arith.constant 0 : index
    %313 = vector.load %arg14[%c0_192, %c0_193] : memref<8x32xf32, #tpu.memory_space<vmem>>, vector<8x32xf32>
    tpu.vector_store %arg14[%c0_192, %c0_193], %312 {strides = array<i32>} : memref<8x32xf32, #tpu.memory_space<vmem>>, vector<8x32xf32>,
    %314 = tpu.concatenate %305, %305 in 1 : vector<8x32xf32>, vector<8x32xf32> -> vector<8x64xf32>
    %315 = arith.subf %314, %288 : vector<8x64xf32>
    %316 = arith.mulf %309, %315 : vector<8x64xf32>
    %317 = arith.addf %288, %316 : vector<8x64xf32>
    %c0_194 = arith.constant 0 : index
    %c0_195 = arith.constant 0 : index
    %318 = vector.load %arg13[%c0_194, %c0_195] : memref<8x64xf32, #tpu.memory_space<vmem>>, vector<8x64xf32>
    tpu.vector_store %arg13[%c0_194, %c0_195], %317 {strides = array<i32>} : memref<8x64xf32, #tpu.memory_space<vmem>>, vector<8x64xf32>,
    %319 = arith.mulf %307, %305 : vector<8x32xf32>
    %320 = vector.extract_strided_slice %319 {offsets = [0, 0], sizes = [4, 32], strides = [1, 1]} : vector<8x32xf32> to vector<4x32xf32>
    %c28_196 = arith.constant 28 : index
    %c0_197 = arith.constant 0 : index
    %321 = vector.load %arg15[%c28_196, %c0_197] : memref<32x64xf32, #tpu.memory_space<vmem>>, vector<4x32xf32>
    tpu.vector_store %arg15[%c28_196, %c0_197], %320 {strides = array<i32>} : memref<32x64xf32, #tpu.memory_space<vmem>>, vector<4x32xf32>,
    %322 = vector.extract_strided_slice %319 {offsets = [4, 0], sizes = [4, 32], strides = [1, 1]} : vector<8x32xf32> to vector<4x32xf32>
    %c0_198 = arith.constant 0 : index
    %c32_199 = arith.constant 32 : index
    %323 = vector.load %arg15[%c0_198, %c32_199] : memref<32x64xf32, #tpu.memory_space<vmem>>, vector<4x32xf32>
    tpu.vector_store %arg15[%c0_198, %c32_199], %322 {strides = array<i32>} : memref<32x64xf32, #tpu.memory_space<vmem>>, vector<4x32xf32>,
    %c0_200 = arith.constant 0 : index
    %c0_201 = arith.constant 0 : index
    %324 = vector.load %arg13[%c0_200, %c0_201] : memref<8x64xf32, #tpu.memory_space<vmem>>, vector<4x32xf32>
    %c0_202 = arith.constant 0 : index
    %c0_203 = arith.constant 0 : index
    %c0_204 = arith.constant 0 : index
    %325 = vector.load %arg11[%c0_202, %c0_203, %c0_204] : memref<4x4x32xf32, #tpu.memory_space<vmem>>, vector<1x4x32xf32>
    %326 = vector.shape_cast %325 : vector<1x4x32xf32> to vector<4x32xf32>
    %327 = vector.shape_cast %324 : vector<4x32xf32> to vector<1x4x32xf32>
    tpu.vector_store %arg11[%c0_202, %c0_203, %c0_204], %327 {strides = array<i32>} : memref<4x4x32xf32, #tpu.memory_space<vmem>>, vector<1x4x32xf32>,
    %c4_205 = arith.constant 4 : index
    %c32_206 = arith.constant 32 : index
    %328 = vector.load %arg13[%c4_205, %c32_206] : memref<8x64xf32, #tpu.memory_space<vmem>>, vector<4x32xf32>
    %c1_207 = arith.constant 1 : index
    %c0_208 = arith.constant 0 : index
    %c0_209 = arith.constant 0 : index
    %329 = vector.load %arg11[%c1_207, %c0_208, %c0_209] : memref<4x4x32xf32, #tpu.memory_space<vmem>>, vector<1x4x32xf32>
    %330 = vector.shape_cast %329 : vector<1x4x32xf32> to vector<4x32xf32>
    %331 = vector.shape_cast %328 : vector<4x32xf32> to vector<1x4x32xf32>
    tpu.vector_store %arg11[%c1_207, %c0_208, %c0_209], %331 {strides = array<i32>} : memref<4x4x32xf32, #tpu.memory_space<vmem>>, vector<1x4x32xf32>,
    %c0_210 = arith.constant 0 : index
    %c0_211 = arith.constant 0 : index
    %332 = vector.load %arg14[%c0_210, %c0_211] : memref<8x32xf32, #tpu.memory_space<vmem>>, vector<4x32xf32>
    %c0_212 = arith.constant 0 : index
    %c0_213 = arith.constant 0 : index
    %c0_214 = arith.constant 0 : index
    %333 = vector.load %arg12[%c0_212, %c0_213, %c0_214] : memref<4x4x32xf32, #tpu.memory_space<vmem>>, vector<1x4x32xf32>
    %334 = vector.shape_cast %333 : vector<1x4x32xf32> to vector<4x32xf32>
    %335 = vector.shape_cast %332 : vector<4x32xf32> to vector<1x4x32xf32>
    tpu.vector_store %arg12[%c0_212, %c0_213, %c0_214], %335 {strides = array<i32>} : memref<4x4x32xf32, #tpu.memory_space<vmem>>, vector<1x4x32xf32>,
    %c4_215 = arith.constant 4 : index
    %c0_216 = arith.constant 0 : index
    %336 = vector.load %arg14[%c4_215, %c0_216] : memref<8x32xf32, #tpu.memory_space<vmem>>, vector<4x32xf32>
    %c1_217 = arith.constant 1 : index
    %c0_218 = arith.constant 0 : index
    %c0_219 = arith.constant 0 : index
    %337 = vector.load %arg12[%c1_217, %c0_218, %c0_219] : memref<4x4x32xf32, #tpu.memory_space<vmem>>, vector<1x4x32xf32>
    %338 = vector.shape_cast %337 : vector<1x4x32xf32> to vector<4x32xf32>
    %339 = vector.shape_cast %336 : vector<4x32xf32> to vector<1x4x32xf32>
    tpu.vector_store %arg12[%c1_217, %c0_218, %c0_219], %339 {strides = array<i32>} : memref<4x4x32xf32, #tpu.memory_space<vmem>>, vector<1x4x32xf32>,
    %c0_220 = arith.constant 0 : index
    %c0_221 = arith.constant 0 : index
    %340 = vector.load %arg15[%c0_220, %c0_221] : memref<32x64xf32, #tpu.memory_space<vmem>>, vector<32x64xf32>
    %c0_222 = arith.constant 0 : index
    %c0_223 = arith.constant 0 : index
    %341 = vector.load %arg5[%c0_222, %c0_223] : memref<64x256xf32, #tpu.memory_space<vmem>>, vector<64x256xf32>
    %cst_224 = arith.constant dense<0.000000e+00> : vector<32x256xf32>
    %342 = tpu.matmul %340, %341, %cst_224 {dimension_numbers = #tpu.dot_dimension_numbers<[1], [0], [0], [1], [0, 0, 1, 1], [], []>} : vector<32x64xf32>, vector<64x256xf32>, vector<32x256xf32> -> vector<32x256xf32>
    %c0_225 = arith.constant 0 : index
    %c0_226 = arith.constant 0 : index
    %343 = vector.load %arg6[%c0_225, %c0_226] : memref<1x256xf32, #tpu.memory_space<vmem>>, vector<1x256xf32>
    %344 = vector.broadcast %343 : vector<1x256xf32> to vector<32x256xf32>
    %345 = arith.addf %342, %344 : vector<32x256xf32>
    %c0_227 = arith.constant 0 : index
    %c0_228 = arith.constant 0 : index
    %346 = vector.load %arg17[%c0_227, %c0_228] : memref<32x256xf32, #tpu.memory_space<vmem>>, vector<32x256xf32>
    tpu.vector_store %arg17[%c0_227, %c0_228], %345 {strides = array<i32>} : memref<32x256xf32, #tpu.memory_space<vmem>>, vector<32x256xf32>,
    %cst_229 = arith.constant 0.000000e+00 : f32
    %347 = vector.broadcast %cst_229 : f32 to vector<8x64xf32>
    %c0_230 = arith.constant 0 : index
    %c0_231 = arith.constant 0 : index
    %348 = vector.load %arg13[%c0_230, %c0_231] : memref<8x64xf32, #tpu.memory_space<vmem>>, vector<8x64xf32>
    tpu.vector_store %arg13[%c0_230, %c0_231], %347 {strides = array<i32>} : memref<8x64xf32, #tpu.memory_space<vmem>>, vector<8x64xf32>,
    %cst_232 = arith.constant 0.000000e+00 : f32
    %349 = vector.broadcast %cst_232 : f32 to vector<8x32xf32>
    %c0_233 = arith.constant 0 : index
    %c0_234 = arith.constant 0 : index
    %350 = vector.load %arg14[%c0_233, %c0_234] : memref<8x32xf32, #tpu.memory_space<vmem>>, vector<8x32xf32>
    tpu.vector_store %arg14[%c0_233, %c0_234], %349 {strides = array<i32>} : memref<8x32xf32, #tpu.memory_space<vmem>>, vector<8x32xf32>,
    %c0_235 = arith.constant 0 : index
    %c0_236 = arith.constant 0 : index
    %351 = vector.load %arg7[%c0_235, %c0_236] : memref<64x128xf32, #tpu.memory_space<vmem>>, vector<64x128xf32>
    %c0_237 = arith.constant 0 : index
    %c0_238 = arith.constant 0 : index
    %352 = vector.load %arg17[%c0_237, %c0_238] : memref<32x256xf32, #tpu.memory_space<vmem>>, vector<4x128xf32>
    %c28_239 = arith.constant 28 : index
    %c128_240 = arith.constant 128 : index
    %353 = vector.load %arg17[%c28_239, %c128_240] : memref<32x256xf32, #tpu.memory_space<vmem>>, vector<4x128xf32>
    %354 = tpu.concatenate %352, %353 in 0 : vector<4x128xf32>, vector<4x128xf32> -> vector<8x128xf32>
    %c0_241 = arith.constant 0 : index
    %c0_242 = arith.constant 0 : index
    %355 = vector.load %arg13[%c0_241, %c0_242] : memref<8x64xf32, #tpu.memory_space<vmem>>, vector<8x64xf32>
    %c0_243 = arith.constant 0 : index
    %c0_244 = arith.constant 0 : index
    %356 = vector.load %arg14[%c0_243, %c0_244] : memref<8x32xf32, #tpu.memory_space<vmem>>, vector<8x32xf32>
    %cst_245 = arith.constant dense<0.000000e+00> : vector<8x128xf32>
    %357 = tpu.matmul %355, %351, %cst_245 {dimension_numbers = #tpu.dot_dimension_numbers<[1], [0], [0], [1], [0, 0, 1, 1], [], []>} : vector<8x64xf32>, vector<64x128xf32>, vector<8x128xf32> -> vector<8x128xf32>
    %358 = arith.addf %354, %357 : vector<8x128xf32>
    %359 = math.tanh %358 : vector<8x128xf32>
    %cst_246 = arith.constant 5.000000e-01 : f32
    %360 = vector.broadcast %cst_246 : f32 to vector<8x128xf32>
    %361 = arith.mulf %360, %359 : vector<8x128xf32>
    %cst_247 = arith.constant 5.000000e-01 : f32
    %362 = vector.broadcast %cst_247 : f32 to vector<8x128xf32>
    %363 = arith.addf %361, %362 : vector<8x128xf32>
    %364 = vector.extract_strided_slice %363 {offsets = [0, 0], sizes = [8, 32], strides = [1, 1]} : vector<8x128xf32> to vector<8x32xf32>
    %365 = vector.extract_strided_slice %363 {offsets = [0, 32], sizes = [8, 32], strides = [1, 1]} : vector<8x128xf32> to vector<8x32xf32>
    %366 = vector.extract_strided_slice %359 {offsets = [0, 64], sizes = [8, 32], strides = [1, 1]} : vector<8x128xf32> to vector<8x32xf32>
    %367 = vector.extract_strided_slice %363 {offsets = [0, 96], sizes = [8, 32], strides = [1, 1]} : vector<8x128xf32> to vector<8x32xf32>
    %368 = arith.mulf %365, %356 : vector<8x32xf32>
    %369 = arith.mulf %364, %366 : vector<8x32xf32>
    %370 = arith.addf %368, %369 : vector<8x32xf32>
    %371 = math.tanh %370 : vector<8x32xf32>
    %372 = arith.mulf %367, %371 : vector<8x32xf32>
    %c0_248 = arith.constant 0 : index
    %c0_249 = arith.constant 0 : index
    %c0_250 = arith.constant 0 : index
    %373 = vector.load %arg8[%c0_248, %c0_249, %c0_250] : memref<8x8x32xf32, #tpu.memory_space<vmem>>, vector<1x8x32xf32>
    %374 = vector.shape_cast %373 : vector<1x8x32xf32> to vector<8x32xf32>
    %c0_251 = arith.constant 0 : index
    %c0_252 = arith.constant 0 : index
    %c0_253 = arith.constant 0 : index
    %375 = vector.load %arg9[%c0_251, %c0_252, %c0_253] : memref<8x8x64xf32, #tpu.memory_space<vmem>>, vector<1x8x64xf32>
    %376 = vector.shape_cast %375 : vector<1x8x64xf32> to vector<8x64xf32>
    %377 = arith.subf %370, %356 : vector<8x32xf32>
    %378 = arith.mulf %374, %377 : vector<8x32xf32>
    %379 = arith.addf %356, %378 : vector<8x32xf32>
    %c0_254 = arith.constant 0 : index
    %c0_255 = arith.constant 0 : index
    %380 = vector.load %arg14[%c0_254, %c0_255] : memref<8x32xf32, #tpu.memory_space<vmem>>, vector<8x32xf32>
    tpu.vector_store %arg14[%c0_254, %c0_255], %379 {strides = array<i32>} : memref<8x32xf32, #tpu.memory_space<vmem>>, vector<8x32xf32>,
    %381 = tpu.concatenate %372, %372 in 1 : vector<8x32xf32>, vector<8x32xf32> -> vector<8x64xf32>
    %382 = arith.subf %381, %355 : vector<8x64xf32>
    %383 = arith.mulf %376, %382 : vector<8x64xf32>
    %384 = arith.addf %355, %383 : vector<8x64xf32>
    %c0_256 = arith.constant 0 : index
    %c0_257 = arith.constant 0 : index
    %385 = vector.load %arg13[%c0_256, %c0_257] : memref<8x64xf32, #tpu.memory_space<vmem>>, vector<8x64xf32>
    tpu.vector_store %arg13[%c0_256, %c0_257], %384 {strides = array<i32>} : memref<8x64xf32, #tpu.memory_space<vmem>>, vector<8x64xf32>,
    %386 = arith.mulf %374, %372 : vector<8x32xf32>
    %387 = vector.extract_strided_slice %386 {offsets = [0, 0], sizes = [4, 32], strides = [1, 1]} : vector<8x32xf32> to vector<4x32xf32>
    %c0_258 = arith.constant 0 : index
    %c0_259 = arith.constant 0 : index
    %388 = vector.load %arg10[%c0_258, %c0_259] : memref<32x64xf32, #tpu.memory_space<vmem>>, vector<4x32xf32>
    tpu.vector_store %arg10[%c0_258, %c0_259], %387 {strides = array<i32>} : memref<32x64xf32, #tpu.memory_space<vmem>>, vector<4x32xf32>,
    %389 = vector.extract_strided_slice %386 {offsets = [4, 0], sizes = [4, 32], strides = [1, 1]} : vector<8x32xf32> to vector<4x32xf32>
    %c28_260 = arith.constant 28 : index
    %c32_261 = arith.constant 32 : index
    %390 = vector.load %arg10[%c28_260, %c32_261] : memref<32x64xf32, #tpu.memory_space<vmem>>, vector<4x32xf32>
    tpu.vector_store %arg10[%c28_260, %c32_261], %389 {strides = array<i32>} : memref<32x64xf32, #tpu.memory_space<vmem>>, vector<4x32xf32>,
    %c4_262 = arith.constant 4 : index
    %c0_263 = arith.constant 0 : index
    %391 = vector.load %arg17[%c4_262, %c0_263] : memref<32x256xf32, #tpu.memory_space<vmem>>, vector<4x128xf32>
    %c24_264 = arith.constant 24 : index
    %c128_265 = arith.constant 128 : index
    %392 = vector.load %arg17[%c24_264, %c128_265] : memref<32x256xf32, #tpu.memory_space<vmem>>, vector<4x128xf32>
    %393 = tpu.concatenate %391, %392 in 0 : vector<4x128xf32>, vector<4x128xf32> -> vector<8x128xf32>
    %c0_266 = arith.constant 0 : index
    %c0_267 = arith.constant 0 : index
    %394 = vector.load %arg13[%c0_266, %c0_267] : memref<8x64xf32, #tpu.memory_space<vmem>>, vector<8x64xf32>
    %c0_268 = arith.constant 0 : index
    %c0_269 = arith.constant 0 : index
    %395 = vector.load %arg14[%c0_268, %c0_269] : memref<8x32xf32, #tpu.memory_space<vmem>>, vector<8x32xf32>
    %cst_270 = arith.constant dense<0.000000e+00> : vector<8x128xf32>
    %396 = tpu.matmul %394, %351, %cst_270 {dimension_numbers = #tpu.dot_dimension_numbers<[1], [0], [0], [1], [0, 0, 1, 1], [], []>} : vector<8x64xf32>, vector<64x128xf32>, vector<8x128xf32> -> vector<8x128xf32>
    %397 = arith.addf %393, %396 : vector<8x128xf32>
    %398 = math.tanh %397 : vector<8x128xf32>
    %cst_271 = arith.constant 5.000000e-01 : f32
    %399 = vector.broadcast %cst_271 : f32 to vector<8x128xf32>
    %400 = arith.mulf %399, %398 : vector<8x128xf32>
    %cst_272 = arith.constant 5.000000e-01 : f32
    %401 = vector.broadcast %cst_272 : f32 to vector<8x128xf32>
    %402 = arith.addf %400, %401 : vector<8x128xf32>
    %403 = vector.extract_strided_slice %402 {offsets = [0, 0], sizes = [8, 32], strides = [1, 1]} : vector<8x128xf32> to vector<8x32xf32>
    %404 = vector.extract_strided_slice %402 {offsets = [0, 32], sizes = [8, 32], strides = [1, 1]} : vector<8x128xf32> to vector<8x32xf32>
    %405 = vector.extract_strided_slice %398 {offsets = [0, 64], sizes = [8, 32], strides = [1, 1]} : vector<8x128xf32> to vector<8x32xf32>
    %406 = vector.extract_strided_slice %402 {offsets = [0, 96], sizes = [8, 32], strides = [1, 1]} : vector<8x128xf32> to vector<8x32xf32>
    %407 = arith.mulf %404, %395 : vector<8x32xf32>
    %408 = arith.mulf %403, %405 : vector<8x32xf32>
    %409 = arith.addf %407, %408 : vector<8x32xf32>
    %410 = math.tanh %409 : vector<8x32xf32>
    %411 = arith.mulf %406, %410 : vector<8x32xf32>
    %c1_273 = arith.constant 1 : index
    %c0_274 = arith.constant 0 : index
    %c0_275 = arith.constant 0 : index
    %412 = vector.load %arg8[%c1_273, %c0_274, %c0_275] : memref<8x8x32xf32, #tpu.memory_space<vmem>>, vector<1x8x32xf32>
    %413 = vector.shape_cast %412 : vector<1x8x32xf32> to vector<8x32xf32>
    %c1_276 = arith.constant 1 : index
    %c0_277 = arith.constant 0 : index
    %c0_278 = arith.constant 0 : index
    %414 = vector.load %arg9[%c1_276, %c0_277, %c0_278] : memref<8x8x64xf32, #tpu.memory_space<vmem>>, vector<1x8x64xf32>
    %415 = vector.shape_cast %414 : vector<1x8x64xf32> to vector<8x64xf32>
    %416 = arith.subf %409, %395 : vector<8x32xf32>
    %417 = arith.mulf %413, %416 : vector<8x32xf32>
    %418 = arith.addf %395, %417 : vector<8x32xf32>
    %c0_279 = arith.constant 0 : index
    %c0_280 = arith.constant 0 : index
    %419 = vector.load %arg14[%c0_279, %c0_280] : memref<8x32xf32, #tpu.memory_space<vmem>>, vector<8x32xf32>
    tpu.vector_store %arg14[%c0_279, %c0_280], %418 {strides = array<i32>} : memref<8x32xf32, #tpu.memory_space<vmem>>, vector<8x32xf32>,
    %420 = tpu.concatenate %411, %411 in 1 : vector<8x32xf32>, vector<8x32xf32> -> vector<8x64xf32>
    %421 = arith.subf %420, %394 : vector<8x64xf32>
    %422 = arith.mulf %415, %421 : vector<8x64xf32>
    %423 = arith.addf %394, %422 : vector<8x64xf32>
    %c0_281 = arith.constant 0 : index
    %c0_282 = arith.constant 0 : index
    %424 = vector.load %arg13[%c0_281, %c0_282] : memref<8x64xf32, #tpu.memory_space<vmem>>, vector<8x64xf32>
    tpu.vector_store %arg13[%c0_281, %c0_282], %423 {strides = array<i32>} : memref<8x64xf32, #tpu.memory_space<vmem>>, vector<8x64xf32>,
    %425 = arith.mulf %413, %411 : vector<8x32xf32>
    %426 = vector.extract_strided_slice %425 {offsets = [0, 0], sizes = [4, 32], strides = [1, 1]} : vector<8x32xf32> to vector<4x32xf32>
    %c4_283 = arith.constant 4 : index
    %c0_284 = arith.constant 0 : index
    %427 = vector.load %arg10[%c4_283, %c0_284] : memref<32x64xf32, #tpu.memory_space<vmem>>, vector<4x32xf32>
    tpu.vector_store %arg10[%c4_283, %c0_284], %426 {strides = array<i32>} : memref<32x64xf32, #tpu.memory_space<vmem>>, vector<4x32xf32>,
    %428 = vector.extract_strided_slice %425 {offsets = [4, 0], sizes = [4, 32], strides = [1, 1]} : vector<8x32xf32> to vector<4x32xf32>
    %c24_285 = arith.constant 24 : index
    %c32_286 = arith.constant 32 : index
    %429 = vector.load %arg10[%c24_285, %c32_286] : memref<32x64xf32, #tpu.memory_space<vmem>>, vector<4x32xf32>
    tpu.vector_store %arg10[%c24_285, %c32_286], %428 {strides = array<i32>} : memref<32x64xf32, #tpu.memory_space<vmem>>, vector<4x32xf32>,
    %c8_287 = arith.constant 8 : index
    %c0_288 = arith.constant 0 : index
    %430 = vector.load %arg17[%c8_287, %c0_288] : memref<32x256xf32, #tpu.memory_space<vmem>>, vector<4x128xf32>
    %c20_289 = arith.constant 20 : index
    %c128_290 = arith.constant 128 : index
    %431 = vector.load %arg17[%c20_289, %c128_290] : memref<32x256xf32, #tpu.memory_space<vmem>>, vector<4x128xf32>
    %432 = tpu.concatenate %430, %431 in 0 : vector<4x128xf32>, vector<4x128xf32> -> vector<8x128xf32>
    %c0_291 = arith.constant 0 : index
    %c0_292 = arith.constant 0 : index
    %433 = vector.load %arg13[%c0_291, %c0_292] : memref<8x64xf32, #tpu.memory_space<vmem>>, vector<8x64xf32>
    %c0_293 = arith.constant 0 : index
    %c0_294 = arith.constant 0 : index
    %434 = vector.load %arg14[%c0_293, %c0_294] : memref<8x32xf32, #tpu.memory_space<vmem>>, vector<8x32xf32>
    %cst_295 = arith.constant dense<0.000000e+00> : vector<8x128xf32>
    %435 = tpu.matmul %433, %351, %cst_295 {dimension_numbers = #tpu.dot_dimension_numbers<[1], [0], [0], [1], [0, 0, 1, 1], [], []>} : vector<8x64xf32>, vector<64x128xf32>, vector<8x128xf32> -> vector<8x128xf32>
    %436 = arith.addf %432, %435 : vector<8x128xf32>
    %437 = math.tanh %436 : vector<8x128xf32>
    %cst_296 = arith.constant 5.000000e-01 : f32
    %438 = vector.broadcast %cst_296 : f32 to vector<8x128xf32>
    %439 = arith.mulf %438, %437 : vector<8x128xf32>
    %cst_297 = arith.constant 5.000000e-01 : f32
    %440 = vector.broadcast %cst_297 : f32 to vector<8x128xf32>
    %441 = arith.addf %439, %440 : vector<8x128xf32>
    %442 = vector.extract_strided_slice %441 {offsets = [0, 0], sizes = [8, 32], strides = [1, 1]} : vector<8x128xf32> to vector<8x32xf32>
    %443 = vector.extract_strided_slice %441 {offsets = [0, 32], sizes = [8, 32], strides = [1, 1]} : vector<8x128xf32> to vector<8x32xf32>
    %444 = vector.extract_strided_slice %437 {offsets = [0, 64], sizes = [8, 32], strides = [1, 1]} : vector<8x128xf32> to vector<8x32xf32>
    %445 = vector.extract_strided_slice %441 {offsets = [0, 96], sizes = [8, 32], strides = [1, 1]} : vector<8x128xf32> to vector<8x32xf32>
    %446 = arith.mulf %443, %434 : vector<8x32xf32>
    %447 = arith.mulf %442, %444 : vector<8x32xf32>
    %448 = arith.addf %446, %447 : vector<8x32xf32>
    %449 = math.tanh %448 : vector<8x32xf32>
    %450 = arith.mulf %445, %449 : vector<8x32xf32>
    %c2_298 = arith.constant 2 : index
    %c0_299 = arith.constant 0 : index
    %c0_300 = arith.constant 0 : index
    %451 = vector.load %arg8[%c2_298, %c0_299, %c0_300] : memref<8x8x32xf32, #tpu.memory_space<vmem>>, vector<1x8x32xf32>
    %452 = vector.shape_cast %451 : vector<1x8x32xf32> to vector<8x32xf32>
    %c2_301 = arith.constant 2 : index
    %c0_302 = arith.constant 0 : index
    %c0_303 = arith.constant 0 : index
    %453 = vector.load %arg9[%c2_301, %c0_302, %c0_303] : memref<8x8x64xf32, #tpu.memory_space<vmem>>, vector<1x8x64xf32>
    %454 = vector.shape_cast %453 : vector<1x8x64xf32> to vector<8x64xf32>
    %455 = arith.subf %448, %434 : vector<8x32xf32>
    %456 = arith.mulf %452, %455 : vector<8x32xf32>
    %457 = arith.addf %434, %456 : vector<8x32xf32>
    %c0_304 = arith.constant 0 : index
    %c0_305 = arith.constant 0 : index
    %458 = vector.load %arg14[%c0_304, %c0_305] : memref<8x32xf32, #tpu.memory_space<vmem>>, vector<8x32xf32>
    tpu.vector_store %arg14[%c0_304, %c0_305], %457 {strides = array<i32>} : memref<8x32xf32, #tpu.memory_space<vmem>>, vector<8x32xf32>,
    %459 = tpu.concatenate %450, %450 in 1 : vector<8x32xf32>, vector<8x32xf32> -> vector<8x64xf32>
    %460 = arith.subf %459, %433 : vector<8x64xf32>
    %461 = arith.mulf %454, %460 : vector<8x64xf32>
    %462 = arith.addf %433, %461 : vector<8x64xf32>
    %c0_306 = arith.constant 0 : index
    %c0_307 = arith.constant 0 : index
    %463 = vector.load %arg13[%c0_306, %c0_307] : memref<8x64xf32, #tpu.memory_space<vmem>>, vector<8x64xf32>
    tpu.vector_store %arg13[%c0_306, %c0_307], %462 {strides = array<i32>} : memref<8x64xf32, #tpu.memory_space<vmem>>, vector<8x64xf32>,
    %464 = arith.mulf %452, %450 : vector<8x32xf32>
    %465 = vector.extract_strided_slice %464 {offsets = [0, 0], sizes = [4, 32], strides = [1, 1]} : vector<8x32xf32> to vector<4x32xf32>
    %c8_308 = arith.constant 8 : index
    %c0_309 = arith.constant 0 : index
    %466 = vector.load %arg10[%c8_308, %c0_309] : memref<32x64xf32, #tpu.memory_space<vmem>>, vector<4x32xf32>
    tpu.vector_store %arg10[%c8_308, %c0_309], %465 {strides = array<i32>} : memref<32x64xf32, #tpu.memory_space<vmem>>, vector<4x32xf32>,
    %467 = vector.extract_strided_slice %464 {offsets = [4, 0], sizes = [4, 32], strides = [1, 1]} : vector<8x32xf32> to vector<4x32xf32>
    %c20_310 = arith.constant 20 : index
    %c32_311 = arith.constant 32 : index
    %468 = vector.load %arg10[%c20_310, %c32_311] : memref<32x64xf32, #tpu.memory_space<vmem>>, vector<4x32xf32>
    tpu.vector_store %arg10[%c20_310, %c32_311], %467 {strides = array<i32>} : memref<32x64xf32, #tpu.memory_space<vmem>>, vector<4x32xf32>,
    %c12_312 = arith.constant 12 : index
    %c0_313 = arith.constant 0 : index
    %469 = vector.load %arg17[%c12_312, %c0_313] : memref<32x256xf32, #tpu.memory_space<vmem>>, vector<4x128xf32>
    %c16_314 = arith.constant 16 : index
    %c128_315 = arith.constant 128 : index
    %470 = vector.load %arg17[%c16_314, %c128_315] : memref<32x256xf32, #tpu.memory_space<vmem>>, vector<4x128xf32>
    %471 = tpu.concatenate %469, %470 in 0 : vector<4x128xf32>, vector<4x128xf32> -> vector<8x128xf32>
    %c0_316 = arith.constant 0 : index
    %c0_317 = arith.constant 0 : index
    %472 = vector.load %arg13[%c0_316, %c0_317] : memref<8x64xf32, #tpu.memory_space<vmem>>, vector<8x64xf32>
    %c0_318 = arith.constant 0 : index
    %c0_319 = arith.constant 0 : index
    %473 = vector.load %arg14[%c0_318, %c0_319] : memref<8x32xf32, #tpu.memory_space<vmem>>, vector<8x32xf32>
    %cst_320 = arith.constant dense<0.000000e+00> : vector<8x128xf32>
    %474 = tpu.matmul %472, %351, %cst_320 {dimension_numbers = #tpu.dot_dimension_numbers<[1], [0], [0], [1], [0, 0, 1, 1], [], []>} : vector<8x64xf32>, vector<64x128xf32>, vector<8x128xf32> -> vector<8x128xf32>
    %475 = arith.addf %471, %474 : vector<8x128xf32>
    %476 = math.tanh %475 : vector<8x128xf32>
    %cst_321 = arith.constant 5.000000e-01 : f32
    %477 = vector.broadcast %cst_321 : f32 to vector<8x128xf32>
    %478 = arith.mulf %477, %476 : vector<8x128xf32>
    %cst_322 = arith.constant 5.000000e-01 : f32
    %479 = vector.broadcast %cst_322 : f32 to vector<8x128xf32>
    %480 = arith.addf %478, %479 : vector<8x128xf32>
    %481 = vector.extract_strided_slice %480 {offsets = [0, 0], sizes = [8, 32], strides = [1, 1]} : vector<8x128xf32> to vector<8x32xf32>
    %482 = vector.extract_strided_slice %480 {offsets = [0, 32], sizes = [8, 32], strides = [1, 1]} : vector<8x128xf32> to vector<8x32xf32>
    %483 = vector.extract_strided_slice %476 {offsets = [0, 64], sizes = [8, 32], strides = [1, 1]} : vector<8x128xf32> to vector<8x32xf32>
    %484 = vector.extract_strided_slice %480 {offsets = [0, 96], sizes = [8, 32], strides = [1, 1]} : vector<8x128xf32> to vector<8x32xf32>
    %485 = arith.mulf %482, %473 : vector<8x32xf32>
    %486 = arith.mulf %481, %483 : vector<8x32xf32>
    %487 = arith.addf %485, %486 : vector<8x32xf32>
    %488 = math.tanh %487 : vector<8x32xf32>
    %489 = arith.mulf %484, %488 : vector<8x32xf32>
    %c3_323 = arith.constant 3 : index
    %c0_324 = arith.constant 0 : index
    %c0_325 = arith.constant 0 : index
    %490 = vector.load %arg8[%c3_323, %c0_324, %c0_325] : memref<8x8x32xf32, #tpu.memory_space<vmem>>, vector<1x8x32xf32>
    %491 = vector.shape_cast %490 : vector<1x8x32xf32> to vector<8x32xf32>
    %c3_326 = arith.constant 3 : index
    %c0_327 = arith.constant 0 : index
    %c0_328 = arith.constant 0 : index
    %492 = vector.load %arg9[%c3_326, %c0_327, %c0_328] : memref<8x8x64xf32, #tpu.memory_space<vmem>>, vector<1x8x64xf32>
    %493 = vector.shape_cast %492 : vector<1x8x64xf32> to vector<8x64xf32>
    %494 = arith.subf %487, %473 : vector<8x32xf32>
    %495 = arith.mulf %491, %494 : vector<8x32xf32>
    %496 = arith.addf %473, %495 : vector<8x32xf32>
    %c0_329 = arith.constant 0 : index
    %c0_330 = arith.constant 0 : index
    %497 = vector.load %arg14[%c0_329, %c0_330] : memref<8x32xf32, #tpu.memory_space<vmem>>, vector<8x32xf32>
    tpu.vector_store %arg14[%c0_329, %c0_330], %496 {strides = array<i32>} : memref<8x32xf32, #tpu.memory_space<vmem>>, vector<8x32xf32>,
    %498 = tpu.concatenate %489, %489 in 1 : vector<8x32xf32>, vector<8x32xf32> -> vector<8x64xf32>
    %499 = arith.subf %498, %472 : vector<8x64xf32>
    %500 = arith.mulf %493, %499 : vector<8x64xf32>
    %501 = arith.addf %472, %500 : vector<8x64xf32>
    %c0_331 = arith.constant 0 : index
    %c0_332 = arith.constant 0 : index
    %502 = vector.load %arg13[%c0_331, %c0_332] : memref<8x64xf32, #tpu.memory_space<vmem>>, vector<8x64xf32>
    tpu.vector_store %arg13[%c0_331, %c0_332], %501 {strides = array<i32>} : memref<8x64xf32, #tpu.memory_space<vmem>>, vector<8x64xf32>,
    %503 = arith.mulf %491, %489 : vector<8x32xf32>
    %504 = vector.extract_strided_slice %503 {offsets = [0, 0], sizes = [4, 32], strides = [1, 1]} : vector<8x32xf32> to vector<4x32xf32>
    %c12_333 = arith.constant 12 : index
    %c0_334 = arith.constant 0 : index
    %505 = vector.load %arg10[%c12_333, %c0_334] : memref<32x64xf32, #tpu.memory_space<vmem>>, vector<4x32xf32>
    tpu.vector_store %arg10[%c12_333, %c0_334], %504 {strides = array<i32>} : memref<32x64xf32, #tpu.memory_space<vmem>>, vector<4x32xf32>,
    %506 = vector.extract_strided_slice %503 {offsets = [4, 0], sizes = [4, 32], strides = [1, 1]} : vector<8x32xf32> to vector<4x32xf32>
    %c16_335 = arith.constant 16 : index
    %c32_336 = arith.constant 32 : index
    %507 = vector.load %arg10[%c16_335, %c32_336] : memref<32x64xf32, #tpu.memory_space<vmem>>, vector<4x32xf32>
    tpu.vector_store %arg10[%c16_335, %c32_336], %506 {strides = array<i32>} : memref<32x64xf32, #tpu.memory_space<vmem>>, vector<4x32xf32>,
    %c16_337 = arith.constant 16 : index
    %c0_338 = arith.constant 0 : index
    %508 = vector.load %arg17[%c16_337, %c0_338] : memref<32x256xf32, #tpu.memory_space<vmem>>, vector<4x128xf32>
    %c12_339 = arith.constant 12 : index
    %c128_340 = arith.constant 128 : index
    %509 = vector.load %arg17[%c12_339, %c128_340] : memref<32x256xf32, #tpu.memory_space<vmem>>, vector<4x128xf32>
    %510 = tpu.concatenate %508, %509 in 0 : vector<4x128xf32>, vector<4x128xf32> -> vector<8x128xf32>
    %c0_341 = arith.constant 0 : index
    %c0_342 = arith.constant 0 : index
    %511 = vector.load %arg13[%c0_341, %c0_342] : memref<8x64xf32, #tpu.memory_space<vmem>>, vector<8x64xf32>
    %c0_343 = arith.constant 0 : index
    %c0_344 = arith.constant 0 : index
    %512 = vector.load %arg14[%c0_343, %c0_344] : memref<8x32xf32, #tpu.memory_space<vmem>>, vector<8x32xf32>
    %cst_345 = arith.constant dense<0.000000e+00> : vector<8x128xf32>
    %513 = tpu.matmul %511, %351, %cst_345 {dimension_numbers = #tpu.dot_dimension_numbers<[1], [0], [0], [1], [0, 0, 1, 1], [], []>} : vector<8x64xf32>, vector<64x128xf32>, vector<8x128xf32> -> vector<8x128xf32>
    %514 = arith.addf %510, %513 : vector<8x128xf32>
    %515 = math.tanh %514 : vector<8x128xf32>
    %cst_346 = arith.constant 5.000000e-01 : f32
    %516 = vector.broadcast %cst_346 : f32 to vector<8x128xf32>
    %517 = arith.mulf %516, %515 : vector<8x128xf32>
    %cst_347 = arith.constant 5.000000e-01 : f32
    %518 = vector.broadcast %cst_347 : f32 to vector<8x128xf32>
    %519 = arith.addf %517, %518 : vector<8x128xf32>
    %520 = vector.extract_strided_slice %519 {offsets = [0, 0], sizes = [8, 32], strides = [1, 1]} : vector<8x128xf32> to vector<8x32xf32>
    %521 = vector.extract_strided_slice %519 {offsets = [0, 32], sizes = [8, 32], strides = [1, 1]} : vector<8x128xf32> to vector<8x32xf32>
    %522 = vector.extract_strided_slice %515 {offsets = [0, 64], sizes = [8, 32], strides = [1, 1]} : vector<8x128xf32> to vector<8x32xf32>
    %523 = vector.extract_strided_slice %519 {offsets = [0, 96], sizes = [8, 32], strides = [1, 1]} : vector<8x128xf32> to vector<8x32xf32>
    %524 = arith.mulf %521, %512 : vector<8x32xf32>
    %525 = arith.mulf %520, %522 : vector<8x32xf32>
    %526 = arith.addf %524, %525 : vector<8x32xf32>
    %527 = math.tanh %526 : vector<8x32xf32>
    %528 = arith.mulf %523, %527 : vector<8x32xf32>
    %c4_348 = arith.constant 4 : index
    %c0_349 = arith.constant 0 : index
    %c0_350 = arith.constant 0 : index
    %529 = vector.load %arg8[%c4_348, %c0_349, %c0_350] : memref<8x8x32xf32, #tpu.memory_space<vmem>>, vector<1x8x32xf32>
    %530 = vector.shape_cast %529 : vector<1x8x32xf32> to vector<8x32xf32>
    %c4_351 = arith.constant 4 : index
    %c0_352 = arith.constant 0 : index
    %c0_353 = arith.constant 0 : index
    %531 = vector.load %arg9[%c4_351, %c0_352, %c0_353] : memref<8x8x64xf32, #tpu.memory_space<vmem>>, vector<1x8x64xf32>
    %532 = vector.shape_cast %531 : vector<1x8x64xf32> to vector<8x64xf32>
    %533 = arith.subf %526, %512 : vector<8x32xf32>
    %534 = arith.mulf %530, %533 : vector<8x32xf32>
    %535 = arith.addf %512, %534 : vector<8x32xf32>
    %c0_354 = arith.constant 0 : index
    %c0_355 = arith.constant 0 : index
    %536 = vector.load %arg14[%c0_354, %c0_355] : memref<8x32xf32, #tpu.memory_space<vmem>>, vector<8x32xf32>
    tpu.vector_store %arg14[%c0_354, %c0_355], %535 {strides = array<i32>} : memref<8x32xf32, #tpu.memory_space<vmem>>, vector<8x32xf32>,
    %537 = tpu.concatenate %528, %528 in 1 : vector<8x32xf32>, vector<8x32xf32> -> vector<8x64xf32>
    %538 = arith.subf %537, %511 : vector<8x64xf32>
    %539 = arith.mulf %532, %538 : vector<8x64xf32>
    %540 = arith.addf %511, %539 : vector<8x64xf32>
    %c0_356 = arith.constant 0 : index
    %c0_357 = arith.constant 0 : index
    %541 = vector.load %arg13[%c0_356, %c0_357] : memref<8x64xf32, #tpu.memory_space<vmem>>, vector<8x64xf32>
    tpu.vector_store %arg13[%c0_356, %c0_357], %540 {strides = array<i32>} : memref<8x64xf32, #tpu.memory_space<vmem>>, vector<8x64xf32>,
    %542 = arith.mulf %530, %528 : vector<8x32xf32>
    %543 = vector.extract_strided_slice %542 {offsets = [0, 0], sizes = [4, 32], strides = [1, 1]} : vector<8x32xf32> to vector<4x32xf32>
    %c16_358 = arith.constant 16 : index
    %c0_359 = arith.constant 0 : index
    %544 = vector.load %arg10[%c16_358, %c0_359] : memref<32x64xf32, #tpu.memory_space<vmem>>, vector<4x32xf32>
    tpu.vector_store %arg10[%c16_358, %c0_359], %543 {strides = array<i32>} : memref<32x64xf32, #tpu.memory_space<vmem>>, vector<4x32xf32>,
    %545 = vector.extract_strided_slice %542 {offsets = [4, 0], sizes = [4, 32], strides = [1, 1]} : vector<8x32xf32> to vector<4x32xf32>
    %c12_360 = arith.constant 12 : index
    %c32_361 = arith.constant 32 : index
    %546 = vector.load %arg10[%c12_360, %c32_361] : memref<32x64xf32, #tpu.memory_space<vmem>>, vector<4x32xf32>
    tpu.vector_store %arg10[%c12_360, %c32_361], %545 {strides = array<i32>} : memref<32x64xf32, #tpu.memory_space<vmem>>, vector<4x32xf32>,
    %c20_362 = arith.constant 20 : index
    %c0_363 = arith.constant 0 : index
    %547 = vector.load %arg17[%c20_362, %c0_363] : memref<32x256xf32, #tpu.memory_space<vmem>>, vector<4x128xf32>
    %c8_364 = arith.constant 8 : index
    %c128_365 = arith.constant 128 : index
    %548 = vector.load %arg17[%c8_364, %c128_365] : memref<32x256xf32, #tpu.memory_space<vmem>>, vector<4x128xf32>
    %549 = tpu.concatenate %547, %548 in 0 : vector<4x128xf32>, vector<4x128xf32> -> vector<8x128xf32>
    %c0_366 = arith.constant 0 : index
    %c0_367 = arith.constant 0 : index
    %550 = vector.load %arg13[%c0_366, %c0_367] : memref<8x64xf32, #tpu.memory_space<vmem>>, vector<8x64xf32>
    %c0_368 = arith.constant 0 : index
    %c0_369 = arith.constant 0 : index
    %551 = vector.load %arg14[%c0_368, %c0_369] : memref<8x32xf32, #tpu.memory_space<vmem>>, vector<8x32xf32>
    %cst_370 = arith.constant dense<0.000000e+00> : vector<8x128xf32>
    %552 = tpu.matmul %550, %351, %cst_370 {dimension_numbers = #tpu.dot_dimension_numbers<[1], [0], [0], [1], [0, 0, 1, 1], [], []>} : vector<8x64xf32>, vector<64x128xf32>, vector<8x128xf32> -> vector<8x128xf32>
    %553 = arith.addf %549, %552 : vector<8x128xf32>
    %554 = math.tanh %553 : vector<8x128xf32>
    %cst_371 = arith.constant 5.000000e-01 : f32
    %555 = vector.broadcast %cst_371 : f32 to vector<8x128xf32>
    %556 = arith.mulf %555, %554 : vector<8x128xf32>
    %cst_372 = arith.constant 5.000000e-01 : f32
    %557 = vector.broadcast %cst_372 : f32 to vector<8x128xf32>
    %558 = arith.addf %556, %557 : vector<8x128xf32>
    %559 = vector.extract_strided_slice %558 {offsets = [0, 0], sizes = [8, 32], strides = [1, 1]} : vector<8x128xf32> to vector<8x32xf32>
    %560 = vector.extract_strided_slice %558 {offsets = [0, 32], sizes = [8, 32], strides = [1, 1]} : vector<8x128xf32> to vector<8x32xf32>
    %561 = vector.extract_strided_slice %554 {offsets = [0, 64], sizes = [8, 32], strides = [1, 1]} : vector<8x128xf32> to vector<8x32xf32>
    %562 = vector.extract_strided_slice %558 {offsets = [0, 96], sizes = [8, 32], strides = [1, 1]} : vector<8x128xf32> to vector<8x32xf32>
    %563 = arith.mulf %560, %551 : vector<8x32xf32>
    %564 = arith.mulf %559, %561 : vector<8x32xf32>
    %565 = arith.addf %563, %564 : vector<8x32xf32>
    %566 = math.tanh %565 : vector<8x32xf32>
    %567 = arith.mulf %562, %566 : vector<8x32xf32>
    %c5_373 = arith.constant 5 : index
    %c0_374 = arith.constant 0 : index
    %c0_375 = arith.constant 0 : index
    %568 = vector.load %arg8[%c5_373, %c0_374, %c0_375] : memref<8x8x32xf32, #tpu.memory_space<vmem>>, vector<1x8x32xf32>
    %569 = vector.shape_cast %568 : vector<1x8x32xf32> to vector<8x32xf32>
    %c5_376 = arith.constant 5 : index
    %c0_377 = arith.constant 0 : index
    %c0_378 = arith.constant 0 : index
    %570 = vector.load %arg9[%c5_376, %c0_377, %c0_378] : memref<8x8x64xf32, #tpu.memory_space<vmem>>, vector<1x8x64xf32>
    %571 = vector.shape_cast %570 : vector<1x8x64xf32> to vector<8x64xf32>
    %572 = arith.subf %565, %551 : vector<8x32xf32>
    %573 = arith.mulf %569, %572 : vector<8x32xf32>
    %574 = arith.addf %551, %573 : vector<8x32xf32>
    %c0_379 = arith.constant 0 : index
    %c0_380 = arith.constant 0 : index
    %575 = vector.load %arg14[%c0_379, %c0_380] : memref<8x32xf32, #tpu.memory_space<vmem>>, vector<8x32xf32>
    tpu.vector_store %arg14[%c0_379, %c0_380], %574 {strides = array<i32>} : memref<8x32xf32, #tpu.memory_space<vmem>>, vector<8x32xf32>,
    %576 = tpu.concatenate %567, %567 in 1 : vector<8x32xf32>, vector<8x32xf32> -> vector<8x64xf32>
    %577 = arith.subf %576, %550 : vector<8x64xf32>
    %578 = arith.mulf %571, %577 : vector<8x64xf32>
    %579 = arith.addf %550, %578 : vector<8x64xf32>
    %c0_381 = arith.constant 0 : index
    %c0_382 = arith.constant 0 : index
    %580 = vector.load %arg13[%c0_381, %c0_382] : memref<8x64xf32, #tpu.memory_space<vmem>>, vector<8x64xf32>
    tpu.vector_store %arg13[%c0_381, %c0_382], %579 {strides = array<i32>} : memref<8x64xf32, #tpu.memory_space<vmem>>, vector<8x64xf32>,
    %581 = arith.mulf %569, %567 : vector<8x32xf32>
    %582 = vector.extract_strided_slice %581 {offsets = [0, 0], sizes = [4, 32], strides = [1, 1]} : vector<8x32xf32> to vector<4x32xf32>
    %c20_383 = arith.constant 20 : index
    %c0_384 = arith.constant 0 : index
    %583 = vector.load %arg10[%c20_383, %c0_384] : memref<32x64xf32, #tpu.memory_space<vmem>>, vector<4x32xf32>
    tpu.vector_store %arg10[%c20_383, %c0_384], %582 {strides = array<i32>} : memref<32x64xf32, #tpu.memory_space<vmem>>, vector<4x32xf32>,
    %584 = vector.extract_strided_slice %581 {offsets = [4, 0], sizes = [4, 32], strides = [1, 1]} : vector<8x32xf32> to vector<4x32xf32>
    %c8_385 = arith.constant 8 : index
    %c32_386 = arith.constant 32 : index
    %585 = vector.load %arg10[%c8_385, %c32_386] : memref<32x64xf32, #tpu.memory_space<vmem>>, vector<4x32xf32>
    tpu.vector_store %arg10[%c8_385, %c32_386], %584 {strides = array<i32>} : memref<32x64xf32, #tpu.memory_space<vmem>>, vector<4x32xf32>,
    %c24_387 = arith.constant 24 : index
    %c0_388 = arith.constant 0 : index
    %586 = vector.load %arg17[%c24_387, %c0_388] : memref<32x256xf32, #tpu.memory_space<vmem>>, vector<4x128xf32>
    %c4_389 = arith.constant 4 : index
    %c128_390 = arith.constant 128 : index
    %587 = vector.load %arg17[%c4_389, %c128_390] : memref<32x256xf32, #tpu.memory_space<vmem>>, vector<4x128xf32>
    %588 = tpu.concatenate %586, %587 in 0 : vector<4x128xf32>, vector<4x128xf32> -> vector<8x128xf32>
    %c0_391 = arith.constant 0 : index
    %c0_392 = arith.constant 0 : index
    %589 = vector.load %arg13[%c0_391, %c0_392] : memref<8x64xf32, #tpu.memory_space<vmem>>, vector<8x64xf32>
    %c0_393 = arith.constant 0 : index
    %c0_394 = arith.constant 0 : index
    %590 = vector.load %arg14[%c0_393, %c0_394] : memref<8x32xf32, #tpu.memory_space<vmem>>, vector<8x32xf32>
    %cst_395 = arith.constant dense<0.000000e+00> : vector<8x128xf32>
    %591 = tpu.matmul %589, %351, %cst_395 {dimension_numbers = #tpu.dot_dimension_numbers<[1], [0], [0], [1], [0, 0, 1, 1], [], []>} : vector<8x64xf32>, vector<64x128xf32>, vector<8x128xf32> -> vector<8x128xf32>
    %592 = arith.addf %588, %591 : vector<8x128xf32>
    %593 = math.tanh %592 : vector<8x128xf32>
    %cst_396 = arith.constant 5.000000e-01 : f32
    %594 = vector.broadcast %cst_396 : f32 to vector<8x128xf32>
    %595 = arith.mulf %594, %593 : vector<8x128xf32>
    %cst_397 = arith.constant 5.000000e-01 : f32
    %596 = vector.broadcast %cst_397 : f32 to vector<8x128xf32>
    %597 = arith.addf %595, %596 : vector<8x128xf32>
    %598 = vector.extract_strided_slice %597 {offsets = [0, 0], sizes = [8, 32], strides = [1, 1]} : vector<8x128xf32> to vector<8x32xf32>
    %599 = vector.extract_strided_slice %597 {offsets = [0, 32], sizes = [8, 32], strides = [1, 1]} : vector<8x128xf32> to vector<8x32xf32>
    %600 = vector.extract_strided_slice %593 {offsets = [0, 64], sizes = [8, 32], strides = [1, 1]} : vector<8x128xf32> to vector<8x32xf32>
    %601 = vector.extract_strided_slice %597 {offsets = [0, 96], sizes = [8, 32], strides = [1, 1]} : vector<8x128xf32> to vector<8x32xf32>
    %602 = arith.mulf %599, %590 : vector<8x32xf32>
    %603 = arith.mulf %598, %600 : vector<8x32xf32>
    %604 = arith.addf %602, %603 : vector<8x32xf32>
    %605 = math.tanh %604 : vector<8x32xf32>
    %606 = arith.mulf %601, %605 : vector<8x32xf32>
    %c6_398 = arith.constant 6 : index
    %c0_399 = arith.constant 0 : index
    %c0_400 = arith.constant 0 : index
    %607 = vector.load %arg8[%c6_398, %c0_399, %c0_400] : memref<8x8x32xf32, #tpu.memory_space<vmem>>, vector<1x8x32xf32>
    %608 = vector.shape_cast %607 : vector<1x8x32xf32> to vector<8x32xf32>
    %c6_401 = arith.constant 6 : index
    %c0_402 = arith.constant 0 : index
    %c0_403 = arith.constant 0 : index
    %609 = vector.load %arg9[%c6_401, %c0_402, %c0_403] : memref<8x8x64xf32, #tpu.memory_space<vmem>>, vector<1x8x64xf32>
    %610 = vector.shape_cast %609 : vector<1x8x64xf32> to vector<8x64xf32>
    %611 = arith.subf %604, %590 : vector<8x32xf32>
    %612 = arith.mulf %608, %611 : vector<8x32xf32>
    %613 = arith.addf %590, %612 : vector<8x32xf32>
    %c0_404 = arith.constant 0 : index
    %c0_405 = arith.constant 0 : index
    %614 = vector.load %arg14[%c0_404, %c0_405] : memref<8x32xf32, #tpu.memory_space<vmem>>, vector<8x32xf32>
    tpu.vector_store %arg14[%c0_404, %c0_405], %613 {strides = array<i32>} : memref<8x32xf32, #tpu.memory_space<vmem>>, vector<8x32xf32>,
    %615 = tpu.concatenate %606, %606 in 1 : vector<8x32xf32>, vector<8x32xf32> -> vector<8x64xf32>
    %616 = arith.subf %615, %589 : vector<8x64xf32>
    %617 = arith.mulf %610, %616 : vector<8x64xf32>
    %618 = arith.addf %589, %617 : vector<8x64xf32>
    %c0_406 = arith.constant 0 : index
    %c0_407 = arith.constant 0 : index
    %619 = vector.load %arg13[%c0_406, %c0_407] : memref<8x64xf32, #tpu.memory_space<vmem>>, vector<8x64xf32>
    tpu.vector_store %arg13[%c0_406, %c0_407], %618 {strides = array<i32>} : memref<8x64xf32, #tpu.memory_space<vmem>>, vector<8x64xf32>,
    %620 = arith.mulf %608, %606 : vector<8x32xf32>
    %621 = vector.extract_strided_slice %620 {offsets = [0, 0], sizes = [4, 32], strides = [1, 1]} : vector<8x32xf32> to vector<4x32xf32>
    %c24_408 = arith.constant 24 : index
    %c0_409 = arith.constant 0 : index
    %622 = vector.load %arg10[%c24_408, %c0_409] : memref<32x64xf32, #tpu.memory_space<vmem>>, vector<4x32xf32>
    tpu.vector_store %arg10[%c24_408, %c0_409], %621 {strides = array<i32>} : memref<32x64xf32, #tpu.memory_space<vmem>>, vector<4x32xf32>,
    %623 = vector.extract_strided_slice %620 {offsets = [4, 0], sizes = [4, 32], strides = [1, 1]} : vector<8x32xf32> to vector<4x32xf32>
    %c4_410 = arith.constant 4 : index
    %c32_411 = arith.constant 32 : index
    %624 = vector.load %arg10[%c4_410, %c32_411] : memref<32x64xf32, #tpu.memory_space<vmem>>, vector<4x32xf32>
    tpu.vector_store %arg10[%c4_410, %c32_411], %623 {strides = array<i32>} : memref<32x64xf32, #tpu.memory_space<vmem>>, vector<4x32xf32>,
    %c28_412 = arith.constant 28 : index
    %c0_413 = arith.constant 0 : index
    %625 = vector.load %arg17[%c28_412, %c0_413] : memref<32x256xf32, #tpu.memory_space<vmem>>, vector<4x128xf32>
    %c0_414 = arith.constant 0 : index
    %c128_415 = arith.constant 128 : index
    %626 = vector.load %arg17[%c0_414, %c128_415] : memref<32x256xf32, #tpu.memory_space<vmem>>, vector<4x128xf32>
    %627 = tpu.concatenate %625, %626 in 0 : vector<4x128xf32>, vector<4x128xf32> -> vector<8x128xf32>
    %c0_416 = arith.constant 0 : index
    %c0_417 = arith.constant 0 : index
    %628 = vector.load %arg13[%c0_416, %c0_417] : memref<8x64xf32, #tpu.memory_space<vmem>>, vector<8x64xf32>
    %c0_418 = arith.constant 0 : index
    %c0_419 = arith.constant 0 : index
    %629 = vector.load %arg14[%c0_418, %c0_419] : memref<8x32xf32, #tpu.memory_space<vmem>>, vector<8x32xf32>
    %cst_420 = arith.constant dense<0.000000e+00> : vector<8x128xf32>
    %630 = tpu.matmul %628, %351, %cst_420 {dimension_numbers = #tpu.dot_dimension_numbers<[1], [0], [0], [1], [0, 0, 1, 1], [], []>} : vector<8x64xf32>, vector<64x128xf32>, vector<8x128xf32> -> vector<8x128xf32>
    %631 = arith.addf %627, %630 : vector<8x128xf32>
    %632 = math.tanh %631 : vector<8x128xf32>
    %cst_421 = arith.constant 5.000000e-01 : f32
    %633 = vector.broadcast %cst_421 : f32 to vector<8x128xf32>
    %634 = arith.mulf %633, %632 : vector<8x128xf32>
    %cst_422 = arith.constant 5.000000e-01 : f32
    %635 = vector.broadcast %cst_422 : f32 to vector<8x128xf32>
    %636 = arith.addf %634, %635 : vector<8x128xf32>
    %637 = vector.extract_strided_slice %636 {offsets = [0, 0], sizes = [8, 32], strides = [1, 1]} : vector<8x128xf32> to vector<8x32xf32>
    %638 = vector.extract_strided_slice %636 {offsets = [0, 32], sizes = [8, 32], strides = [1, 1]} : vector<8x128xf32> to vector<8x32xf32>
    %639 = vector.extract_strided_slice %632 {offsets = [0, 64], sizes = [8, 32], strides = [1, 1]} : vector<8x128xf32> to vector<8x32xf32>
    %640 = vector.extract_strided_slice %636 {offsets = [0, 96], sizes = [8, 32], strides = [1, 1]} : vector<8x128xf32> to vector<8x32xf32>
    %641 = arith.mulf %638, %629 : vector<8x32xf32>
    %642 = arith.mulf %637, %639 : vector<8x32xf32>
    %643 = arith.addf %641, %642 : vector<8x32xf32>
    %644 = math.tanh %643 : vector<8x32xf32>
    %645 = arith.mulf %640, %644 : vector<8x32xf32>
    %c7_423 = arith.constant 7 : index
    %c0_424 = arith.constant 0 : index
    %c0_425 = arith.constant 0 : index
    %646 = vector.load %arg8[%c7_423, %c0_424, %c0_425] : memref<8x8x32xf32, #tpu.memory_space<vmem>>, vector<1x8x32xf32>
    %647 = vector.shape_cast %646 : vector<1x8x32xf32> to vector<8x32xf32>
    %c7_426 = arith.constant 7 : index
    %c0_427 = arith.constant 0 : index
    %c0_428 = arith.constant 0 : index
    %648 = vector.load %arg9[%c7_426, %c0_427, %c0_428] : memref<8x8x64xf32, #tpu.memory_space<vmem>>, vector<1x8x64xf32>
    %649 = vector.shape_cast %648 : vector<1x8x64xf32> to vector<8x64xf32>
    %650 = arith.subf %643, %629 : vector<8x32xf32>
    %651 = arith.mulf %647, %650 : vector<8x32xf32>
    %652 = arith.addf %629, %651 : vector<8x32xf32>
    %c0_429 = arith.constant 0 : index
    %c0_430 = arith.constant 0 : index
    %653 = vector.load %arg14[%c0_429, %c0_430] : memref<8x32xf32, #tpu.memory_space<vmem>>, vector<8x32xf32>
    tpu.vector_store %arg14[%c0_429, %c0_430], %652 {strides = array<i32>} : memref<8x32xf32, #tpu.memory_space<vmem>>, vector<8x32xf32>,
    %654 = tpu.concatenate %645, %645 in 1 : vector<8x32xf32>, vector<8x32xf32> -> vector<8x64xf32>
    %655 = arith.subf %654, %628 : vector<8x64xf32>
    %656 = arith.mulf %649, %655 : vector<8x64xf32>
    %657 = arith.addf %628, %656 : vector<8x64xf32>
    %c0_431 = arith.constant 0 : index
    %c0_432 = arith.constant 0 : index
    %658 = vector.load %arg13[%c0_431, %c0_432] : memref<8x64xf32, #tpu.memory_space<vmem>>, vector<8x64xf32>
    tpu.vector_store %arg13[%c0_431, %c0_432], %657 {strides = array<i32>} : memref<8x64xf32, #tpu.memory_space<vmem>>, vector<8x64xf32>,
    %659 = arith.mulf %647, %645 : vector<8x32xf32>
    %660 = vector.extract_strided_slice %659 {offsets = [0, 0], sizes = [4, 32], strides = [1, 1]} : vector<8x32xf32> to vector<4x32xf32>
    %c28_433 = arith.constant 28 : index
    %c0_434 = arith.constant 0 : index
    %661 = vector.load %arg10[%c28_433, %c0_434] : memref<32x64xf32, #tpu.memory_space<vmem>>, vector<4x32xf32>
    tpu.vector_store %arg10[%c28_433, %c0_434], %660 {strides = array<i32>} : memref<32x64xf32, #tpu.memory_space<vmem>>, vector<4x32xf32>,
    %662 = vector.extract_strided_slice %659 {offsets = [4, 0], sizes = [4, 32], strides = [1, 1]} : vector<8x32xf32> to vector<4x32xf32>
    %c0_435 = arith.constant 0 : index
    %c32_436 = arith.constant 32 : index
    %663 = vector.load %arg10[%c0_435, %c32_436] : memref<32x64xf32, #tpu.memory_space<vmem>>, vector<4x32xf32>
    tpu.vector_store %arg10[%c0_435, %c32_436], %662 {strides = array<i32>} : memref<32x64xf32, #tpu.memory_space<vmem>>, vector<4x32xf32>,
    %c0_437 = arith.constant 0 : index
    %c0_438 = arith.constant 0 : index
    %664 = vector.load %arg13[%c0_437, %c0_438] : memref<8x64xf32, #tpu.memory_space<vmem>>, vector<4x32xf32>
    %c2_439 = arith.constant 2 : index
    %c0_440 = arith.constant 0 : index
    %c0_441 = arith.constant 0 : index
    %665 = vector.load %arg11[%c2_439, %c0_440, %c0_441] : memref<4x4x32xf32, #tpu.memory_space<vmem>>, vector<1x4x32xf32>
    %666 = vector.shape_cast %665 : vector<1x4x32xf32> to vector<4x32xf32>
    %667 = vector.shape_cast %664 : vector<4x32xf32> to vector<1x4x32xf32>
    tpu.vector_store %arg11[%c2_439, %c0_440, %c0_441], %667 {strides = array<i32>} : memref<4x4x32xf32, #tpu.memory_space<vmem>>, vector<1x4x32xf32>,
    %c4_442 = arith.constant 4 : index
    %c32_443 = arith.constant 32 : index
    %668 = vector.load %arg13[%c4_442, %c32_443] : memref<8x64xf32, #tpu.memory_space<vmem>>, vector<4x32xf32>
    %c3_444 = arith.constant 3 : index
    %c0_445 = arith.constant 0 : index
    %c0_446 = arith.constant 0 : index
    %669 = vector.load %arg11[%c3_444, %c0_445, %c0_446] : memref<4x4x32xf32, #tpu.memory_space<vmem>>, vector<1x4x32xf32>
    %670 = vector.shape_cast %669 : vector<1x4x32xf32> to vector<4x32xf32>
    %671 = vector.shape_cast %668 : vector<4x32xf32> to vector<1x4x32xf32>
    tpu.vector_store %arg11[%c3_444, %c0_445, %c0_446], %671 {strides = array<i32>} : memref<4x4x32xf32, #tpu.memory_space<vmem>>, vector<1x4x32xf32>,
    %c0_447 = arith.constant 0 : index
    %c0_448 = arith.constant 0 : index
    %672 = vector.load %arg14[%c0_447, %c0_448] : memref<8x32xf32, #tpu.memory_space<vmem>>, vector<4x32xf32>
    %c2_449 = arith.constant 2 : index
    %c0_450 = arith.constant 0 : index
    %c0_451 = arith.constant 0 : index
    %673 = vector.load %arg12[%c2_449, %c0_450, %c0_451] : memref<4x4x32xf32, #tpu.memory_space<vmem>>, vector<1x4x32xf32>
    %674 = vector.shape_cast %673 : vector<1x4x32xf32> to vector<4x32xf32>
    %675 = vector.shape_cast %672 : vector<4x32xf32> to vector<1x4x32xf32>
    tpu.vector_store %arg12[%c2_449, %c0_450, %c0_451], %675 {strides = array<i32>} : memref<4x4x32xf32, #tpu.memory_space<vmem>>, vector<1x4x32xf32>,
    %c4_452 = arith.constant 4 : index
    %c0_453 = arith.constant 0 : index
    %676 = vector.load %arg14[%c4_452, %c0_453] : memref<8x32xf32, #tpu.memory_space<vmem>>, vector<4x32xf32>
    %c3_454 = arith.constant 3 : index
    %c0_455 = arith.constant 0 : index
    %c0_456 = arith.constant 0 : index
    %677 = vector.load %arg12[%c3_454, %c0_455, %c0_456] : memref<4x4x32xf32, #tpu.memory_space<vmem>>, vector<1x4x32xf32>
    %678 = vector.shape_cast %677 : vector<1x4x32xf32> to vector<4x32xf32>
    %679 = vector.shape_cast %676 : vector<4x32xf32> to vector<1x4x32xf32>
    tpu.vector_store %arg12[%c3_454, %c0_455, %c0_456], %679 {strides = array<i32>} : memref<4x4x32xf32, #tpu.memory_space<vmem>>, vector<1x4x32xf32>,
    return
  }
  func.func @transform_0(%arg0: i32) -> (i32, i32) {
    %c0_i32 = arith.constant 0 : i32
    %c0_i32_0 = arith.constant 0 : i32
    %c0_i32_1 = arith.constant 0 : i32
    return %c0_i32, %c0_i32_0 : i32, i32
  }
  func.func @transform_1(%arg0: i32) -> (i32, i32) {
    %c0_i32 = arith.constant 0 : i32
    %c0_i32_0 = arith.constant 0 : i32
    %c0_i32_1 = arith.constant 0 : i32
    return %c0_i32, %c0_i32_0 : i32, i32
  }
  func.func @transform_2(%arg0: i32) -> (i32, i32) {
    %c0_i32 = arith.constant 0 : i32
    %c0_i32_0 = arith.constant 0 : i32
    %c0_i32_1 = arith.constant 0 : i32
    return %c0_i32, %c0_i32_0 : i32, i32
  }
  func.func @transform_3(%arg0: i32) -> (i32, i32) {
    %c0_i32 = arith.constant 0 : i32
    %c0_i32_0 = arith.constant 0 : i32
    %c0_i32_1 = arith.constant 0 : i32
    return %c0_i32, %c0_i32_0 : i32, i32
  }
  func.func @transform_4(%arg0: i32) -> (i32, i32) {
    %c0_i32 = arith.constant 0 : i32
    %c0_i32_0 = arith.constant 0 : i32
    %c0_i32_1 = arith.constant 0 : i32
    return %c0_i32, %c0_i32_0 : i32, i32
  }
  func.func @transform_5(%arg0: i32) -> (i32, i32) {
    %c0_i32 = arith.constant 0 : i32
    %c0_i32_0 = arith.constant 0 : i32
    %c0_i32_1 = arith.constant 0 : i32
    return %c0_i32, %c0_i32_0 : i32, i32
  }
  func.func @transform_6(%arg0: i32) -> (i32, i32) {
    %c0_i32 = arith.constant 0 : i32
    %c0_i32_0 = arith.constant 0 : i32
    %c0_i32_1 = arith.constant 0 : i32
    return %c0_i32, %c0_i32_0 : i32, i32
  }
  func.func @transform_7(%arg0: i32) -> (i32, i32, i32) {
    %c0_i32 = arith.constant 0 : i32
    %c0_i32_0 = arith.constant 0 : i32
    %c0_i32_1 = arith.constant 0 : i32
    %c0_i32_2 = arith.constant 0 : i32
    return %c0_i32, %c0_i32_0, %c0_i32_1 : i32, i32, i32
  }
  func.func @transform_8(%arg0: i32) -> (i32, i32, i32) {
    %c0_i32 = arith.constant 0 : i32
    %c0_i32_0 = arith.constant 0 : i32
    %c0_i32_1 = arith.constant 0 : i32
    %c0_i32_2 = arith.constant 0 : i32
    return %c0_i32, %c0_i32_0, %c0_i32_1 : i32, i32, i32
  }
  func.func @transform_9(%arg0: i32) -> (i32, i32) {
    %c0_i32 = arith.constant 0 : i32
    %c0_i32_0 = arith.constant 0 : i32
    %c0_i32_1 = arith.constant 0 : i32
    return %c0_i32, %c0_i32_0 : i32, i32
  }
  func.func @transform_10(%arg0: i32) -> (i32, i32, i32) {
    %c0_i32 = arith.constant 0 : i32
    %c0_i32_0 = arith.constant 0 : i32
    %c0_i32_1 = arith.constant 0 : i32
    %c0_i32_2 = arith.constant 0 : i32
    return %c0_i32, %c0_i32_0, %c0_i32_1 : i32, i32, i32
  }
  func.func @transform_11(%arg0: i32) -> (i32, i32, i32) {
    %c0_i32 = arith.constant 0 : i32
    %c0_i32_0 = arith.constant 0 : i32
    %c0_i32_1 = arith.constant 0 : i32
    %c0_i32_2 = arith.constant 0 : i32
    return %c0_i32, %c0_i32_0, %c0_i32_1 : i32, i32, i32
  }
}

</mosaic_0001>

<bundles_post_ra>
// kernel: encoder_forward.1
= control target key start
LH: loop header
LB: loop body
LE: loop exit
PB: predicated region body
PF: predicated region fallthrough
CT: control target
= control target key end

     0   :  { %17 = vsyncpa [#allocation8], 0  ;;  %s5526_s0 = inlined_call_operand.vmem [shape: f32[32,768], index: 0, kind: input, shape index: {}]   ;;  %s5527_s1 = inlined_call_operand.vmem [shape: f32[768,256], index: 1, kind: input, shape index: {}]   ;;  %s5528_s2 = inlined_call_operand.vmem [shape: f32[1,256], index: 2, kind: input, shape index: {}]   ;;  %s5529_s3 = inlined_call_operand.vmem [shape: f32[64,128], index: 3, kind: input, shape index: {}]   ;;  %s5530_s4 = inlined_call_operand.vmem [shape: f32[64,256], index: 4, kind: input, shape index: {}]   ;;  %s5531_s5 = inlined_call_operand.vmem [shape: f32[1,256], index: 5, kind: input, shape index: {}]   ;;  %s5532_s6 = inlined_call_operand.vmem [shape: f32[64,128], index: 6, kind: input, shape index: {}]   ;;  %s5533_s7 = inlined_call_operand.vmem [shape: f32[8,8,32], index: 7, kind: input, shape index: {}]   ;;  %s5534_s8 = inlined_call_operand.vmem [shape: f32[8,8,64], index: 8, kind: input, shape index: {}]   ;;  %s5535_s9 = inlined_call_operand.vmem [shape: f32[32,64], index: 9, kind: output, shape index: {0}]   ;;  %s5536_s10 = inlined_call_operand.hbm [shape: f32[4,4,32], index: 10, kind: output, shape index: {1}]   ;;  %s5537_s11 = inlined_call_operand.hbm [shape: f32[4,4,32], index: 11, kind: output, shape index: {2}]  }
   0x1   :  { %v62_v0 = vld [vmem:[%s5527_s1 + $0x8] sm:$0xff]  ;;  %v64_v1 = vld [vmem:[%s5527_s1 + $0x18] sm:$0xff]  ;;  %v61_v2 = vld [vmem:[%s5527_s1] sm:$0xff] }
   0x2   :  { %v3442_v3 = vpack.c.bf16 %v64_v1, %v62_v0  ;;  %v63_v4 = vld [vmem:[%s5527_s1 + $0x10] sm:$0xff]  ;;  %v66_v5 = vld [vmem:[%s5527_s1 + $0x28] sm:$0xff]  ;;  %v68_v6 = vld [vmem:[%s5527_s1 + $0x38] sm:$0xff] }
   0x3   :  { %v3444_v7 = vpack.c.bf16 %v63_v4, %v61_v2  ;;  %v3446_v8 = vpack.c.bf16 %v68_v6, %v66_v5  ;;  %v65_v9 = vld [vmem:[%s5527_s1 + $0x20] sm:$0xff]  ;;  %v67_v10 = vld [vmem:[%s5527_s1 + $0x30] sm:$0xff]  ;;  %v70_v11 = vld [vmem:[%s5527_s1 + $0x48] sm:$0xff] }
   0x4   :  { %3443 = vmatprep.subr.bf16.mxu0 %v3442_v3  ;;  %v72_v12 = vld [vmem:[%s5527_s1 + $0x58] sm:$0xff]  ;;  %v3448_v13 = vpack.c.bf16 %v67_v10, %v65_v9  ;;  %v69_v15 = vld [vmem:[%s5527_s1 + $0x40] sm:$0xff]  ;;  %v71_v16 = vld [vmem:[%s5527_s1 + $0x50] sm:$0xff] }
   0x5   :  { %3445 = vmatpush1.bf16.msra.mxu0 %v3444_v7  ;;  %v3450_v14 = vpack.c.bf16 %v72_v12, %v70_v11  ;;  %v74_v17 = vld [vmem:[%s5527_s1 + $0x68] sm:$0xff]  ;;  %v76_v18 = vld [vmem:[%s5527_s1 + $0x78] sm:$0xff]  ;;  %v3452_v19 = vpack.c.bf16 %v71_v16, %v69_v15  ;;  %v73_v21 = vld [vmem:[%s5527_s1 + $0x60] sm:$0xff] }
   0x6   :  { %3447 = vmatprep.subr.bf16.mxu0 %v3446_v8  ;;  %v3454_v20 = vpack.c.bf16 %v76_v18, %v74_v17  ;;  %v75_v22 = vld [vmem:[%s5527_s1 + $0x70] sm:$0xff]  ;;  %v78_v23 = vld [vmem:[%s5527_s1 + $0x88] sm:$0xff]  ;;  %v80_v24 = vld [vmem:[%s5527_s1 + $0x98] sm:$0xff] }
   0x7   :  { %v3456_v25 = vpack.c.bf16 %v75_v22, %v73_v21  ;;  %v3458_v26 = vpack.c.bf16 %v80_v24, %v78_v23  ;;  %v77_v27 = vld [vmem:[%s5527_s1 + $0x80] sm:$0xff]  ;;  %v79_v28 = vld [vmem:[%s5527_s1 + $0x90] sm:$0xff]  ;;  %v82_v29 = vld [vmem:[%s5527_s1 + $0xa8] sm:$0xff] }
   0x8   :  { %v84_v30 = vld [vmem:[%s5527_s1 + $0xb8] sm:$0xff]  ;;  %v3460_v31 = vpack.c.bf16 %v79_v28, %v77_v27  ;;  %v81_v33 = vld [vmem:[%s5527_s1 + $0xa0] sm:$0xff]  ;;  %v83_v34 = vld [vmem:[%s5527_s1 + $0xb0] sm:$0xff] }
   0x9   :  { %3449 = vmatpush1.bf16.msra.mxu0 %v3448_v13  ;;  %v3462_v32 = vpack.c.bf16 %v84_v30, %v82_v29  ;;  %v86_v35 = vld [vmem:[%s5527_s1 + $0xc8] sm:$0xff]  ;;  %v88_v36 = vld [vmem:[%s5527_s1 + $0xd8] sm:$0xff]  ;;  %v3464_v37 = vpack.c.bf16 %v83_v34, %v81_v33  ;;  %v85_v39 = vld [vmem:[%s5527_s1 + $0xc0] sm:$0xff] }
   0xa   :  { %3451 = vmatprep.subr.bf16.mxu0 %v3450_v14  ;;  %v3466_v38 = vpack.c.bf16 %v88_v36, %v86_v35  ;;  %v87_v40 = vld [vmem:[%s5527_s1 + $0xd0] sm:$0xff]  ;;  %v38_v41 = vld [vmem:[%s5526_s0 + $0x8] sm:$0xff]  ;;  %v92_v43 = vld [vmem:[%s5527_s1 + $0xf8] sm:$0xff] }
   0xb   :  { %v90_v42 = vld [vmem:[%s5527_s1 + $0xe8] sm:$0xff]  ;;  %329 = vmatprep.mubr.f32.mxu0 %v38_v41  ;;  %v3468_v44 = vpack.c.bf16 %v87_v40, %v85_v39  ;;  %v89_v46 = vld [vmem:[%s5527_s1 + $0xe0] sm:$0xff]  ;;  %v91_v47 = vld [vmem:[%s5527_s1 + $0xf0] sm:$0xff] }
   0xc   :  { %v3470_v45 = vpack.c.bf16 %v92_v43, %v90_v42  ;;  %v94_v48 = vld [vmem:[%s5527_s1 + $0x108] sm:$0xff]  ;;  %v96_v49 = vld [vmem:[%s5527_s1 + $0x118] sm:$0xff]  ;;  %v3472_v50 = vpack.c.bf16 %v91_v47, %v89_v46  ;;  %v93_v52 = vld [vmem:[%s5527_s1 + $0x100] sm:$0xff] }
   0xd   :  { %3453 = vmatpush1.bf16.msra.mxu0 %v3452_v19  ;;  %v3474_v51 = vpack.c.bf16 %v96_v49, %v94_v48  ;;  %v95_v53 = vld [vmem:[%s5527_s1 + $0x110] sm:$0xff]  ;;  %v98_v54 = vld [vmem:[%s5527_s1 + $0x128] sm:$0xff]  ;;  %v100_v55 = vld [vmem:[%s5527_s1 + $0x138] sm:$0xff] }
   0xe   :  { %3455 = vmatprep.subr.bf16.mxu0 %v3454_v20  ;;  %v3476_v56 = vpack.c.bf16 %v95_v53, %v93_v52  ;;  %v3478_v57 = vpack.c.bf16 %v100_v55, %v98_v54  ;;  %v97_v58 = vld [vmem:[%s5527_s1 + $0x120] sm:$0xff]  ;;  %v99_v59 = vld [vmem:[%s5527_s1 + $0x130] sm:$0xff]  ;;  %v102_v60 = vld [vmem:[%s5527_s1 + $0x148] sm:$0xff] }
   0xf   :  { %v104_v61 = vld [vmem:[%s5527_s1 + $0x158] sm:$0xff]  ;;  %v3480_v62 = vpack.c.bf16 %v99_v59, %v97_v58  ;;  %v101_v0 = vld [vmem:[%s5527_s1 + $0x140] sm:$0xff]  ;;  %v103_v1 = vld [vmem:[%s5527_s1 + $0x150] sm:$0xff] }
  0x10   :  { %v3482_v63 = vpack.c.bf16 %v104_v61, %v102_v60  ;;  %v106_v2 = vld [vmem:[%s5527_s1 + $0x168] sm:$0xff]  ;;  %v108_v3 = vld [vmem:[%s5527_s1 + $0x178] sm:$0xff]  ;;  %v3484_v4 = vpack.c.bf16 %v103_v1, %v101_v0  ;;  %v105_v6 = vld [vmem:[%s5527_s1 + $0x160] sm:$0xff] }
  0x11   :  { %3457 = vmatpush1.bf16.msra.mxu0 %v3456_v25  ;;  %v3486_v5 = vpack.c.bf16 %v108_v3, %v106_v2  ;;  %v107_v7 = vld [vmem:[%s5527_s1 + $0x170] sm:$0xff]  ;;  %v110_v8 = vld [vmem:[%s5527_s1 + $0x188] sm:$0xff]  ;;  %v112_v9 = vld [vmem:[%s5527_s1 + $0x198] sm:$0xff] }
  0x12   :  { %3459 = vmatprep.subr.bf16.mxu0 %v3458_v26  ;;  %v3488_v10 = vpack.c.bf16 %v107_v7, %v105_v6  ;;  %v3490_v11 = vpack.c.bf16 %v112_v9, %v110_v8  ;;  %v109_v12 = vld [vmem:[%s5527_s1 + $0x180] sm:$0xff]  ;;  %v111_v13 = vld [vmem:[%s5527_s1 + $0x190] sm:$0xff]  ;;  %v114_v14 = vld [vmem:[%s5527_s1 + $0x1a8] sm:$0xff] }
  0x13   :  { %v116_v15 = vld [vmem:[%s5527_s1 + $0x1b8] sm:$0xff]  ;;  %v3492_v16 = vpack.c.bf16 %v111_v13, %v109_v12  ;;  %v113_v18 = vld [vmem:[%s5527_s1 + $0x1a0] sm:$0xff]  ;;  %v115_v19 = vld [vmem:[%s5527_s1 + $0x1b0] sm:$0xff] }
  0x14   :  { %v3494_v17 = vpack.c.bf16 %v116_v15, %v114_v14  ;;  %v118_v20 = vld [vmem:[%s5527_s1 + $0x1c8] sm:$0xff]  ;;  %v120_v21 = vld [vmem:[%s5527_s1 + $0x1d8] sm:$0xff]  ;;  %v3496_v22 = vpack.c.bf16 %v115_v19, %v113_v18  ;;  %v117_v24 = vld [vmem:[%s5527_s1 + $0x1c0] sm:$0xff] }
  0x15   :  { %3461 = vmatpush1.bf16.msra.mxu0 %v3460_v31  ;;  %v3498_v23 = vpack.c.bf16 %v120_v21, %v118_v20  ;;  %v119_v25 = vld [vmem:[%s5527_s1 + $0x1d0] sm:$0xff]  ;;  %v122_v26 = vld [vmem:[%s5527_s1 + $0x1e8] sm:$0xff]  ;;  %v124_v27 = vld [vmem:[%s5527_s1 + $0x1f8] sm:$0xff] }
  0x16   :  { %3463 = vmatprep.subr.bf16.mxu0 %v3462_v32  ;;  %v3500_v28 = vpack.c.bf16 %v119_v25, %v117_v24  ;;  %v3502_v29 = vpack.c.bf16 %v124_v27, %v122_v26  ;;  %v121_v30 = vld [vmem:[%s5527_s1 + $0x1e0] sm:$0xff]  ;;  %v123_v31 = vld [vmem:[%s5527_s1 + $0x1f0] sm:$0xff]  ;;  %v126_v32 = vld [vmem:[%s5527_s1 + $0x208] sm:$0xff] }
  0x17   :  { %v128_v33 = vld [vmem:[%s5527_s1 + $0x218] sm:$0xff]  ;;  %v3504_v34 = vpack.c.bf16 %v123_v31, %v121_v30  ;;  %v125_v36 = vld [vmem:[%s5527_s1 + $0x200] sm:$0xff]  ;;  %v134_v46 = vld [vmem:[%s5527_s1 + $0x248] sm:$0xff] }
  0x18   :  { %v3506_v35 = vpack.c.bf16 %v128_v33, %v126_v32  ;;  %v132_v39 = vld [vmem:[%s5527_s1 + $0x238] sm:$0xff]  ;;  %v37_v40 = vld [vmem:[%s5526_s0] sm:$0xff]  ;;  %v43_v49 = vld [vmem:[%s5526_s0 + $0x30] sm:$0xff] }
  0x19   :  { %3465 = vmatpush1.bf16.msra.mxu0 %v3464_v37  ;;  %v127_v37 = vld [vmem:[%s5527_s1 + $0x210] sm:$0xff]  ;;  %v129_v43 = vld [vmem:[%s5527_s1 + $0x220] sm:$0xff]  ;;  %v136_v47 = vld [vmem:[%s5527_s1 + $0x258] sm:$0xff] }
  0x1a   :  { %3467 = vmatprep.subr.bf16.mxu0 %v3466_v38  ;;  %v130_v38 = vld [vmem:[%s5527_s1 + $0x228] sm:$0xff]  ;;  %v3508_v41 = vpack.c.bf16 %v127_v37, %v125_v36  ;;  %v135_v52 = vld [vmem:[%s5527_s1 + $0x250] sm:$0xff]  ;;  %v140_v55 = vld [vmem:[%s5527_s1 + $0x278] sm:$0xff] }
  0x1b   :  { %v3510_v42 = vpack.c.bf16 %v132_v39, %v130_v38  ;;  %v50_v53 = vld [vmem:[%s5526_s0 + $0x68] sm:$0xff] }
  0x1c   :  { %v138_v54 = vld [vmem:[%s5527_s1 + $0x268] sm:$0xff] }
  0x1d   :  { %3469 = vmatpush1.bf16.msra.mxu0 %v3468_v44  ;;  %v131_v44 = vld [vmem:[%s5527_s1 + $0x230] sm:$0xff] }
  0x1e   :  { %3471 = vmatprep.subr.bf16.mxu0 %v3470_v45  ;;  %v44_v45 = vld [vmem:[%s5526_s0 + $0x38] sm:$0xff]  ;;  %v3512_v48 = vpack.c.bf16 %v131_v44, %v129_v43 }
  0x21   :  { %3473 = vmatpush1.bf16.msra.mxu0 %v3472_v50  ;;  %v3514_v50 = vpack.c.bf16 %v136_v47, %v134_v46 }
  0x22   :  { %3475 = vmatprep.subr.bf16.mxu0 %v3474_v51  ;;  %v133_v51 = vld [vmem:[%s5527_s1 + $0x240] sm:$0xff] }
  0x25   :  { %3477 = vmatpush1.bf16.msra.mxu0 %v3476_v56 }
  0x26   :  { %3479 = vmatprep.subr.bf16.mxu0 %v3478_v57 }
  0x29   :  { %3481 = vmatpush1.bf16.msra.mxu0 %v3480_v62 }
  0x2a   :  { %3483 = vmatprep.subr.bf16.mxu0 %v3482_v63 }
  0x2d   :  { %3485 = vmatpush1.bf16.msra.mxu0 %v3484_v4 }
  0x2e   :  { %3487 = vmatprep.subr.bf16.mxu0 %v3486_v5 }
  0x31   :  { %3489 = vmatpush1.bf16.msra.mxu0 %v3488_v10 }
  0x32   :  { %3491 = vmatprep.subr.bf16.mxu0 %v3490_v11 }
  0x35   :  { %3493 = vmatpush1.bf16.msra.mxu0 %v3492_v16 }
  0x36   :  { %3495 = vmatprep.subr.bf16.mxu0 %v3494_v17 }
  0x39   :  { %3497 = vmatpush1.bf16.msra.mxu0 %v3496_v22 }
  0x3a   :  { %3499 = vmatprep.subr.bf16.mxu0 %v3498_v23 }
  0x3d   :  { %3501 = vmatpush1.bf16.msra.mxu0 %v3500_v28 }
  0x3e   :  { %3503 = vmatprep.subr.bf16.mxu0 %v3502_v29 }
  0x41   :  { %3505 = vmatpush1.bf16.msra.mxu0 %v3504_v34 }
  0x42   :  { %3507 = vmatprep.subr.bf16.mxu0 %v3506_v35 }
  0x44   :  { %330 = vmatmul.mubr.f32.vlgmr.msra.gmra.mrb[0].mxu0 %v37_v40 }
  0x45   :  { %3509 = vmatpush1.bf16.msra.mxu0 %v3508_v41  ;;  %335 = vmatprep.mubr.f32.mxu0 %v44_v45 }
  0x46   :  { %3511 = vmatprep.subr.bf16.mxu0 %v3510_v42 }
  0x47   :  { %18 = vsyncpa [#allocation10], 0  ;;  %v3516_v56 = vpack.c.bf16 %v135_v52, %v133_v51  ;;  %v49_v57 = vld [vmem:[%s5526_s0 + $0x60] sm:$0xff]  ;;  %v545_v59 = vld [vmem:[%s5529_s3 + $0x8] sm:$0xff]  ;;  %v3518_v60 = vpack.c.bf16 %v140_v55, %v138_v54  ;;  %v3987_v0 = vmov 0.0|0.0   ;;  %vm540_vm0 = vcmask 523264  }
  0x48   :  { %336 = vmatmul.mubr.f32.gmra.mrb[2].mxu0 %v43_v49  ;;  %v544_v58 = vld [vmem:[%s5529_s3] sm:$0xff]  ;;  %v139_v62 = vld [vmem:[%s5527_s1 + $0x270] sm:$0xff]  ;;  %v56_v63 = vld [vmem:[%s5526_s0 + $0x98] sm:$0xff]  ;;  %3634 = vmatprep.subr.bf16.mxu1 %v3987_v0  ;;  %v3988_v21 = vmov 0.0   ;;  %vm3989_vm1 = vmmov 0   ;;  %vm542_vm2 = vcmask 261120  }
  0x49   :  { %3513 = vmatpush1.bf16.msra.mxu0 %v3512_v48  ;;  %341 = vmatprep.mubr.f32.mxu0 %v50_v53  ;;  %v137_v61 = vld [vmem:[%s5527_s1 + $0x260] sm:$0xff]  ;;  %v4324_v1 = vpack.c.bf16 %v545_v59, %v544_v58  ;;  %v142_v2 = vld [vmem:[%s5527_s1 + $0x288] sm:$0xff]  ;;  %v144_v3 = vld [vmem:[%s5527_s1 + $0x298] sm:$0xff]  ;;  %541 = vst.msk [vmem:[#allocation2] sm:$0xff] %vm540_vm0, %v3988_v21  ;;  %vm554_vm3 = vcmask 1043456   ;;  %s3992_s17 = smov 96  }
  0x4a   :  { %3515 = vmatprep.subr.bf16.mxu0 %v3514_v50  ;;  %v3520_v4 = vpack.c.bf16 %v139_v62, %v137_v61  ;;  %v55_v5 = vld [vmem:[%s5526_s0 + $0x90] sm:$0xff]  ;;  %v547_v7 = vld [vmem:[%s5529_s3 + $0x18] sm:$0xff]  ;;  %v3522_v8 = vpack.c.bf16 %v144_v3, %v142_v2  ;;  %v141_v9 = vld [vmem:[%s5527_s1 + $0x280] sm:$0xff]  ;;  %3154 = vmatprep.mubr.msk.f32.mxu1 %vm3989_vm1, %v3988_v21  ;;  %543 = vst.msk [vmem:[#allocation3] sm:$0xff] %vm542_vm2, %v3988_v21  ;;  %vm679_vm4 = vcmask 257024   ;;  %vm685_vm5 = vcmask 523524  }
  0x4b   :  { %3636 = vmatpush3.bf16.msra.mxu1 %v4324_v1  ;;  %v546_v6 = vld [vmem:[%s5529_s3 + $0x10] sm:$0xff]  ;;  %v40_v11 = vld [vmem:[%s5526_s0 + $0x18] sm:$0xff]  ;;  %v146_v13 = vld [vmem:[%s5527_s1 + $0x2a8] sm:$0xff] }
  0x4c   :  { %342 = vmatmul.mubr.f32.gmra.mrb[4].mxu0 %v49_v57  ;;  %v143_v10 = vld [vmem:[%s5527_s1 + $0x290] sm:$0xff]  ;;  %3637 = vmatprep.subr.bf16.mxu1 %v3987_v0  ;;  %v4352_v12 = vpack.c.bf16 %v547_v7, %v546_v6  ;;  %v148_v14 = vld [vmem:[%s5527_s1 + $0x2b8] sm:$0xff]  ;;  %v548_v15 = vld [vmem:[%s5529_s3 + $0x20] sm:$0xff] }
  0x4d   :  { %3517 = vmatpush1.bf16.msra.mxu0 %v3516_v56  ;;  %347 = vmatprep.mubr.f32.mxu0 %v56_v63  ;;  %v549_v16 = vld [vmem:[%s5529_s3 + $0x28] sm:$0xff]  ;;  %v3524_v17 = vpack.c.bf16 %v143_v10, %v141_v9  ;;  %v550_v19 = vld [vmem:[%s5529_s3 + $0x30] sm:$0xff]  ;;  %v551_v20 = vld [vmem:[%s5529_s3 + $0x38] sm:$0xff]  ;;  %v3526_v22 = vpack.c.bf16 %v148_v14, %v146_v13 }
  0x4e   :  { %3519 = vmatprep.subr.bf16.mxu0 %v3518_v60  ;;  %v4367_v18 = vpack.c.bf16 %v549_v16, %v548_v15  ;;  %v145_v23 = vld [vmem:[%s5527_s1 + $0x2a0] sm:$0xff]  ;;  %v147_v24 = vld [vmem:[%s5527_s1 + $0x2b0] sm:$0xff]  ;;  %v150_v25 = vld [vmem:[%s5527_s1 + $0x2c8] sm:$0xff]  ;;  %v4393_v27 = vpack.c.bf16 %v551_v20, %v550_v19 }
  0x4f   :  { %3639 = vmatpush3.bf16.msra.mxu1 %v4352_v12  ;;  %v152_v26 = vld [vmem:[%s5527_s1 + $0x2d8] sm:$0xff]  ;;  %v3528_v28 = vpack.c.bf16 %v147_v24, %v145_v23  ;;  %v149_v30 = vld [vmem:[%s5527_s1 + $0x2c0] sm:$0xff]  ;;  %v151_v31 = vld [vmem:[%s5527_s1 + $0x2d0] sm:$0xff] }
  0x50   :  { %348 = vmatmul.mubr.f32.gmra.mrb[6].mxu0 %v55_v5  ;;  %3640 = vmatprep.subr.bf16.mxu1 %v3987_v0  ;;  %v3530_v29 = vpack.c.bf16 %v152_v26, %v150_v25  ;;  %v154_v32 = vld [vmem:[%s5527_s1 + $0x2e8] sm:$0xff]  ;;  %v156_v33 = vld [vmem:[%s5527_s1 + $0x2f8] sm:$0xff]  ;;  %v4409_v34 = vld [vmem:[#allocation2] sm:$0xff]  ;;  %v3532_v35 = vpack.c.bf16 %v151_v31, %v149_v30 }
  0x51   :  { %3521 = vmatpush1.bf16.msra.mxu0 %v3520_v4  ;;  %418 = vmatprep.mubr.f32.mxu0 %v40_v11  ;;  %v3534_v36 = vpack.c.bf16 %v156_v33, %v154_v32  ;;  %v153_v37 = vld [vmem:[%s5527_s1 + $0x2e0] sm:$0xff]  ;;  %v155_v38 = vld [vmem:[%s5527_s1 + $0x2f0] sm:$0xff]  ;;  %v158_v39 = vld [vmem:[%s5527_s1 + $0x308] sm:$0xff] }
  0x52   :  { %3523 = vmatprep.subr.bf16.mxu0 %v3522_v8  ;;  %v160_v40 = vld [vmem:[%s5527_s1 + $0x318] sm:$0xff]  ;;  %v3536_v41 = vpack.c.bf16 %v155_v38, %v153_v37  ;;  %v157_v43 = vld [vmem:[%s5527_s1 + $0x300] sm:$0xff]  ;;  %v159_v44 = vld [vmem:[%s5527_s1 + $0x310] sm:$0xff] }
  0x53   :  { %3642 = vmatpush3.bf16.msra.mxu1 %v4367_v18  ;;  %v3538_v42 = vpack.c.bf16 %v160_v40, %v158_v39  ;;  %v162_v45 = vld [vmem:[%s5527_s1 + $0x328] sm:$0xff]  ;;  %v164_v46 = vld [vmem:[%s5527_s1 + $0x338] sm:$0xff]  ;;  %v3540_v47 = vpack.c.bf16 %v159_v44, %v157_v43  ;;  %v161_v49 = vld [vmem:[%s5527_s1 + $0x320] sm:$0xff] }
  0x54   :  { %3643 = vmatprep.subr.bf16.mxu1 %v3987_v0  ;;  %v3542_v48 = vpack.c.bf16 %v164_v46, %v162_v45  ;;  %v163_v50 = vld [vmem:[%s5527_s1 + $0x330] sm:$0xff]  ;;  %v166_v51 = vld [vmem:[%s5527_s1 + $0x348] sm:$0xff]  ;;  %v168_v52 = vld [vmem:[%s5527_s1 + $0x358] sm:$0xff] }
  0x55   :  { %3525 = vmatpush1.bf16.msra.mxu0 %v3524_v17  ;;  %v3544_v53 = vpack.c.bf16 %v163_v50, %v161_v49  ;;  %v3546_v54 = vpack.c.bf16 %v168_v52, %v166_v51  ;;  %v165_v55 = vld [vmem:[%s5527_s1 + $0x340] sm:$0xff]  ;;  %v167_v56 = vld [vmem:[%s5527_s1 + $0x350] sm:$0xff]  ;;  %v170_v57 = vld [vmem:[%s5527_s1 + $0x368] sm:$0xff] }
  0x56   :  { %3527 = vmatprep.subr.bf16.mxu0 %v3526_v22  ;;  %v172_v58 = vld [vmem:[%s5527_s1 + $0x378] sm:$0xff]  ;;  %v3548_v59 = vpack.c.bf16 %v167_v56, %v165_v55  ;;  %v169_v61 = vld [vmem:[%s5527_s1 + $0x360] sm:$0xff]  ;;  %v171_v62 = vld [vmem:[%s5527_s1 + $0x370] sm:$0xff] }
  0x57   :  { %3645 = vmatpush3.bf16.msra.mxu1 %v4393_v27  ;;  %v3550_v60 = vpack.c.bf16 %v172_v58, %v170_v57  ;;  %v174_v63 = vld [vmem:[%s5527_s1 + $0x388] sm:$0xff]  ;;  %v176_v2 = vld [vmem:[%s5527_s1 + $0x398] sm:$0xff]  ;;  %v3552_v3 = vpack.c.bf16 %v171_v62, %v169_v61  ;;  %v173_v5 = vld [vmem:[%s5527_s1 + $0x380] sm:$0xff] }
  0x58   :  { %3646 = vmatprep.subr.bf16.mxu1 %v3987_v0  ;;  %v3554_v4 = vpack.c.bf16 %v176_v2, %v174_v63  ;;  %v175_v6 = vld [vmem:[%s5527_s1 + $0x390] sm:$0xff]  ;;  %v178_v7 = vld [vmem:[%s5527_s1 + $0x3a8] sm:$0xff]  ;;  %v180_v8 = vld [vmem:[%s5527_s1 + $0x3b8] sm:$0xff] }
  0x59   :  { %3529 = vmatpush1.bf16.msra.mxu0 %v3528_v28  ;;  %v3556_v9 = vpack.c.bf16 %v175_v6, %v173_v5  ;;  %v3558_v10 = vpack.c.bf16 %v180_v8, %v178_v7  ;;  %v177_v11 = vld [vmem:[%s5527_s1 + $0x3a0] sm:$0xff]  ;;  %v179_v13 = vld [vmem:[%s5527_s1 + $0x3b0] sm:$0xff]  ;;  %v182_v14 = vld [vmem:[%s5527_s1 + $0x3c8] sm:$0xff] }
  0x5a   :  { %3531 = vmatprep.subr.bf16.mxu0 %v3530_v29  ;;  %3155 = vmatmul.mubr.msk.f32.vlgmr.msra.gmra.mrb[0].mxu1 %vm540_vm0, %v4409_v34  ;;  %v184_v15 = vld [vmem:[%s5527_s1 + $0x3d8] sm:$0xff]  ;;  %v3560_v16 = vpack.c.bf16 %v179_v13, %v177_v11  ;;  %v181_v19 = vld [vmem:[%s5527_s1 + $0x3c0] sm:$0xff]  ;;  %v183_v20 = vld [vmem:[%s5527_s1 + $0x3d0] sm:$0xff] }
  0x5b   :  { %3648 = vmatpush3.bf16.msra.mxu1 %v4324_v1  ;;  %3173 = vmatprep.mubr.msk.f32.mxu1 %vm3989_vm1, %v3988_v21  ;;  %v3562_v17 = vpack.c.bf16 %v184_v15, %v182_v14  ;;  %v186_v22 = vld [vmem:[%s5527_s1 + $0x3e8] sm:$0xff]  ;;  %v188_v23 = vld [vmem:[%s5527_s1 + $0x3f8] sm:$0xff]  ;;  %v3564_v24 = vpack.c.bf16 %v183_v20, %v181_v19  ;;  %v185_v26 = vld [vmem:[%s5527_s1 + $0x3e0] sm:$0xff] }
  0x5c   :  { %3649 = vmatprep.subr.bf16.mxu1 %v3987_v0  ;;  %v3566_v25 = vpack.c.bf16 %v188_v23, %v186_v22  ;;  %v187_v28 = vld [vmem:[%s5527_s1 + $0x3f0] sm:$0xff]  ;;  %v190_v29 = vld [vmem:[%s5527_s1 + $0x408] sm:$0xff]  ;;  %v192_v30 = vld [vmem:[%s5527_s1 + $0x418] sm:$0xff] }
  0x5d   :  { %3533 = vmatpush1.bf16.msra.mxu0 %v3532_v35  ;;  %v3568_v31 = vpack.c.bf16 %v187_v28, %v185_v26  ;;  %v3570_v32 = vpack.c.bf16 %v192_v30, %v190_v29  ;;  %v189_v33 = vld [vmem:[%s5527_s1 + $0x400] sm:$0xff]  ;;  %v191_v35 = vld [vmem:[%s5527_s1 + $0x410] sm:$0xff]  ;;  %v196_v37 = vld [vmem:[%s5527_s1 + $0x438] sm:$0xff] }
  0x5e   :  { %3535 = vmatprep.subr.bf16.mxu0 %v3534_v36  ;;  %v194_v36 = vld [vmem:[%s5527_s1 + $0x428] sm:$0xff]  ;;  %v39_v38 = vld [vmem:[%s5526_s0 + $0x10] sm:$0xff]  ;;  %v3572_v39 = vpack.c.bf16 %v191_v35, %v189_v33  ;;  %v200_v45 = vld [vmem:[%s5527_s1 + $0x458] sm:$0xff] }
  0x5f   :  { %3651 = vmatpush3.bf16.msra.mxu1 %v4352_v12  ;;  %v3574_v40 = vpack.c.bf16 %v196_v37, %v194_v36  ;;  %v46_v43 = vld [vmem:[%s5526_s0 + $0x48] sm:$0xff]  ;;  %v197_v49 = vld [vmem:[%s5527_s1 + $0x440] sm:$0xff]  ;;  %v199_v50 = vld [vmem:[%s5527_s1 + $0x450] sm:$0xff] }
  0x60   :  { %3652 = vmatprep.subr.bf16.mxu1 %v3987_v0  ;;  %v198_v44 = vld [vmem:[%s5527_s1 + $0x448] sm:$0xff]  ;;  %v52_v51 = vld [vmem:[%s5526_s0 + $0x78] sm:$0xff]  ;;  %v51_v55 = vld [vmem:[%s5526_s0 + $0x70] sm:$0xff] }
  0x61   :  { %3537 = vmatpush1.bf16.msra.mxu0 %v3536_v41  ;;  %v193_v41 = vld [vmem:[%s5527_s1 + $0x420] sm:$0xff]  ;;  %v202_v52 = vld [vmem:[%s5527_s1 + $0x468] sm:$0xff]  ;;  %v203_v58 = vld [vmem:[%s5527_s1 + $0x470] sm:$0xff] }
  0x62   :  { %3539 = vmatprep.subr.bf16.mxu0 %v3538_v42  ;;  %v195_v42 = vld [vmem:[%s5527_s1 + $0x430] sm:$0xff]  ;;  %v201_v57 = vld [vmem:[%s5527_s1 + $0x460] sm:$0xff]  ;;  %v208_v61 = vld [vmem:[%s5527_s1 + $0x498] sm:$0xff] }
  0x63   :  { %3654 = vmatpush3.bf16.msra.mxu1 %v4367_v18  ;;  %v3576_v46 = vpack.c.bf16 %v195_v42, %v193_v41  ;;  %v3584_v62 = vpack.c.bf16 %v203_v58, %v201_v57  ;;  %v57_v63 = vld [vmem:[%s5526_s0 + $0xa0] sm:$0xff]  ;;  %v42_v5 = vld [vmem:[%s5526_s0 + $0x28] sm:$0xff]  ;;  %v212_v7 = vld [vmem:[%s5527_s1 + $0x4b8] sm:$0xff] }
  0x64   :  { %3655 = vmatprep.subr.bf16.mxu1 %v3987_v0  ;;  %v210_v6 = vld [vmem:[%s5527_s1 + $0x4a8] sm:$0xff]  ;;  %v211_v11 = vld [vmem:[%s5527_s1 + $0x4b0] sm:$0xff]  ;;  %v216_v14 = vld [vmem:[%s5527_s1 + $0x4d8] sm:$0xff] }
  0x65   :  { %3541 = vmatpush1.bf16.msra.mxu0 %v3540_v47  ;;  %v45_v47 = vld [vmem:[%s5526_s0 + $0x40] sm:$0xff]  ;;  %v214_v13 = vld [vmem:[%s5527_s1 + $0x4c8] sm:$0xff]  ;;  %v215_v19 = vld [vmem:[%s5527_s1 + $0x4d0] sm:$0xff] }
  0x66   :  { %3543 = vmatprep.subr.bf16.mxu0 %v3542_v48  ;;  %v3578_v48 = vpack.c.bf16 %v200_v45, %v198_v44  ;;  %v218_v20 = vld [vmem:[%s5527_s1 + $0x4e8] sm:$0xff]  ;;  %v220_v22 = vld [vmem:[%s5527_s1 + $0x4f8] sm:$0xff]  ;;  %v219_v26 = vld [vmem:[%s5527_s1 + $0x4f0] sm:$0xff] }
  0x67   :  { %3657 = vmatpush3.bf16.msra.mxu1 %v4393_v27  ;;  %v222_v28 = vld [vmem:[%s5527_s1 + $0x508] sm:$0xff]  ;;  %v224_v29 = vld [vmem:[%s5527_s1 + $0x518] sm:$0xff]  ;;  %v223_v33 = vld [vmem:[%s5527_s1 + $0x510] sm:$0xff] }
  0x68   :  { %3658 = vmatprep.subr.bf16.mxu1 %v3987_v0  ;;  %v226_v35 = vld [vmem:[%s5527_s1 + $0x528] sm:$0xff]  ;;  %v228_v36 = vld [vmem:[%s5527_s1 + $0x538] sm:$0xff]  ;;  %v229_v45 = vld [vmem:[%s5527_s1 + $0x540] sm:$0xff] }
  0x69   :  { %3545 = vmatpush1.bf16.msra.mxu0 %v3544_v53  ;;  %v204_v53 = vld [vmem:[%s5527_s1 + $0x478] sm:$0xff]  ;;  %v230_v41 = vld [vmem:[%s5527_s1 + $0x548] sm:$0xff]  ;;  %v237_v57 = vld [vmem:[%s5527_s1 + $0x580] sm:$0xff] }
  0x6a   :  { %3547 = vmatprep.subr.bf16.mxu0 %v3546_v54  ;;  %v3580_v54 = vpack.c.bf16 %v199_v50, %v197_v49  ;;  %v3582_v56 = vpack.c.bf16 %v204_v53, %v202_v52  ;;  %v232_v42 = vld [vmem:[%s5527_s1 + $0x558] sm:$0xff]  ;;  %v235_v52 = vld [vmem:[%s5527_s1 + $0x570] sm:$0xff]  ;;  %v238_v53 = vld [vmem:[%s5527_s1 + $0x588] sm:$0xff] }
  0x6b   :  { %v3610_v44 = vpack.c.bf16 %v232_v42, %v230_v41  ;;  %v239_v58 = vld [vmem:[%s5527_s1 + $0x590] sm:$0xff] }
  0x6d   :  { %3549 = vmatpush1.bf16.msra.mxu0 %v3548_v59  ;;  %v58_v59 = vld [vmem:[%s5526_s0 + $0xa8] sm:$0xff] }
  0x6e   :  { %3551 = vmatprep.subr.bf16.mxu0 %v3550_v60  ;;  %v206_v60 = vld [vmem:[%s5527_s1 + $0x488] sm:$0xff] }
  0x6f   :  { %v3586_v2 = vpack.c.bf16 %v208_v61, %v206_v60  ;;  %v244_v60 = vld [vmem:[%s5527_s1 + $0x5b8] sm:$0xff]  ;;  %v3620_v61 = vpack.c.bf16 %v239_v58, %v237_v57  ;;  %v557_v58 = vld [vmem:[#allocation3] sm:$0xff] }
  0x71   :  { %3553 = vmatpush1.bf16.msra.mxu0 %v3552_v3  ;;  %v205_v3 = vld [vmem:[%s5527_s1 + $0x480] sm:$0xff] }
  0x72   :  { %3555 = vmatprep.subr.bf16.mxu0 %v3554_v4  ;;  %v207_v4 = vld [vmem:[%s5527_s1 + $0x490] sm:$0xff] }
  0x73   :  { %v3588_v8 = vpack.c.bf16 %v207_v4, %v205_v3  ;;  %v246_v3 = vld [vmem:[%s5527_s1 + $0x5c8] sm:$0xff]  ;;  %v248_v4 = vld [vmem:[%s5527_s1 + $0x5d8] sm:$0xff] }
  0x75   :  { %3557 = vmatpush1.bf16.msra.mxu0 %v3556_v9  ;;  %v3590_v9 = vpack.c.bf16 %v212_v7, %v210_v6  ;;  %v3626_v6 = vpack.c.bf16 %v248_v4, %v246_v3  ;;  %v245_v7 = vld [vmem:[%s5527_s1 + $0x5c0] sm:$0xff] }
  0x76   :  { %3559 = vmatprep.subr.bf16.mxu0 %v3558_v10  ;;  %v209_v10 = vld [vmem:[%s5527_s1 + $0x4a0] sm:$0xff] }
  0x77   :  { %v3592_v15 = vpack.c.bf16 %v211_v11, %v209_v10  ;;  %v252_v10 = vld [vmem:[%s5527_s1 + $0x5f8] sm:$0xff] }
  0x79   :  { %3561 = vmatpush1.bf16.msra.mxu0 %v3560_v16  ;;  %v3594_v16 = vpack.c.bf16 %v216_v14, %v214_v13  ;;  %v249_v14 = vld [vmem:[%s5527_s1 + $0x5e0] sm:$0xff] }
  0x7a   :  { %3563 = vmatprep.subr.bf16.mxu0 %v3562_v17  ;;  %v213_v17 = vld [vmem:[%s5527_s1 + $0x4c0] sm:$0xff] }
  0x7b   :  { %v3596_v23 = vpack.c.bf16 %v215_v19, %v213_v17  ;;  %v41_v17 = vld [vmem:[%s5526_s0 + $0x20] sm:$0xff]  ;;  %v48_v19 = vld [vmem:[%s5526_s0 + $0x58] sm:$0xff] }
  0x7d   :  { %3565 = vmatpush1.bf16.msra.mxu0 %v3564_v24  ;;  %v3598_v24 = vpack.c.bf16 %v220_v22, %v218_v20  ;;  %v47_v20 = vld [vmem:[%s5526_s0 + $0x50] sm:$0xff]  ;;  %v54_v22 = vld [vmem:[%s5526_s0 + $0x88] sm:$0xff] }
  0x7e   :  { %3567 = vmatprep.subr.bf16.mxu0 %v3566_v25  ;;  %v217_v25 = vld [vmem:[%s5527_s1 + $0x4e0] sm:$0xff] }
  0x7f   :  { %v3600_v30 = vpack.c.bf16 %v219_v26, %v217_v25  ;;  %v59_v25 = vld [vmem:[%s5526_s0 + $0xb0] sm:$0xff] }
  0x81   :  { %3569 = vmatpush1.bf16.msra.mxu0 %v3568_v31  ;;  %v3602_v31 = vpack.c.bf16 %v224_v29, %v222_v28  ;;  %v255_v29 = vlaneseq }
  0x82   :  { %3571 = vmatprep.subr.bf16.mxu0 %v3570_v32  ;;  %v221_v32 = vld [vmem:[%s5527_s1 + $0x500] sm:$0xff] }
  0x83   :  { %v3604_v37 = vpack.c.bf16 %v223_v33, %v221_v32  ;;  %v253_v32 = vld [vmem:[%s5528_s2] sm:$0x3]  ;;  %s3991_s2 = smov 32  }
  0x84   :  { %419 = vmatmul.mubr.f32.vlgmr.msra.gmra.mrb[0].mxu0 %v39_v38  ;;  %v3606_v38 = vpack.c.bf16 %v228_v36, %v226_v35 }
  0x85   :  { %3573 = vmatpush1.bf16.msra.mxu0 %v3572_v39  ;;  %424 = vmatprep.mubr.f32.mxu0 %v46_v43  ;;  %v225_v39 = vld [vmem:[%s5527_s1 + $0x520] sm:$0xff] }
  0x86   :  { %3575 = vmatprep.subr.bf16.mxu0 %v3574_v40  ;;  %v227_v40 = vld [vmem:[%s5527_s1 + $0x530] sm:$0xff] }
  0x87   :  { %v3608_v43 = vpack.c.bf16 %v227_v40, %v225_v39 }
  0x88   :  { %425 = vmatmul.mubr.f32.gmra.mrb[2].mxu0 %v45_v47  ;;  %v234_v47 = vld [vmem:[%s5527_s1 + $0x568] sm:$0xff] }
  0x89   :  { %3577 = vmatpush1.bf16.msra.mxu0 %v3576_v46  ;;  %430 = vmatprep.mubr.f32.mxu0 %v52_v51  ;;  %v231_v46 = vld [vmem:[%s5527_s1 + $0x550] sm:$0xff]  ;;  %v233_v51 = vld [vmem:[%s5527_s1 + $0x560] sm:$0xff] }
  0x8a   :  { %3579 = vmatprep.subr.bf16.mxu0 %v3578_v48  ;;  %v236_v48 = vld [vmem:[%s5527_s1 + $0x578] sm:$0xff]  ;;  %v3612_v49 = vpack.c.bf16 %v231_v46, %v229_v45 }
  0x8b   :  { %v3614_v50 = vpack.c.bf16 %v236_v48, %v234_v47 }
  0x8c   :  { %431 = vmatmul.mubr.f32.gmra.mrb[4].mxu0 %v51_v55  ;;  %v3616_v55 = vpack.c.bf16 %v235_v52, %v233_v51 }
  0x8d   :  { %3581 = vmatpush1.bf16.msra.mxu0 %v3580_v54  ;;  %436 = vmatprep.mubr.f32.mxu0 %v58_v59  ;;  %v240_v54 = vld [vmem:[%s5527_s1 + $0x598] sm:$0xff]  ;;  %v242_v59 = vld [vmem:[%s5527_s1 + $0x5a8] sm:$0xff] }
  0x8e   :  { %3583 = vmatprep.subr.bf16.mxu0 %v3582_v56  ;;  %v3618_v56 = vpack.c.bf16 %v240_v54, %v238_v53 }
  0x90   :  { %437 = vmatmul.mubr.f32.gmra.mrb[6].mxu0 %v57_v63  ;;  %v241_v63 = vld [vmem:[%s5527_s1 + $0x5a0] sm:$0xff] }
  0x91   :  { %3585 = vmatpush1.bf16.msra.mxu0 %v3584_v62  ;;  %507 = vmatprep.mubr.f32.mxu0 %v42_v5  ;;  %v3622_v62 = vpack.c.bf16 %v244_v60, %v242_v59 }
  0x92   :  { %3587 = vmatprep.subr.bf16.mxu0 %v3586_v2  ;;  %v243_v2 = vld [vmem:[%s5527_s1 + $0x5b0] sm:$0xff] }
  0x93   :  { %v3624_v5 = vpack.c.bf16 %v243_v2, %v241_v63 }
  0x95   :  { %3589 = vmatpush1.bf16.msra.mxu0 %v3588_v8  ;;  %v247_v8 = vld [vmem:[%s5527_s1 + $0x5d0] sm:$0xff] }
  0x96   :  { %3591 = vmatprep.subr.bf16.mxu0 %v3590_v9  ;;  %v250_v9 = vld [vmem:[%s5527_s1 + $0x5e8] sm:$0xff]  ;;  %v3628_v11 = vpack.c.bf16 %v247_v8, %v245_v7 }
  0x97   :  { %v3630_v13 = vpack.c.bf16 %v252_v10, %v250_v9  ;;  %v656_v9 = vld [vmem:[%s5533_s7] sm:$0xff] }
  0x99   :  { %3593 = vmatpush1.bf16.msra.mxu0 %v3592_v15  ;;  %v251_v15 = vld [vmem:[%s5527_s1 + $0x5f0] sm:$0xff] }
  0x9a   :  { %3595 = vmatprep.subr.bf16.mxu0 %v3594_v16  ;;  %v3632_v16 = vpack.c.bf16 %v251_v15, %v249_v14 }
  0x9d   :  { %3597 = vmatpush1.bf16.msra.mxu0 %v3596_v23  ;;  %v53_v23 = vld [vmem:[%s5526_s0 + $0x80] sm:$0xff] }
  0x9e   :  { %3599 = vmatprep.subr.bf16.mxu0 %v3598_v24  ;;  %v60_v24 = vld [vmem:[%s5526_s0 + $0xb8] sm:$0xff]  ;;  %s3990_s0 = smov 64  }
  0xa1   :  { %3601 = vmatpush1.bf16.msra.mxu0 %v3600_v30  ;;  %v4768_v30 = vshrl.u32 %v255_v29, 7 }
  0xa2   :  { %3603 = vmatprep.subr.bf16.mxu0 %v3602_v31 }
  0xa3   :  { %v257_v31 = vsub.s32 0, %v4768_v30  ;;  %v261_v33 = vsub.s32 1, %v4768_v30 }
  0xa5   :  { %3605 = vmatpush1.bf16.msra.mxu0 %v3604_v37  ;;  %v258_v35 = vrot.slane %v253_v32, %v257_v31  ;;  %v262_v36 = vrot.slane %v253_v32, %v261_v33 }
  0xa6   :  { %3607 = vmatprep.subr.bf16.mxu0 %v3606_v38 }
  0xa9   :  { %3609 = vmatpush1.bf16.msra.mxu0 %v3608_v43 }
  0xaa   :  { %3611 = vmatprep.subr.bf16.mxu0 %v3610_v44 }
  0xad   :  { %3613 = vmatpush1.bf16.msra.mxu0 %v3612_v49 }
  0xae   :  { %3615 = vmatprep.subr.bf16.mxu0 %v3614_v50 }
  0xb1   :  { %3617 = vmatpush1.bf16.msra.mxu0 %v3616_v55 }
  0xb2   :  { %3619 = vmatprep.subr.bf16.mxu0 %v3618_v56 }
  0xb5   :  { %3621 = vmatpush1.bf16.msra.mxu0 %v3620_v61 }
  0xb6   :  { %3623 = vmatprep.subr.bf16.mxu0 %v3622_v62 }
  0xb9   :  { %3625 = vmatpush1.bf16.msra.mxu0 %v3624_v5 }
  0xba   :  { %3627 = vmatprep.subr.bf16.mxu0 %v3626_v6 }
  0xbd   :  { %3629 = vmatpush1.bf16.msra.mxu0 %v3628_v11 }
  0xbe   :  { %3631 = vmatprep.subr.bf16.mxu0 %v3630_v13  ;;  %v657_v13 = vld [vmem:[%s5534_s8] sm:$0xff] }
  0xc1   :  { %3633 = vmatpush1.bf16.msra.mxu0 %v3632_v16 }
  0xc2   :  { %3782 = vmatprep.subr.bf16.mxu0 %v3987_v0 }
  0xc4   :  { %508 = vmatmul.mubr.f32.vlgmr.msra.gmra.mrb[0].mxu0 %v41_v17 }
  0xc5   :  { %513 = vmatprep.mubr.f32.mxu0 %v48_v19 }
  0xc8   :  { %514 = vmatmul.mubr.f32.gmra.mrb[2].mxu0 %v47_v20 }
  0xc9   :  { %519 = vmatprep.mubr.f32.mxu0 %v54_v22 }
  0xcc   :  { %520 = vmatmul.mubr.f32.gmra.mrb[4].mxu0 %v53_v23 }
  0xcd   :  { %525 = vmatprep.mubr.f32.mxu0 %v60_v24 }
  0xd0   :  { %526 = vmatmul.mubr.f32.gmra.mrb[6].mxu0 %v59_v25 }
  0xd1   :  { %3363 = vmatprep.mubr.msk.f32.mxu0 %vm3989_vm1, %v3988_v21 }
 0x12d   :  { %v627_v26 = vpop.f32.mrb[0].mxu1 }
 0x12e   :  { %v3156_v28 = vpop.f32.mrb[1].mxu1 }
 0x197   :  { %v509_v37 = vpop.f32.mrb[0].mxu0 }
 0x198   :  { %v3842_v38 = vadd.f32 %v509_v37, %v258_v35  ;;  %v511_v39 = vpop.f32.mrb[1].mxu0 }
 0x199   :  { %v3843_v40 = vadd.f32 %v511_v39, %v262_v36 }
 0x19a   :  { %532 = vst [vmem:[#allocation5] sm:$0xff] %v3842_v38 }
 0x19b   :  { %533 = vst [vmem:[#allocation5 + $0x8] sm:$0xff] %v3843_v40  ;;  %v515_v41 = vpop.f32.mrb[2].mxu0 }
 0x19c   :  { %v3844_v42 = vadd.f32 %v515_v41, %v258_v35  ;;  %v517_v43 = vpop.f32.mrb[3].mxu0 }
 0x19d   :  { %v3845_v44 = vadd.f32 %v517_v43, %v262_v36 }
 0x19e   :  { %534 = vst [vmem:[#allocation5 + $0x10] sm:$0xff] %v3844_v42 }
 0x19f   :  { %535 = vst [vmem:[#allocation5 + $0x18] sm:$0xff] %v3845_v44  ;;  %v521_v45 = vpop.f32.mrb[4].mxu0 }
 0x1a0   :  { %v3846_v46 = vadd.f32 %v521_v45, %v258_v35  ;;  %v523_v47 = vpop.f32.mrb[5].mxu0 }
 0x1a1   :  { %v3847_v48 = vadd.f32 %v523_v47, %v262_v36  ;;  %v552_v53 = vld [vmem:[#allocation5] sm:$0xf] }
 0x1a2   :  { %536 = vst [vmem:[#allocation5 + $0x20] sm:$0xff] %v3846_v46 }
 0x1a3   :  { %537 = vst [vmem:[#allocation5 + $0x28] sm:$0xff] %v3847_v48  ;;  %v527_v49 = vpop.f32.mrb[6].mxu0 }
 0x1a4   :  { %v3848_v50 = vadd.f32 %v527_v49, %v258_v35  ;;  %v529_v51 = vpop.f32.mrb[7].mxu0 }
 0x1a5   :  { %v3849_v52 = vadd.f32 %v529_v51, %v262_v36  ;;  %v2948_v51 = vld [vmem:[%s5533_s7 + $0x8] sm:$0xff] }
 0x1a6   :  { %538 = vst [vmem:[#allocation5 + $0x30] sm:$0xff] %v3848_v50 }
 0x1a7   :  { %539 = vst [vmem:[#allocation5 + $0x38] sm:$0xff] %v3849_v52 }
 0x1ae   :  { %v553_v54 = vld [vmem:[#allocation5 + $0x38] sm:$0xf0] }
 0x1af   :  { %v555_v55 = vsel %vm554_vm3, %v552_v53, %v553_v54  ;;  %v2949_v54 = vld [vmem:[%s5534_s8 + $0x8] sm:$0xff] }
 0x1b0   :  { %v631_v56 = vadd.f32 %v627_v26, %v555_v55  ;;  %v687_v26 = vld [vmem:[#allocation5] sm:$0xf0] }
 0x1b1   :  { %v690_v29 = vrot.slane %v687_v26, 4 }
 0x1b2   :  { %3875 = vtanh.f32 %v631_v56 }
 0x1bc   :  { %v3876_v57 = vpop.eup %3875 }
 0x1bd   :  { %641 = vrot.lane.b32.xlu0 %v3876_v57, %s3990_s0  ;;  %v633_v59 = vmul.f32 0.5, %v3876_v57 }
 0x1bf   :  { %v634_v60 = vadd.f32 0.5, %v633_v59 }
 0x1c1   :  { %636 = vrot.lane.b32.xlu0 %v557_v58, %s3991_s2 }
 0x22f   :  { %v642_v61 = vpop.permute.xlu0 %641 }
 0x230   :  { %v644_v62 = vmul.f32 %v642_v61, %v634_v60 }
 0x232   :  { %646 = vrot.lane.b32.xlu1 %v644_v62, %s3991_s2 }
 0x233   :  { %v637_v63 = vpop.permute.xlu0 %636 }
 0x234   :  { %v639_v2 = vmul.f32 %v637_v63, %v634_v60 }
 0x2a4   :  { %v647_v3 = vpop.permute.xlu1 %646 }
 0x2a5   :  { %v649_v4 = vadd.f32 %v647_v3, %v639_v2  ;;  %v828_v3 = vld [vmem:[#allocation5 + $0x28] sm:$0xf0] }
 0x2a7   :  { %3877 = vtanh.f32 %v649_v4  ;;  %v658_v8 = vsub.f32 %v649_v4, %v637_v63  ;;  %v827_v4 = vld [vmem:[#allocation5 + $0x10] sm:$0xf] }
 0x2b1   :  { %v3878_v5 = vpop.eup %3877 }
 0x2b2   :  { %652 = vrot.lane.b32.xlu1 %v3878_v5, %s3990_s0  ;;  %v829_v5 = vsel %vm554_vm3, %v827_v4, %v828_v3  ;;  %v2954_v4 = vld [vmem:[%s5533_s7 + $0x18] sm:$0xff] }
 0x324   :  { %v653_v6 = vpop.permute.xlu1 %652 }
 0x325   :  { %v655_v7 = vmul.f32 %v653_v6, %v634_v60 }
 0x327   :  { %670 = vrot.lane.b32.xlu1 %v655_v7, %s3990_s0  ;;  %667 = vrot.lane.b32.xlu0 %v655_v7, %s3991_s2 }
 0x32b   :  { %660 = vrot.lane.b32.xlu0 %v658_v8, %s3992_s17 }
 0x399   :  { %v671_v10 = vpop.permute.xlu1 %670  ;;  %v668_v11 = vpop.permute.xlu0 %667 }
 0x39a   :  { %v673_v14 = vsel %vm542_vm2, %v668_v11, %v671_v10  ;;  %v4794_v15 = vmul.f32 %v668_v11, %v656_v9 }
 0x39b   :  { %v674_v16 = vsub.f32 %v673_v14, %v4409_v34 }
 0x39c   :  { %680 = vst.msk [vmem:[#allocation4] sm:$0xf] %vm679_vm4, %v4794_v15 }
 0x39d   :  { %v675_v17 = vmul.f32 %v674_v16, %v657_v13  ;;  %v661_v19 = vpop.permute.xlu0 %660 }
 0x39e   :  { %v663_v20 = vmul.f32 %v661_v19, %v656_v9 }
 0x39f   :  { %v676_v22 = vadd.f32 %v675_v17, %v4409_v34  ;;  %v688_v34 = vld [vmem:[#allocation5 + $0x38] sm:$0xf] }
 0x3a0   :  { %v664_v23 = vadd.f32 %v663_v20, %v557_v58  ;;  %v693_v28 = vrot.slane %v688_v34, 4  ;;  %v2951_v34 = vld [vmem:[%s5533_s7 + $0x10] sm:$0xff] }
 0x3a1   :  { %677 = vst.msk [vmem:[#allocation2] sm:$0xff] %vm540_vm0, %v676_v22 }
 0x3a2   :  { %665 = vst.msk [vmem:[#allocation3] sm:$0xff] %vm542_vm2, %v664_v23  ;;  %v695_v32 = vsel %vm554_vm3, %v690_v29, %v693_v28  ;;  %v2952_v29 = vld [vmem:[%s5534_s8 + $0x10] sm:$0xff] }
 0x3a8   :  { %v696_v24 = vld [vmem:[#allocation2] sm:$0xff] }
 0x3a9   :  { %3174 = vmatmul.mubr.msk.f32.vlgmr.msra.gmra.mrb[2].mxu1 %vm540_vm0, %v696_v24  ;;  %v697_v25 = vld [vmem:[#allocation3] sm:$0xff] }
 0x3aa   :  { %776 = vrot.lane.b32.xlu0 %v697_v25, %s3991_s2  ;;  %3660 = vmatpush3.bf16.msra.mxu1 %v4324_v1 }
 0x3ab   :  { %3661 = vmatprep.subr.bf16.mxu1 %v3987_v0  ;;  %3192 = vmatprep.mubr.msk.f32.mxu1 %vm3989_vm1, %v3988_v21 }
 0x3ae   :  { %3663 = vmatpush3.bf16.msra.mxu1 %v4352_v12 }
 0x3af   :  { %3664 = vmatprep.subr.bf16.mxu1 %v3987_v0 }
 0x3b2   :  { %3666 = vmatpush3.bf16.msra.mxu1 %v4367_v18 }
 0x3b3   :  { %3667 = vmatprep.subr.bf16.mxu1 %v3987_v0 }
 0x3b6   :  { %3669 = vmatpush3.bf16.msra.mxu1 %v4393_v27 }
 0x3b7   :  { %3670 = vmatprep.subr.bf16.mxu1 %v3987_v0 }
 0x41c   :  { %v777_v43 = vpop.permute.xlu0 %776 }
 0x47c   :  { %v767_v35 = vpop.f32.mrb[2].mxu1 }
 0x47d   :  { %v771_v36 = vadd.f32 %v767_v35, %v695_v32  ;;  %v3175_v37 = vpop.f32.mrb[3].mxu1 }
 0x47f   :  { %3879 = vtanh.f32 %v771_v36 }
 0x489   :  { %v3880_v38 = vpop.eup %3879 }
 0x48a   :  { %781 = vrot.lane.b32.xlu1 %v3880_v38, %s3990_s0  ;;  %v773_v39 = vmul.f32 0.5, %v3880_v38 }
 0x48c   :  { %v774_v40 = vadd.f32 0.5, %v773_v39 }
 0x48e   :  { %v779_v44 = vmul.f32 %v777_v43, %v774_v40 }
 0x4fc   :  { %v782_v41 = vpop.permute.xlu1 %781 }
 0x4fd   :  { %v784_v42 = vmul.f32 %v782_v41, %v774_v40 }
 0x4ff   :  { %786 = vrot.lane.b32.xlu1 %v784_v42, %s3991_s2 }
 0x571   :  { %v787_v45 = vpop.permute.xlu1 %786 }
 0x572   :  { %v789_v46 = vadd.f32 %v787_v45, %v779_v44  ;;  %v962_v44 = vld [vmem:[#allocation5 + $0x28] sm:$0xf]  ;;  %v961_v45 = vld [vmem:[#allocation5 + $0x10] sm:$0xf0] }
 0x574   :  { %3881 = vtanh.f32 %v789_v46  ;;  %v800_v50 = vsub.f32 %v789_v46, %v777_v43  ;;  %v967_v46 = vrot.slane %v962_v44, 4 }
 0x57e   :  { %v3882_v47 = vpop.eup %3881 }
 0x57f   :  { %792 = vrot.lane.b32.xlu0 %v3882_v47, %s3990_s0  ;;  %v964_v47 = vrot.slane %v961_v45, 4 }
 0x5f1   :  { %v793_v48 = vpop.permute.xlu0 %792 }
 0x5f2   :  { %v795_v49 = vmul.f32 %v793_v48, %v774_v40  ;;  %v969_v48 = vsel %vm554_vm3, %v964_v47, %v967_v46  ;;  %v2957_v46 = vld [vmem:[%s5533_s7 + $0x20] sm:$0xff] }
 0x5f4   :  { %812 = vrot.lane.b32.xlu0 %v795_v49, %s3990_s0  ;;  %809 = vrot.lane.b32.xlu1 %v795_v49, %s3991_s2 }
 0x5f8   :  { %802 = vrot.lane.b32.xlu1 %v800_v50, %s3992_s17 }
 0x666   :  { %v813_v52 = vpop.permute.xlu0 %812  ;;  %v810_v53 = vpop.permute.xlu1 %809 }
 0x667   :  { %v815_v55 = vsel %vm542_vm2, %v810_v53, %v813_v52  ;;  %v4828_v56 = vmul.f32 %v2948_v51, %v810_v53 }
 0x668   :  { %v816_v57 = vsub.f32 %v815_v55, %v696_v24 }
 0x669   :  { %821 = vst.msk [vmem:[#allocation4 + $0x4] sm:$0xf] %vm679_vm4, %v4828_v56 }
 0x66a   :  { %v817_v58 = vmul.f32 %v2949_v54, %v816_v57  ;;  %v803_v59 = vpop.permute.xlu1 %802 }
 0x66b   :  { %v805_v60 = vmul.f32 %v2948_v51, %v803_v59 }
 0x66c   :  { %v818_v61 = vadd.f32 %v817_v58, %v696_v24 }
 0x66d   :  { %v806_v62 = vadd.f32 %v805_v60, %v697_v25 }
 0x66e   :  { %819 = vst.msk [vmem:[#allocation2] sm:$0xff] %vm540_vm0, %v818_v61 }
 0x66f   :  { %807 = vst.msk [vmem:[#allocation3] sm:$0xff] %vm542_vm2, %v806_v62 }
 0x675   :  { %v830_v63 = vld [vmem:[#allocation2] sm:$0xff] }
 0x676   :  { %3193 = vmatmul.mubr.msk.f32.vlgmr.msra.gmra.mrb[4].mxu1 %vm540_vm0, %v830_v63  ;;  %v831_v2 = vld [vmem:[#allocation3] sm:$0xff] }
 0x677   :  { %910 = vrot.lane.b32.xlu1 %v831_v2, %s3991_s2  ;;  %3672 = vmatpush3.bf16.msra.mxu1 %v4324_v1 }
 0x678   :  { %3673 = vmatprep.subr.bf16.mxu1 %v3987_v0  ;;  %3211 = vmatprep.mubr.msk.f32.mxu1 %vm3989_vm1, %v3988_v21 }
 0x67b   :  { %3675 = vmatpush3.bf16.msra.mxu1 %v4352_v12 }
 0x67c   :  { %3676 = vmatprep.subr.bf16.mxu1 %v3987_v0 }
 0x67f   :  { %3678 = vmatpush3.bf16.msra.mxu1 %v4367_v18 }
 0x680   :  { %3679 = vmatprep.subr.bf16.mxu1 %v3987_v0 }
 0x683   :  { %3681 = vmatpush3.bf16.msra.mxu1 %v4393_v27 }
 0x684   :  { %3682 = vmatprep.subr.bf16.mxu1 %v3987_v0 }
 0x6e9   :  { %v911_v16 = vpop.permute.xlu1 %910 }
 0x749   :  { %v901_v6 = vpop.f32.mrb[4].mxu1 }
 0x74a   :  { %v905_v7 = vadd.f32 %v901_v6, %v829_v5  ;;  %v3194_v8 = vpop.f32.mrb[5].mxu1 }
 0x74c   :  { %3883 = vtanh.f32 %v905_v7  ;;  %v2955_v7 = vld [vmem:[%s5534_s8 + $0x18] sm:$0xff] }
 0x756   :  { %v3884_v9 = vpop.eup %3883 }
 0x757   :  { %915 = vrot.lane.b32.xlu0 %v3884_v9, %s3990_s0  ;;  %v907_v10 = vmul.f32 0.5, %v3884_v9 }
 0x759   :  { %v908_v11 = vadd.f32 0.5, %v907_v10 }
 0x75b   :  { %v913_v17 = vmul.f32 %v911_v16, %v908_v11 }
 0x7c9   :  { %v916_v13 = vpop.permute.xlu0 %915 }
 0x7ca   :  { %v918_v14 = vmul.f32 %v916_v13, %v908_v11 }
 0x7cc   :  { %920 = vrot.lane.b32.xlu0 %v918_v14, %s3991_s2 }
 0x83e   :  { %v921_v19 = vpop.permute.xlu0 %920 }
 0x83f   :  { %v923_v20 = vadd.f32 %v921_v19, %v913_v17 }
 0x841   :  { %3885 = vtanh.f32 %v923_v20  ;;  %v934_v25 = vsub.f32 %v923_v20, %v911_v16 }
 0x84b   :  { %v3886_v22 = vpop.eup %3885 }
 0x84c   :  { %926 = vrot.lane.b32.xlu1 %v3886_v22, %s3990_s0  ;;  %v1101_v22 = vld [vmem:[#allocation5 + $0x20] sm:$0xf] }
 0x8be   :  { %v927_v23 = vpop.permute.xlu1 %926 }
 0x8bf   :  { %v929_v24 = vmul.f32 %v927_v23, %v908_v11  ;;  %v1102_v23 = vld [vmem:[#allocation5 + $0x18] sm:$0xf0] }
 0x8c1   :  { %946 = vrot.lane.b32.xlu1 %v929_v24, %s3990_s0  ;;  %943 = vrot.lane.b32.xlu0 %v929_v24, %s3991_s2  ;;  %v1103_v24 = vsel %vm554_vm3, %v1101_v22, %v1102_v23 }
 0x8c5   :  { %936 = vrot.lane.b32.xlu0 %v934_v25, %s3992_s17 }
 0x933   :  { %v947_v26 = vpop.permute.xlu1 %946  ;;  %v944_v28 = vpop.permute.xlu0 %943 }
 0x934   :  { %v949_v32 = vsel %vm542_vm2, %v944_v28, %v947_v26  ;;  %v4860_v35 = vmul.f32 %v2951_v34, %v944_v28 }
 0x935   :  { %v950_v36 = vsub.f32 %v949_v32, %v830_v63 }
 0x936   :  { %955 = vst.msk [vmem:[#allocation4 + $0x8] sm:$0xf] %vm679_vm4, %v4860_v35 }
 0x937   :  { %v951_v37 = vmul.f32 %v2952_v29, %v950_v36  ;;  %v937_v38 = vpop.permute.xlu0 %936 }
 0x938   :  { %v939_v39 = vmul.f32 %v2951_v34, %v937_v38 }
 0x939   :  { %v952_v40 = vadd.f32 %v951_v37, %v830_v63 }
 0x93a   :  { %v940_v41 = vadd.f32 %v939_v39, %v831_v2 }
 0x93b   :  { %953 = vst.msk [vmem:[#allocation2] sm:$0xff] %vm540_vm0, %v952_v40 }
 0x93c   :  { %941 = vst.msk [vmem:[#allocation3] sm:$0xff] %vm542_vm2, %v940_v41 }
 0x942   :  { %v970_v42 = vld [vmem:[#allocation2] sm:$0xff] }
 0x943   :  { %3212 = vmatmul.mubr.msk.f32.vlgmr.msra.gmra.mrb[6].mxu1 %vm540_vm0, %v970_v42  ;;  %v971_v43 = vld [vmem:[#allocation3] sm:$0xff] }
 0x944   :  { %1050 = vrot.lane.b32.xlu0 %v971_v43, %s3991_s2  ;;  %3684 = vmatpush3.bf16.msra.mxu1 %v4324_v1 }
 0x945   :  { %3685 = vmatprep.subr.bf16.mxu1 %v3987_v0  ;;  %3230 = vmatprep.mubr.msk.f32.mxu1 %vm3989_vm1, %v3988_v21 }
 0x948   :  { %3687 = vmatpush3.bf16.msra.mxu1 %v4352_v12 }
 0x949   :  { %3688 = vmatprep.subr.bf16.mxu1 %v3987_v0 }
 0x94c   :  { %3690 = vmatpush3.bf16.msra.mxu1 %v4367_v18 }
 0x94d   :  { %3691 = vmatprep.subr.bf16.mxu1 %v3987_v0 }
 0x950   :  { %3693 = vmatpush3.bf16.msra.mxu1 %v4393_v27 }
 0x951   :  { %3694 = vmatprep.subr.bf16.mxu1 %v3987_v0 }
 0x9b6   :  { %v1051_v58 = vpop.permute.xlu0 %1050 }
 0xa16   :  { %v1041_v49 = vpop.f32.mrb[6].mxu1 }
 0xa17   :  { %v1045_v50 = vadd.f32 %v1041_v49, %v969_v48  ;;  %v3213_v51 = vpop.f32.mrb[7].mxu1  ;;  %v2958_v49 = vld [vmem:[%s5534_s8 + $0x20] sm:$0xff] }
 0xa19   :  { %3887 = vtanh.f32 %v1045_v50 }
 0xa23   :  { %v3888_v52 = vpop.eup %3887 }
 0xa24   :  { %1055 = vrot.lane.b32.xlu1 %v3888_v52, %s3990_s0  ;;  %v1047_v53 = vmul.f32 0.5, %v3888_v52 }
 0xa26   :  { %v1048_v54 = vadd.f32 0.5, %v1047_v53 }
 0xa28   :  { %v1053_v59 = vmul.f32 %v1051_v58, %v1048_v54 }
 0xa96   :  { %v1056_v55 = vpop.permute.xlu1 %1055 }
 0xa97   :  { %v1058_v57 = vmul.f32 %v1056_v55, %v1048_v54 }
 0xa99   :  { %1060 = vrot.lane.b32.xlu1 %v1058_v57, %s3991_s2 }
 0xb0b   :  { %v1061_v60 = vpop.permute.xlu1 %1060 }
 0xb0c   :  { %v1063_v61 = vadd.f32 %v1061_v60, %v1053_v59 }
 0xb0e   :  { %3889 = vtanh.f32 %v1063_v61  ;;  %v1074_v3 = vsub.f32 %v1063_v61, %v1051_v58  ;;  %v1235_v61 = vld [vmem:[#allocation5 + $0x20] sm:$0xf0] }
 0xb18   :  { %v3890_v62 = vpop.eup %3889 }
 0xb19   :  { %1066 = vrot.lane.b32.xlu0 %v3890_v62, %s3990_s0  ;;  %v1236_v62 = vld [vmem:[#allocation5 + $0x18] sm:$0xf] }
 0xb8b   :  { %v1067_v63 = vpop.permute.xlu0 %1066 }
 0xb8c   :  { %v1069_v2 = vmul.f32 %v1067_v63, %v1048_v54  ;;  %v1238_v63 = vrot.slane %v1235_v61, 4  ;;  %v2963_v61 = vld [vmem:[%s5533_s7 + $0x30] sm:$0xff] }
 0xb8e   :  { %1086 = vrot.lane.b32.xlu0 %v1069_v2, %s3990_s0  ;;  %1083 = vrot.lane.b32.xlu1 %v1069_v2, %s3991_s2  ;;  %v1241_v2 = vrot.slane %v1236_v62, 4 }
 0xb92   :  { %1076 = vrot.lane.b32.xlu1 %v1074_v3, %s3992_s17  ;;  %v1243_v3 = vsel %vm554_vm3, %v1238_v63, %v1241_v2  ;;  %v2964_v2 = vld [vmem:[%s5534_s8 + $0x30] sm:$0xff] }
 0xc00   :  { %v1087_v5 = vpop.permute.xlu0 %1086  ;;  %v1084_v6 = vpop.permute.xlu1 %1083 }
 0xc01   :  { %v1089_v8 = vsel %vm542_vm2, %v1084_v6, %v1087_v5  ;;  %v4892_v9 = vmul.f32 %v2954_v4, %v1084_v6 }
 0xc02   :  { %v1090_v10 = vsub.f32 %v1089_v8, %v970_v42 }
 0xc03   :  { %1095 = vst.msk [vmem:[#allocation4 + $0xc] sm:$0xf] %vm679_vm4, %v4892_v9 }
 0xc04   :  { %v1091_v11 = vmul.f32 %v2955_v7, %v1090_v10  ;;  %v1077_v13 = vpop.permute.xlu1 %1076 }
 0xc05   :  { %v1079_v14 = vmul.f32 %v2954_v4, %v1077_v13 }
 0xc06   :  { %v1092_v16 = vadd.f32 %v1091_v11, %v970_v42 }
 0xc07   :  { %v1080_v17 = vadd.f32 %v1079_v14, %v971_v43 }
 0xc08   :  { %1093 = vst.msk [vmem:[#allocation2] sm:$0xff] %vm540_vm0, %v1092_v16 }
 0xc09   :  { %1081 = vst.msk [vmem:[#allocation3] sm:$0xff] %vm542_vm2, %v1080_v17 }
 0xc0f   :  { %v1104_v19 = vld [vmem:[#allocation2] sm:$0xff] }
 0xc10   :  { %3231 = vmatmul.mubr.msk.f32.vlgmr.msra.gmra.mrb[8].mxu1 %vm540_vm0, %v1104_v19  ;;  %v1105_v20 = vld [vmem:[#allocation3] sm:$0xff] }
 0xc11   :  { %1184 = vrot.lane.b32.xlu1 %v1105_v20, %s3991_s2  ;;  %3696 = vmatpush3.bf16.msra.mxu1 %v4324_v1 }
 0xc12   :  { %3697 = vmatprep.subr.bf16.mxu1 %v3987_v0  ;;  %3249 = vmatprep.mubr.msk.f32.mxu1 %vm3989_vm1, %v3988_v21 }
 0xc15   :  { %3699 = vmatpush3.bf16.msra.mxu1 %v4352_v12 }
 0xc16   :  { %3700 = vmatprep.subr.bf16.mxu1 %v3987_v0 }
 0xc19   :  { %3702 = vmatpush3.bf16.msra.mxu1 %v4367_v18 }
 0xc1a   :  { %3703 = vmatprep.subr.bf16.mxu1 %v3987_v0 }
 0xc1d   :  { %3705 = vmatpush3.bf16.msra.mxu1 %v4393_v27 }
 0xc1e   :  { %3706 = vmatprep.subr.bf16.mxu1 %v3987_v0 }
 0xc83   :  { %v1185_v38 = vpop.permute.xlu1 %1184 }
 0xce3   :  { %v1175_v25 = vpop.f32.mrb[8].mxu1 }
 0xce4   :  { %v1179_v34 = vadd.f32 %v1175_v25, %v1103_v24  ;;  %v3232_v26 = vpop.f32.mrb[9].mxu1  ;;  %v2960_v25 = vld [vmem:[%s5533_s7 + $0x28] sm:$0xff] }
 0xce6   :  { %3891 = vtanh.f32 %v1179_v34 }
 0xcf0   :  { %v3892_v28 = vpop.eup %3891 }
 0xcf1   :  { %1189 = vrot.lane.b32.xlu0 %v3892_v28, %s3990_s0  ;;  %v1181_v29 = vmul.f32 0.5, %v3892_v28  ;;  %v2961_v28 = vld [vmem:[%s5534_s8 + $0x28] sm:$0xff] }
 0xcf3   :  { %v1182_v32 = vadd.f32 0.5, %v1181_v29 }
 0xcf5   :  { %v1187_v39 = vmul.f32 %v1185_v38, %v1182_v32 }
 0xd63   :  { %v1190_v36 = vpop.permute.xlu0 %1189 }
 0xd64   :  { %v1192_v37 = vmul.f32 %v1190_v36, %v1182_v32 }
 0xd66   :  { %1194 = vrot.lane.b32.xlu0 %v1192_v37, %s3991_s2 }
 0xdd8   :  { %v1195_v40 = vpop.permute.xlu0 %1194 }
 0xdd9   :  { %v1197_v41 = vadd.f32 %v1195_v40, %v1187_v39 }
 0xddb   :  { %3893 = vtanh.f32 %v1197_v41  ;;  %v1208_v45 = vsub.f32 %v1197_v41, %v1185_v38 }
 0xde5   :  { %v3894_v42 = vpop.eup %3893 }
 0xde6   :  { %1200 = vrot.lane.b32.xlu1 %v3894_v42, %s3990_s0 }
 0xe58   :  { %v1201_v43 = vpop.permute.xlu1 %1200 }
 0xe59   :  { %v1203_v44 = vmul.f32 %v1201_v43, %v1182_v32 }
 0xe5b   :  { %1220 = vrot.lane.b32.xlu1 %v1203_v44, %s3990_s0  ;;  %1217 = vrot.lane.b32.xlu0 %v1203_v44, %s3991_s2  ;;  %v1375_v44 = vld [vmem:[#allocation5 + $0x30] sm:$0xf] }
 0xe5f   :  { %1210 = vrot.lane.b32.xlu0 %v1208_v45, %s3992_s17  ;;  %v1376_v45 = vld [vmem:[#allocation5 + $0x8] sm:$0xf0] }
 0xecd   :  { %v1221_v47 = vpop.permute.xlu1 %1220  ;;  %v1218_v48 = vpop.permute.xlu0 %1217 }
 0xece   :  { %v1223_v50 = vsel %vm542_vm2, %v1218_v48, %v1221_v47  ;;  %v4924_v51 = vmul.f32 %v2957_v46, %v1218_v48 }
 0xecf   :  { %v1224_v52 = vsub.f32 %v1223_v50, %v1104_v19 }
 0xed1   :  { %v1225_v53 = vmul.f32 %v2958_v49, %v1224_v52  ;;  %v1211_v54 = vpop.permute.xlu0 %1210 }
 0xed2   :  { %v1213_v55 = vmul.f32 %v2957_v46, %v1211_v54  ;;  %v1377_v46 = vsel %vm554_vm3, %v1375_v44, %v1376_v45 }
 0xed3   :  { %v1226_v57 = vadd.f32 %v1225_v53, %v1104_v19 }
 0xed4   :  { %v1214_v58 = vadd.f32 %v1213_v55, %v1105_v20 }
 0xed5   :  { %1227 = vst.msk [vmem:[#allocation2] sm:$0xff] %vm540_vm0, %v1226_v57 }
 0xed6   :  { %1215 = vst.msk [vmem:[#allocation3] sm:$0xff] %vm542_vm2, %v1214_v58 }
 0xedc   :  { %v1244_v59 = vld [vmem:[#allocation2] sm:$0xff] }
 0xedd   :  { %3250 = vmatmul.mubr.msk.f32.vlgmr.msra.gmra.mrb[10].mxu1 %vm540_vm0, %v1244_v59  ;;  %v1245_v60 = vld [vmem:[#allocation3] sm:$0xff] }
 0xede   :  { %1324 = vrot.lane.b32.xlu0 %v1245_v60, %s3991_s2  ;;  %3708 = vmatpush3.bf16.msra.mxu1 %v4324_v1 }
 0xedf   :  { %3709 = vmatprep.subr.bf16.mxu1 %v3987_v0  ;;  %3268 = vmatprep.mubr.msk.f32.mxu1 %vm3989_vm1, %v3988_v21 }
 0xee2   :  { %3711 = vmatpush3.bf16.msra.mxu1 %v4352_v12 }
 0xee3   :  { %3712 = vmatprep.subr.bf16.mxu1 %v3987_v0 }
 0xee6   :  { %3714 = vmatpush3.bf16.msra.mxu1 %v4367_v18 }
 0xee7   :  { %3715 = vmatprep.subr.bf16.mxu1 %v3987_v0 }
 0xeea   :  { %3717 = vmatpush3.bf16.msra.mxu1 %v4393_v27 }
 0xeeb   :  { %3718 = vmatprep.subr.bf16.mxu1 %v3987_v0 }
 0xf50   :  { %v1325_v14 = vpop.permute.xlu0 %1324 }
 0xfb0   :  { %v1315_v4 = vpop.f32.mrb[10].mxu1 }
 0xfb1   :  { %v1319_v5 = vadd.f32 %v1315_v4, %v1243_v3  ;;  %v3251_v6 = vpop.f32.mrb[11].mxu1 }
 0xfb3   :  { %3895 = vtanh.f32 %v1319_v5 }
 0xfbd   :  { %v3896_v7 = vpop.eup %3895 }
 0xfbe   :  { %1329 = vrot.lane.b32.xlu1 %v3896_v7, %s3990_s0  ;;  %v1321_v8 = vmul.f32 0.5, %v3896_v7 }
 0xfc0   :  { %v1322_v10 = vadd.f32 0.5, %v1321_v8 }
 0xfc2   :  { %v1327_v16 = vmul.f32 %v1325_v14, %v1322_v10 }
0x1030   :  { %v1330_v11 = vpop.permute.xlu1 %1329 }
0x1031   :  { %v1332_v13 = vmul.f32 %v1330_v11, %v1322_v10 }
0x1033   :  { %1334 = vrot.lane.b32.xlu1 %v1332_v13, %s3991_s2 }
0x10a5   :  { %v1335_v17 = vpop.permute.xlu1 %1334 }
0x10a6   :  { %v1337_v19 = vadd.f32 %v1335_v17, %v1327_v16  ;;  %v1509_v16 = vld [vmem:[#allocation5 + $0x30] sm:$0xf0]  ;;  %v1510_v17 = vld [vmem:[#allocation5 + $0x8] sm:$0xf] }
0x10a8   :  { %3897 = vtanh.f32 %v1337_v19  ;;  %v1348_v24 = vsub.f32 %v1337_v19, %v1325_v14  ;;  %v1512_v19 = vrot.slane %v1509_v16, 4 }
0x10b2   :  { %v3898_v20 = vpop.eup %3897 }
0x10b3   :  { %1340 = vrot.lane.b32.xlu0 %v3898_v20, %s3990_s0  ;;  %v1515_v20 = vrot.slane %v1510_v17, 4 }
0x1125   :  { %v1341_v22 = vpop.permute.xlu0 %1340 }
0x1126   :  { %v1343_v23 = vmul.f32 %v1341_v22, %v1322_v10  ;;  %v1517_v22 = vsel %vm554_vm3, %v1512_v19, %v1515_v20 }
0x1128   :  { %1360 = vrot.lane.b32.xlu0 %v1343_v23, %s3990_s0  ;;  %1357 = vrot.lane.b32.xlu1 %v1343_v23, %s3991_s2 }
0x112c   :  { %1350 = vrot.lane.b32.xlu1 %v1348_v24, %s3992_s17 }
0x119a   :  { %v1361_v34 = vpop.permute.xlu0 %1360  ;;  %v1358_v26 = vpop.permute.xlu1 %1357 }
0x119b   :  { %v1363_v29 = vsel %vm542_vm2, %v1358_v26, %v1361_v34  ;;  %v4954_v32 = vmul.f32 %v2960_v25, %v1358_v26 }
0x119c   :  { %v1364_v36 = vsub.f32 %v1363_v29, %v1244_v59 }
0x119e   :  { %v1365_v37 = vmul.f32 %v2961_v28, %v1364_v36  ;;  %v1351_v38 = vpop.permute.xlu1 %1350 }
0x119f   :  { %v1353_v39 = vmul.f32 %v2960_v25, %v1351_v38 }
0x11a0   :  { %v1366_v40 = vadd.f32 %v1365_v37, %v1244_v59 }
0x11a1   :  { %v1354_v41 = vadd.f32 %v1353_v39, %v1245_v60 }
0x11a2   :  { %1367 = vst.msk [vmem:[#allocation2] sm:$0xff] %vm540_vm0, %v1366_v40 }
0x11a3   :  { %1355 = vst.msk [vmem:[#allocation3] sm:$0xff] %vm542_vm2, %v1354_v41 }
0x11a9   :  { %v1378_v42 = vld [vmem:[#allocation2] sm:$0xff] }
0x11aa   :  { %3269 = vmatmul.mubr.msk.f32.vlgmr.msra.gmra.mrb[12].mxu1 %vm540_vm0, %v1378_v42  ;;  %v1379_v43 = vld [vmem:[#allocation3] sm:$0xff] }
0x11ab   :  { %1458 = vrot.lane.b32.xlu1 %v1379_v43, %s3991_s2  ;;  %3720 = vmatpush3.bf16.msra.mxu1 %v4324_v1 }
0x11ac   :  { %3721 = vmatprep.subr.bf16.mxu1 %v3987_v0  ;;  %3287 = vmatprep.mubr.msk.f32.mxu1 %vm3989_vm1, %v3988_v21 }
0x11af   :  { %3723 = vmatpush3.bf16.msra.mxu1 %v4352_v12 }
0x11b0   :  { %3724 = vmatprep.subr.bf16.mxu1 %v3987_v0 }
0x11b3   :  { %3726 = vmatpush3.bf16.msra.mxu1 %v4367_v18 }
0x11b4   :  { %3727 = vmatprep.subr.bf16.mxu1 %v3987_v0 }
0x11b7   :  { %3729 = vmatpush3.bf16.msra.mxu1 %v4393_v27 }
0x121d   :  { %v1459_v18 = vpop.permute.xlu1 %1458 }
0x127d   :  { %v1449_v1 = vpop.f32.mrb[12].mxu1 }
0x127e   :  { %v1453_v47 = vadd.f32 %v1449_v1, %v1377_v46  ;;  %v3270_v48 = vpop.f32.mrb[13].mxu1  ;;  %v1668_v46 = vld [vmem:[%s5530_s4 + $0x8] sm:$0xff]  ;;  %v1667_v1 = vld [vmem:[%s5530_s4] sm:$0xff] }
0x127f   :  { %v1672_v48 = vld [vmem:[%s5530_s4 + $0x28] sm:$0xff] }
0x1280   :  { %3899 = vtanh.f32 %v1453_v47 }
0x128a   :  { %v3900_v49 = vpop.eup %3899 }
0x128b   :  { %1463 = vrot.lane.b32.xlu0 %v3900_v49, %s3990_s0  ;;  %v1455_v12 = vmul.f32 0.5, %v3900_v49  ;;  %v1674_v49 = vld [vmem:[%s5530_s4 + $0x38] sm:$0xff] }
0x128d   :  { %v1456_v50 = vadd.f32 0.5, %v1455_v12 }
0x128f   :  { %v1461_v54 = vmul.f32 %v1459_v18, %v1456_v50 }
0x12fd   :  { %v1464_v52 = vpop.permute.xlu0 %1463 }
0x12fe   :  { %v1466_v53 = vmul.f32 %v1464_v52, %v1456_v50  ;;  %v1671_v52 = vld [vmem:[%s5530_s4 + $0x20] sm:$0xff] }
0x1300   :  { %1468 = vrot.lane.b32.xlu0 %v1466_v53, %s3991_s2  ;;  %v1673_v53 = vld [vmem:[%s5530_s4 + $0x30] sm:$0xff] }
0x1372   :  { %v1469_v27 = vpop.permute.xlu0 %1468 }
0x1373   :  { %v1471_v55 = vadd.f32 %v1469_v27, %v1461_v54  ;;  %v3736_v54 = vpack.c.bf16 %v1673_v53, %v1671_v52  ;;  %v1676_v27 = vld [vmem:[%s5530_s4 + $0x48] sm:$0xff] }
0x1375   :  { %3901 = vtanh.f32 %v1471_v55  ;;  %v1482_v60 = vsub.f32 %v1471_v55, %v1459_v18  ;;  %v1678_v55 = vld [vmem:[%s5530_s4 + $0x58] sm:$0xff] }
0x137f   :  { %v3902_v57 = vpop.eup %3901 }
0x1380   :  { %1474 = vrot.lane.b32.xlu1 %v3902_v57, %s3990_s0  ;;  %v3738_v57 = vpack.c.bf16 %v1678_v55, %v1676_v27 }
0x13f2   :  { %v1475_v58 = vpop.permute.xlu1 %1474 }
0x13f3   :  { %v1477_v59 = vmul.f32 %v1475_v58, %v1456_v50  ;;  %v3734_v50 = vpack.c.bf16 %v1674_v49, %v1672_v48  ;;  %v1675_v58 = vld [vmem:[%s5530_s4 + $0x40] sm:$0xff] }
0x13f4   :  { %v1683_v49 = vld [vmem:[%s5531_s5] sm:$0x3]  ;;  %s3993_s5 = smov [#allocation9]  }
0x13f5   :  { %1494 = vrot.lane.b32.xlu1 %v1477_v59, %s3990_s0  ;;  %1491 = vrot.lane.b32.xlu0 %v1477_v59, %s3991_s2  ;;  %v1677_v59 = vld [vmem:[%s5530_s4 + $0x50] sm:$0xff]  ;;  %s2929_s18 = sshll.u32 %s3993_s5, 4  ;;  %s2930_s18 = int_to_ptr.vmem [resolvable:$true] %s2929_s18 }
0x13f6   :  { %p3944_p1 = scmp.lt.s32.totalorder %s2930_s18, %s2930_s18 }
0x13f9   :  { %1484 = vrot.lane.b32.xlu0 %v1482_v60, %s3992_s17  ;;  %v3740_v60 = vpack.c.bf16 %v1677_v59, %v1675_v58 }
0x1467   :  { %v1495_v62 = vpop.permute.xlu1 %1494  ;;  %v1492_v63 = vpop.permute.xlu0 %1491 }
0x1468   :  { %v1497_v3 = vsel %vm542_vm2, %v1492_v63, %v1495_v62  ;;  %v4983_v4 = vmul.f32 %v2963_v61, %v1492_v63  ;;  %v1682_v62 = vld [vmem:[%s5530_s4 + $0x78] sm:$0xff] }
0x1469   :  { %v1498_v5 = vsub.f32 %v1497_v3, %v1378_v42  ;;  %v1681_v3 = vld [vmem:[%s5530_s4 + $0x70] sm:$0xff] }
0x146b   :  { %v1499_v6 = vmul.f32 %v2964_v2, %v1498_v5  ;;  %v1485_v7 = vpop.permute.xlu0 %1484  ;;  %v1679_v2 = vld [vmem:[%s5530_s4 + $0x60] sm:$0xff] }
0x146c   :  { %v1487_v8 = vmul.f32 %v2963_v61, %v1485_v7  ;;  %v1680_v61 = vld [vmem:[%s5530_s4 + $0x68] sm:$0xff]  ;;  %v3744_v5 = vpack.c.bf16 %v1681_v3, %v1679_v2 }
0x146d   :  { %v1500_v10 = vadd.f32 %v1499_v6, %v1378_v42  ;;  %v3742_v63 = vpack.c.bf16 %v1682_v62, %v1680_v61  ;;  %v5073_v6 = vld [vmem:[%s5533_s7 + $0x38] sm:$0xff] }
0x146e   :  { %v1488_v11 = vadd.f32 %v1487_v8, %v1379_v43 }
0x146f   :  { %1501 = vst.msk [vmem:[#allocation2] sm:$0xff] %vm540_vm0, %v1500_v10 }
0x1470   :  { %1489 = vst.msk [vmem:[#allocation3] sm:$0xff] %vm542_vm2, %v1488_v11  ;;  %v2967_v11 = vld [vmem:[%s5534_s8 + $0x38] sm:$0xff] }
0x1476   :  { %v4987_v13 = vld [vmem:[#allocation2] sm:$0xff] }
0x1477   :  { %3288 = vmatmul.mubr.msk.f32.vlgmr.msra.gmra.mrb[14].mxu1 %vm540_vm0, %v4987_v13  ;;  %v4991_v14 = vld [vmem:[#allocation3] sm:$0xff] }
0x1478   :  { %1598 = vrot.lane.b32.xlu0 %v4991_v14, %s3991_s2  ;;  %1771 = vmatprep.mubr.f32.mxu1 %v3988_v21 }
0x14ea   :  { %v4999_v37 = vpop.permute.xlu0 %1598 }
0x154a   :  { %v1589_v23 = vpop.f32.mrb[14].mxu1 }
0x154b   :  { %v1593_v24 = vadd.f32 %v1589_v23, %v1517_v22  ;;  %v3289_v25 = vpop.f32.mrb[15].mxu1  ;;  %v1806_v22 = vld [vmem:[%s5532_s6] sm:$0xff]  ;;  %v1807_v23 = vld [vmem:[%s5532_s6 + $0x8] sm:$0xff] }
0x154d   :  { %3903 = vtanh.f32 %v1593_v24  ;;  %v5089_v24 = vpack.c.bf16 %v1807_v23, %v1806_v22 }
0x154f   :  { %3784 = vmatpush3.bf16.msra.mxu0 %v5089_v24 }
0x1550   :  { %3785 = vmatprep.subr.bf16.mxu0 %v3987_v0 }
0x1557   :  { %v3904_v34 = vpop.eup %3903 }
0x1558   :  { %1603 = vrot.lane.b32.xlu1 %v3904_v34, %s3990_s0  ;;  %v1595_v26 = vmul.f32 0.5, %v3904_v34  ;;  %v1808_v34 = vld [vmem:[%s5532_s6 + $0x10] sm:$0xff] }
0x155a   :  { %v1596_v28 = vadd.f32 0.5, %v1595_v26  ;;  %v1809_v26 = vld [vmem:[%s5532_s6 + $0x18] sm:$0xff] }
0x155c   :  { %v1601_v38 = vmul.f32 %v4999_v37, %v1596_v28 }
0x15ca   :  { %v1604_v29 = vpop.permute.xlu1 %1603 }
0x15cb   :  { %v1606_v36 = vmul.f32 %v1604_v29, %v1596_v28 }
0x15cd   :  { %1608 = vrot.lane.b32.xlu1 %v1606_v36, %s3991_s2 }
0x163f   :  { %v1609_v39 = vpop.permute.xlu1 %1608 }
0x1640   :  { %v5002_v40 = vadd.f32 %v1609_v39, %v1601_v38  ;;  %v1813_v38 = vld [vmem:[%s5532_s6 + $0x38] sm:$0xff] }
0x1642   :  { %3905 = vtanh.f32 %v5002_v40 }
0x164c   :  { %v3906_v41 = vpop.eup %3905 }
0x164d   :  { %1614 = vrot.lane.b32.xlu0 %v3906_v41, %s3990_s0 }
0x1651   :  { %1505 = vrot.lane.b32.xlu0 %v4983_v4, %s3991_s2 }
0x1655   :  { %1231 = vrot.lane.b32.xlu0 %v4924_v51, %s3991_s2 }
0x1659   :  { %957 = vrot.lane.b32.xlu0 %v4860_v35, %s3991_s2  ;;  %v1670_v35 = vld [vmem:[%s5530_s4 + $0x18] sm:$0xff] }
0x165a   :  { %v3730_v47 = vpack.c.bf16 %v1670_v35, %v1668_v46 }
0x165c   :  { %3731 = vmatprep.subr.bf16.mxu1 %v3730_v47 }
0x16bf   :  { %v1615_v42 = vpop.permute.xlu0 %1614 }
0x16c0   :  { %v1617_v43 = vmul.f32 %v1615_v42, %v1596_v28 }
0x16c2   :  { %1634 = vrot.lane.b32.xlu0 %v1617_v43, %s3990_s0  ;;  %1631 = vrot.lane.b32.xlu1 %v1617_v43, %s3991_s2 }
0x16c3   :  { %v1506_v44 = vpop.permute.xlu0 %1505 }
0x16c4   :  { %1508 = vst.msk [vmem:[#allocation4] sm:$0xf0] %vm685_vm5, %v1506_v44 }
0x16c6   :  { %823 = vrot.lane.b32.xlu0 %v4828_v56, %s3991_s2  ;;  %v1669_v56 = vld [vmem:[%s5530_s4 + $0x10] sm:$0xff] }
0x16c7   :  { %v1232_v45 = vpop.permute.xlu0 %1231  ;;  %v3732_v12 = vpack.c.bf16 %v1669_v56, %v1667_v1 }
0x16c8   :  { %1234 = vst.msk [vmem:[#allocation4 + $0x8] sm:$0xf0] %vm685_vm5, %v1232_v45 }
0x16c9   :  { %3733 = vmatpush1.bf16.msra.mxu1 %v3732_v12  ;;  %v1688_v12 = vrot.slane %v1683_v49, %v257_v31 }
0x16ca   :  { %3735 = vmatprep.subr.bf16.mxu1 %v3734_v50  ;;  %v1692_v50 = vrot.slane %v1683_v49, %v261_v33 }
0x16cb   :  { %v958_v18 = vpop.permute.xlu0 %957 }
0x16cc   :  { %960 = vst.msk [vmem:[#allocation4 + $0x10] sm:$0xf0] %vm685_vm5, %v958_v18 }
0x16cd   :  { %1369 = vst.msk [vmem:[#allocation4 + $0x14] sm:$0xf] %vm679_vm4, %v4954_v32  ;;  %3737 = vmatpush1.bf16.msra.mxu1 %v3736_v54 }
0x16ce   :  { %3739 = vmatprep.subr.bf16.mxu1 %v3738_v57 }
0x16d1   :  { %3741 = vmatpush1.bf16.msra.mxu1 %v3740_v60 }
0x16d2   :  { %3743 = vmatprep.subr.bf16.mxu1 %v3742_v63 }
0x16d5   :  { %3745 = vmatpush1.bf16.msra.mxu1 %v3744_v5 }
0x16d6   :  { %3746 = vmatprep.subr.bf16.mxu1 %v3987_v0 }
0x1734   :  { %v1632_v7 = vpop.permute.xlu1 %1631  ;;  %v1635_v8 = vpop.permute.xlu0 %1634 }
0x1735   :  { %v1642_v10 = vmul.f32 %v5073_v6, %v1632_v7  ;;  %v1637_v16 = vsel %vm542_vm2, %v1632_v7, %v1635_v8 }
0x1736   :  { %v1638_v17 = vsub.f32 %v1637_v16, %v4987_v13 }
0x1737   :  { %1645 = vrot.lane.b32.xlu1 %v1642_v10, %s3991_s2 }
0x1738   :  { %v1639_v19 = vmul.f32 %v2967_v11, %v1638_v17  ;;  %v824_v20 = vpop.permute.xlu0 %823 }
0x1739   :  { %826 = vst.msk [vmem:[#allocation4 + $0x14] sm:$0xf0] %vm685_vm5, %v824_v20 }
0x173a   :  { %v1640_v25 = vadd.f32 %v1639_v19, %v4987_v13  ;;  %1503 = vst.msk [vmem:[#allocation4 + $0x18] sm:$0xf] %vm679_vm4, %v4983_v4  ;;  %v5105_v13 = vpack.c.bf16 %v1809_v26, %v1808_v34  ;;  %v1811_v4 = vld [vmem:[%s5532_s6 + $0x28] sm:$0xff] }
0x173b   :  { %1371 = vrot.lane.b32.xlu1 %v4954_v32, %s3991_s2  ;;  %v1810_v32 = vld [vmem:[%s5532_s6 + $0x20] sm:$0xff] }
0x173c   :  { %1641 = vst.msk [vmem:[#allocation2] sm:$0xff] %vm540_vm0, %v1640_v25  ;;  %3787 = vmatpush3.bf16.msra.mxu0 %v5105_v13  ;;  %v5117_v28 = vpack.c.bf16 %v1811_v4, %v1810_v32 }
0x173d   :  { %3788 = vmatprep.subr.bf16.mxu0 %v3987_v0 }
0x173f   :  { %1097 = vrot.lane.b32.xlu1 %v4892_v9, %s3991_s2  ;;  %v1812_v9 = vld [vmem:[%s5532_s6 + $0x30] sm:$0xff] }
0x1740   :  { %3790 = vmatpush3.bf16.msra.mxu0 %v5117_v28  ;;  %v5136_v39 = vpack.c.bf16 %v1813_v38, %v1812_v9 }
0x1741   :  { %3791 = vmatprep.subr.bf16.mxu0 %v3987_v0 }
0x1743   :  { %v1649_v29 = vld [vmem:[#allocation2] sm:$0xf]  ;;  %v5119_v36 = vld [vmem:[#allocation2 + $0x4] sm:$0xf]  ;;  %682 = vrot.lane.b32.xlu1 %v4794_v15, %s3991_s2  ;;  %v1622_v15 = vsub.f32 %v5002_v40, %v4999_v37 }
0x1744   :  { %1804 = vst.msk [vmem:[#allocation2] sm:$0xff] %vm540_vm0, %v3988_v21  ;;  %3793 = vmatpush3.bf16.msra.mxu0 %v5136_v39 }
0x1745   :  { %1650 = vst.msk [vmem:[#allocation7] sm:$0xf] %vm679_vm4, %v1649_v29  ;;  %3806 = vmatprep.subr.bf16.mxu0 %v3987_v0  ;;  %v1917_v29 = vld [vmem:[%s5533_s7] sm:$0xff] }
0x1747   :  { %1624 = vrot.lane.b32.xlu1 %v1622_v15, %s3992_s17  ;;  %v1918_v15 = vld [vmem:[%s5534_s8] sm:$0xff] }
0x174b   :  { %v5167_v47 = vld [vmem:[#allocation2] sm:$0xff] }
0x17a9   :  { %v1646_v41 = vpop.permute.xlu1 %1645 }
0x17aa   :  { %1648 = vst.msk [vmem:[#allocation4 - $0x4] sm:$0xf0] %vm685_vm5, %v1646_v41 }
0x17ad   :  { %v1372_v42 = vpop.permute.xlu1 %1371 }
0x17ae   :  { %1374 = vst.msk [vmem:[#allocation4 + $0x4] sm:$0xf0] %vm685_vm5, %v1372_v42 }
0x17b1   :  { %v1098_v43 = vpop.permute.xlu1 %1097  ;;  %v1663_v44 = vld [vmem:[#allocation4] sm:$0xff] }
0x17b2   :  { %1100 = vst.msk [vmem:[#allocation4 + $0xc] sm:$0xf0] %vm685_vm5, %v1098_v43  ;;  %2968 = vmatmul.mubr.msk.f32.vlgmr.msra.gmra.mrb[16].mxu1 %vm540_vm0, %v1663_v44 }
0x17b3   :  { %1229 = vst.msk [vmem:[#allocation4 + $0x10] sm:$0xf] %vm679_vm4, %v4924_v51  ;;  %1777 = vmatprep.mubr.f32.mxu1 %v3988_v21  ;;  %3748 = vmatpush3.bf16.msra.mxu1 %v5089_v24 }
0x17b4   :  { %3749 = vmatprep.subr.bf16.mxu1 %v3987_v0 }
0x17b5   :  { %v683_v37 = vpop.permute.xlu1 %682  ;;  %v1664_v40 = vld [vmem:[#allocation4 + $0x8] sm:$0xff] }
0x17b6   :  { %686 = vst.msk [vmem:[#allocation4 + $0x18] sm:$0xf0] %vm685_vm5, %v683_v37  ;;  %2969 = vmatmul.mubr.msk.f32.gmra.mrb[18].mxu1 %vm540_vm0, %v1664_v40 }
0x17b7   :  { %1643 = vst.msk [vmem:[#allocation4 + $0x1c] sm:$0xf] %vm679_vm4, %v1642_v10  ;;  %1783 = vmatprep.mubr.f32.mxu1 %v3988_v21  ;;  %3751 = vmatpush3.bf16.msra.mxu1 %v5105_v13 }
0x17b8   :  { %3752 = vmatprep.subr.bf16.mxu1 %v3987_v0 }
0x17b9   :  { %v1625_v51 = vpop.permute.xlu1 %1624 }
0x17ba   :  { %v1627_v45 = vmul.f32 %v5073_v6, %v1625_v51  ;;  %v1665_v46 = vld [vmem:[#allocation4 + $0x10] sm:$0xff] }
0x17bb   :  { %2970 = vmatmul.mubr.msk.f32.gmra.mrb[20].mxu1 %vm540_vm0, %v1665_v46 }
0x17bc   :  { %v1628_v35 = vadd.f32 %v1627_v45, %v4991_v14  ;;  %1789 = vmatprep.mubr.f32.mxu1 %v3988_v21  ;;  %3754 = vmatpush3.bf16.msra.mxu1 %v5117_v28 }
0x17bd   :  { %3755 = vmatprep.subr.bf16.mxu1 %v3987_v0 }
0x17be   :  { %1629 = vst.msk [vmem:[#allocation3] sm:$0xff] %vm542_vm2, %v1628_v35  ;;  %v1666_v1 = vld [vmem:[#allocation4 + $0x18] sm:$0xff] }
0x17bf   :  { %2971 = vmatmul.mubr.msk.f32.gmra.mrb[22].mxu1 %vm540_vm0, %v1666_v1 }
0x17c0   :  { %3757 = vmatpush3.bf16.msra.mxu1 %v5136_v39  ;;  %3306 = vmatprep.mubr.msk.f32.mxu1 %vm3989_vm1, %v3988_v21 }
0x17c1   :  { %3758 = vmatprep.subr.bf16.mxu1 %v3987_v0 }
0x17c3   :  { %3307 = vmatmul.mubr.msk.f32.vlgmr.msra.gmra.mrb[24].mxu1 %vm540_vm0, %v5167_v47 }
0x17c4   :  { %3760 = vmatpush3.bf16.msra.mxu1 %v5089_v24  ;;  %3325 = vmatprep.mubr.msk.f32.mxu1 %vm3989_vm1, %v3988_v21 }
0x17c5   :  { %v1658_v14 = vld [vmem:[#allocation3] sm:$0xf]  ;;  %v1660_v56 = vld [vmem:[#allocation3 + $0x4] sm:$0xf]  ;;  %3761 = vmatprep.subr.bf16.mxu1 %v3987_v0 }
0x17c6   :  { %1805 = vst.msk [vmem:[#allocation3] sm:$0xff] %vm542_vm2, %v3988_v21 }
0x17c7   :  { %1659 = vst.msk [vmem:[#allocation9] sm:$0xf] %vm679_vm4, %v1658_v14  ;;  %1662 = vst.msk [vmem:[#allocation9 + $0x4] sm:$0xf] %vm679_vm4, %v1660_v56 }
0x17c8   :  { %3763 = vmatpush3.bf16.msra.mxu1 %v5105_v13 }
0x17c9   :  { %3764 = vmatprep.subr.bf16.mxu1 %v3987_v0 }
0x17cc   :  { %3766 = vmatpush3.bf16.msra.mxu1 %v5117_v28 }
0x17cd   :  { %v5183_v48 = vld [vmem:[#allocation3] sm:$0xff]  ;;  %3767 = vmatprep.subr.bf16.mxu1 %v3987_v0 }
0x17ce   :  { %1897 = vrot.lane.b32.xlu1 %v5183_v48, %s3991_s2 }
0x17d0   :  { %3769 = vmatpush3.bf16.msra.mxu1 %v5136_v39 }
0x17d1   :  { %3770 = vmatprep.subr.bf16.mxu1 %v3987_v0 }
0x1840   :  { %v1898_v20 = vpop.permute.xlu1 %1897 }
0x1885   :  { %v1773_v52 = vpop.f32.mrb[16].mxu1 }
0x1886   :  { %v1774_v53 = vadd.f32 %v1773_v52, %v1688_v12  ;;  %v1775_v18 = vpop.f32.mrb[17].mxu1 }
0x1887   :  { %v1776_v54 = vadd.f32 %v1775_v18, %v1692_v50 }
0x1888   :  { %1796 = vst [vmem:[#allocation6] sm:$0xff] %v1774_v53 }
0x1889   :  { %1797 = vst [vmem:[#allocation6 + $0x8] sm:$0xff] %v1776_v54  ;;  %v1779_v27 = vpop.f32.mrb[18].mxu1 }
0x188a   :  { %v1780_v55 = vadd.f32 %v1779_v27, %v1688_v12  ;;  %v1781_v57 = vpop.f32.mrb[19].mxu1 }
0x188b   :  { %v1782_v58 = vadd.f32 %v1781_v57, %v1692_v50 }
0x188c   :  { %1798 = vst [vmem:[#allocation6 + $0x10] sm:$0xff] %v1780_v55 }
0x188d   :  { %1799 = vst [vmem:[#allocation6 + $0x18] sm:$0xff] %v1782_v58 }
0x188e   :  { %v1785_v59 = vpop.f32.mrb[20].mxu1 }
0x188f   :  { %v1786_v60 = vadd.f32 %v1785_v59, %v1688_v12  ;;  %v1787_v61 = vpop.f32.mrb[21].mxu1  ;;  %v1814_v5 = vld [vmem:[#allocation6] sm:$0xf] }
0x1890   :  { %v1788_v62 = vadd.f32 %v1787_v61, %v1692_v50 }
0x1891   :  { %1800 = vst [vmem:[#allocation6 + $0x20] sm:$0xff] %v1786_v60 }
0x1892   :  { %1801 = vst [vmem:[#allocation6 + $0x28] sm:$0xff] %v1788_v62  ;;  %v1791_v30 = vpop.f32.mrb[22].mxu1 }
0x1893   :  { %v1792_v31 = vadd.f32 %v1791_v30, %v1688_v12  ;;  %v1793_v33 = vpop.f32.mrb[23].mxu1 }
0x1894   :  { %v1794_v63 = vadd.f32 %v1793_v33, %v1692_v50 }
0x1895   :  { %1802 = vst [vmem:[#allocation6 + $0x30] sm:$0xff] %v1792_v31  ;;  %v2974_v31 = vld [vmem:[%s5533_s7 + $0x8] sm:$0xff] }
0x1896   :  { %1803 = vst [vmem:[#allocation6 + $0x38] sm:$0xff] %v1794_v63  ;;  %v1888_v2 = vpop.f32.mrb[24].mxu1 }
0x1897   :  { %v3308_v3 = vpop.f32.mrb[25].mxu1 }
0x189d   :  { %v1815_v6 = vld [vmem:[#allocation6 + $0x38] sm:$0xf0]  ;;  %v1947_v1 = vld [vmem:[#allocation6 + $0x38] sm:$0xf] }
0x189e   :  { %v1816_v7 = vsel %vm554_vm3, %v1814_v5, %v1815_v6  ;;  %v1952_v14 = vrot.slane %v1947_v1, 4 }
0x189f   :  { %v1892_v8 = vadd.f32 %v1888_v2, %v1816_v7  ;;  %v2975_v2 = vld [vmem:[%s5534_s8 + $0x8] sm:$0xff] }
0x18a1   :  { %3907 = vtanh.f32 %v1892_v8 }
0x18ab   :  { %v3908_v10 = vpop.eup %3907 }
0x18ac   :  { %1902 = vrot.lane.b32.xlu0 %v3908_v10, %s3990_s0  ;;  %v1894_v11 = vmul.f32 0.5, %v3908_v10 }
0x18ae   :  { %v1895_v16 = vadd.f32 0.5, %v1894_v11 }
0x18b0   :  { %v1900_v22 = vmul.f32 %v1898_v20, %v1895_v16 }
0x191e   :  { %v1903_v17 = vpop.permute.xlu0 %1902 }
0x191f   :  { %v1905_v19 = vmul.f32 %v1903_v17, %v1895_v16 }
0x1921   :  { %1907 = vrot.lane.b32.xlu0 %v1905_v19, %s3991_s2 }
0x1993   :  { %v1908_v23 = vpop.permute.xlu0 %1907 }
0x1994   :  { %v1910_v25 = vadd.f32 %v1908_v23, %v1900_v22  ;;  %v2084_v22 = vld [vmem:[#allocation6 + $0x10] sm:$0xf] }
0x1996   :  { %3909 = vtanh.f32 %v1910_v25  ;;  %v1919_v4 = vsub.f32 %v1910_v25, %v1898_v20  ;;  %v2085_v20 = vld [vmem:[#allocation6 + $0x28] sm:$0xf0] }
0x1997   :  { %v2086_v23 = vsel %vm554_vm3, %v2084_v22, %v2085_v20 }
0x19a0   :  { %v3910_v34 = vpop.eup %3909 }
0x19a1   :  { %1913 = vrot.lane.b32.xlu1 %v3910_v34, %s3990_s0 }
0x1a13   :  { %v1914_v26 = vpop.permute.xlu1 %1913 }
0x1a14   :  { %v1916_v32 = vmul.f32 %v1914_v26, %v1895_v16 }
0x1a16   :  { %1931 = vrot.lane.b32.xlu1 %v1916_v32, %s3990_s0  ;;  %1928 = vrot.lane.b32.xlu0 %v1916_v32, %s3991_s2 }
0x1a1a   :  { %1921 = vrot.lane.b32.xlu0 %v1919_v4, %s3992_s17 }
0x1a88   :  { %v1932_v9 = vpop.permute.xlu1 %1931  ;;  %v1929_v38 = vpop.permute.xlu0 %1928 }
0x1a89   :  { %v1934_v41 = vsel %vm542_vm2, %v1929_v38, %v1932_v9  ;;  %v5211_v42 = vmul.f32 %v1929_v38, %v1917_v29 }
0x1a8a   :  { %v1935_v43 = vsub.f32 %v1934_v41, %v5167_v47 }
0x1a8b   :  { %1940 = vst.msk [vmem:[%s5535_s9] sm:$0xf] %vm679_vm4, %v5211_v42 }
0x1a8c   :  { %v1936_v44 = vmul.f32 %v1935_v43, %v1918_v15  ;;  %v1922_v37 = vpop.permute.xlu0 %1921 }
0x1a8d   :  { %v1924_v40 = vmul.f32 %v1922_v37, %v1917_v29 }
0x1a8e   :  { %v1937_v51 = vadd.f32 %v1936_v44, %v5167_v47  ;;  %v1946_v47 = vld [vmem:[#allocation6] sm:$0xf0] }
0x1a8f   :  { %v1925_v45 = vadd.f32 %v1924_v40, %v5183_v48  ;;  %v1949_v56 = vrot.slane %v1946_v47, 4  ;;  %v2978_v47 = vld [vmem:[%s5534_s8 + $0x10] sm:$0xff] }
0x1a90   :  { %1938 = vst.msk [vmem:[#allocation2] sm:$0xff] %vm540_vm0, %v1937_v51 }
0x1a91   :  { %1926 = vst.msk [vmem:[#allocation3] sm:$0xff] %vm542_vm2, %v1925_v45  ;;  %v1954_v48 = vsel %vm554_vm3, %v1949_v56, %v1952_v14 }
0x1a97   :  { %v1955_v46 = vld [vmem:[#allocation2] sm:$0xff] }
0x1a98   :  { %3326 = vmatmul.mubr.msk.f32.vlgmr.msra.gmra.mrb[26].mxu1 %vm540_vm0, %v1955_v46  ;;  %v1956_v35 = vld [vmem:[#allocation3] sm:$0xff] }
0x1a99   :  { %2035 = vrot.lane.b32.xlu0 %v1956_v35, %s3991_s2  ;;  %3772 = vmatpush3.bf16.msra.mxu1 %v5089_v24 }
0x1a9a   :  { %3773 = vmatprep.subr.bf16.mxu1 %v3987_v0  ;;  %3344 = vmatprep.mubr.msk.f32.mxu1 %vm3989_vm1, %v3988_v21 }
0x1a9d   :  { %3775 = vmatpush3.bf16.msra.mxu1 %v5105_v13 }
0x1a9e   :  { %3776 = vmatprep.subr.bf16.mxu1 %v3987_v0 }
0x1aa1   :  { %3778 = vmatpush3.bf16.msra.mxu1 %v5117_v28 }
0x1aa2   :  { %3779 = vmatprep.subr.bf16.mxu1 %v3987_v0 }
0x1aa5   :  { %3781 = vmatpush3.bf16.msra.mxu1 %v5136_v39 }
0x1aa6   :  { %3794 = vmatprep.subr.bf16.mxu1 %v3987_v0 }
0x1b0b   :  { %v2036_v55 = vpop.permute.xlu0 %2035 }
0x1b6b   :  { %v2026_v49 = vpop.f32.mrb[26].mxu1 }
0x1b6c   :  { %v2030_v12 = vadd.f32 %v2026_v49, %v1954_v48  ;;  %v3327_v50 = vpop.f32.mrb[27].mxu1 }
0x1b6e   :  { %3911 = vtanh.f32 %v2030_v12 }
0x1b78   :  { %v3912_v52 = vpop.eup %3911 }
0x1b79   :  { %2040 = vrot.lane.b32.xlu1 %v3912_v52, %s3990_s0  ;;  %v2032_v53 = vmul.f32 0.5, %v3912_v52 }
0x1b7b   :  { %v2033_v18 = vadd.f32 0.5, %v2032_v53 }
0x1b7d   :  { %v2038_v57 = vmul.f32 %v2036_v55, %v2033_v18 }
0x1beb   :  { %v2041_v54 = vpop.permute.xlu1 %2040 }
0x1bec   :  { %v2043_v27 = vmul.f32 %v2041_v54, %v2033_v18 }
0x1bee   :  { %2045 = vrot.lane.b32.xlu1 %v2043_v27, %s3991_s2  ;;  %v2217_v27 = vld [vmem:[#allocation6 + $0x28] sm:$0xf] }
0x1c60   :  { %v2046_v58 = vpop.permute.xlu1 %2045 }
0x1c61   :  { %v2048_v59 = vadd.f32 %v2046_v58, %v2038_v57  ;;  %v2222_v57 = vrot.slane %v2217_v27, 4  ;;  %v2983_v27 = vld [vmem:[%s5533_s7 + $0x20] sm:$0xff] }
0x1c63   :  { %3913 = vtanh.f32 %v2048_v59  ;;  %v2057_v30 = vsub.f32 %v2048_v59, %v2036_v55  ;;  %v2216_v55 = vld [vmem:[#allocation6 + $0x10] sm:$0xf0] }
0x1c64   :  { %v2219_v58 = vrot.slane %v2216_v55, 4 }
0x1c66   :  { %v2224_v59 = vsel %vm554_vm3, %v2219_v58, %v2222_v57  ;;  %v2984_v58 = vld [vmem:[%s5534_s8 + $0x20] sm:$0xff] }
0x1c6d   :  { %v3914_v60 = vpop.eup %3913 }
0x1c6e   :  { %2051 = vrot.lane.b32.xlu0 %v3914_v60, %s3990_s0 }
0x1ce0   :  { %v2052_v61 = vpop.permute.xlu0 %2051 }
0x1ce1   :  { %v2054_v62 = vmul.f32 %v2052_v61, %v2033_v18 }
0x1ce3   :  { %2069 = vrot.lane.b32.xlu0 %v2054_v62, %s3990_s0  ;;  %2066 = vrot.lane.b32.xlu1 %v2054_v62, %s3991_s2 }
0x1ce7   :  { %2059 = vrot.lane.b32.xlu1 %v2057_v30, %s3992_s17 }
0x1d55   :  { %v2070_v33 = vpop.permute.xlu0 %2069  ;;  %v2067_v63 = vpop.permute.xlu1 %2066 }
0x1d56   :  { %v2072_v3 = vsel %vm542_vm2, %v2067_v63, %v2070_v33  ;;  %v5249_v5 = vmul.f32 %v2974_v31, %v2067_v63 }
0x1d57   :  { %v2073_v6 = vsub.f32 %v2072_v3, %v1955_v46 }
0x1d58   :  { %2078 = vst.msk [vmem:[%s5535_s9 + $0x4] sm:$0xf] %vm679_vm4, %v5249_v5 }
0x1d59   :  { %v2074_v7 = vmul.f32 %v2975_v2, %v2073_v6  ;;  %v2060_v8 = vpop.permute.xlu1 %2059 }
0x1d5a   :  { %v2062_v10 = vmul.f32 %v2974_v31, %v2060_v8 }
0x1d5b   :  { %v2075_v11 = vadd.f32 %v2074_v7, %v1955_v46  ;;  %v2977_v46 = vld [vmem:[%s5533_s7 + $0x10] sm:$0xff] }
0x1d5c   :  { %v2063_v16 = vadd.f32 %v2062_v10, %v1956_v35 }
0x1d5d   :  { %2076 = vst.msk [vmem:[#allocation2] sm:$0xff] %vm540_vm0, %v2075_v11 }
0x1d5e   :  { %2064 = vst.msk [vmem:[#allocation3] sm:$0xff] %vm542_vm2, %v2063_v16 }
0x1d64   :  { %v2087_v17 = vld [vmem:[#allocation2] sm:$0xff] }
0x1d65   :  { %3345 = vmatmul.mubr.msk.f32.vlgmr.msra.gmra.mrb[28].mxu1 %vm540_vm0, %v2087_v17  ;;  %v2088_v19 = vld [vmem:[#allocation3] sm:$0xff] }
0x1d66   :  { %2167 = vrot.lane.b32.xlu1 %v2088_v19, %s3991_s2  ;;  %3796 = vmatpush3.bf16.msra.mxu1 %v5089_v24 }
0x1d67   :  { %3797 = vmatprep.subr.bf16.mxu1 %v3987_v0  ;;  %3382 = vmatprep.mubr.msk.f32.mxu1 %vm3989_vm1, %v3988_v21 }
0x1d6a   :  { %3799 = vmatpush3.bf16.msra.mxu1 %v5105_v13 }
0x1d6b   :  { %3800 = vmatprep.subr.bf16.mxu1 %v3987_v0 }
0x1d6e   :  { %3802 = vmatpush3.bf16.msra.mxu1 %v5117_v28 }
0x1d6f   :  { %3803 = vmatprep.subr.bf16.mxu1 %v3987_v0 }
0x1d72   :  { %3805 = vmatpush3.bf16.msra.mxu1 %v5136_v39 }
0x1d73   :  { %3818 = vmatprep.subr.bf16.mxu1 %v3987_v0 }
0x1dd8   :  { %v2168_v15 = vpop.permute.xlu1 %2167 }
0x1e38   :  { %v2158_v25 = vpop.f32.mrb[28].mxu1 }
0x1e39   :  { %v2162_v34 = vadd.f32 %v2158_v25, %v2086_v23  ;;  %v3346_v26 = vpop.f32.mrb[29].mxu1  ;;  %v2981_v23 = vld [vmem:[%s5534_s8 + $0x18] sm:$0xff] }
0x1e3b   :  { %3915 = vtanh.f32 %v2162_v34 }
0x1e45   :  { %v3916_v32 = vpop.eup %3915 }
0x1e46   :  { %2172 = vrot.lane.b32.xlu0 %v3916_v32, %s3990_s0  ;;  %v2164_v4 = vmul.f32 0.5, %v3916_v32 }
0x1e48   :  { %v2165_v29 = vadd.f32 0.5, %v2164_v4 }
0x1e4a   :  { %v2170_v41 = vmul.f32 %v2168_v15, %v2165_v29 }
0x1eb8   :  { %v2173_v9 = vpop.permute.xlu0 %2172 }
0x1eb9   :  { %v2175_v38 = vmul.f32 %v2173_v9, %v2165_v29 }
0x1ebb   :  { %2177 = vrot.lane.b32.xlu0 %v2175_v38, %s3991_s2 }
0x1f2d   :  { %v2178_v43 = vpop.permute.xlu0 %2177 }
0x1f2e   :  { %v2180_v44 = vadd.f32 %v2178_v43, %v2170_v41  ;;  %v2354_v43 = vld [vmem:[#allocation6 + $0x20] sm:$0xf] }
0x1f30   :  { %3917 = vtanh.f32 %v2180_v44  ;;  %v2189_v45 = vsub.f32 %v2180_v44, %v2168_v15  ;;  %v2355_v44 = vld [vmem:[#allocation6 + $0x18] sm:$0xf0] }
0x1f3a   :  { %v3918_v37 = vpop.eup %3917 }
0x1f3b   :  { %2183 = vrot.lane.b32.xlu1 %v3918_v37, %s3990_s0  ;;  %v2356_v37 = vsel %vm554_vm3, %v2354_v43, %v2355_v44 }
0x1fad   :  { %v2184_v40 = vpop.permute.xlu1 %2183 }
0x1fae   :  { %v2186_v51 = vmul.f32 %v2184_v40, %v2165_v29 }
0x1fb0   :  { %2201 = vrot.lane.b32.xlu1 %v2186_v51, %s3990_s0  ;;  %2198 = vrot.lane.b32.xlu0 %v2186_v51, %s3991_s2 }
0x1fb4   :  { %2191 = vrot.lane.b32.xlu0 %v2189_v45, %s3992_s17 }
0x2022   :  { %v2202_v35 = vpop.permute.xlu1 %2201  ;;  %v2199_v1 = vpop.permute.xlu0 %2198 }
0x2023   :  { %v2204_v14 = vsel %vm542_vm2, %v2199_v1, %v2202_v35  ;;  %v5284_v56 = vmul.f32 %v2977_v46, %v2199_v1 }
0x2024   :  { %v2205_v48 = vsub.f32 %v2204_v14, %v2087_v17 }
0x2025   :  { %2210 = vst.msk [vmem:[%s5535_s9 + $0x8] sm:$0xf] %vm679_vm4, %v5284_v56 }
0x2026   :  { %v2206_v49 = vmul.f32 %v2978_v47, %v2205_v48  ;;  %v2192_v12 = vpop.permute.xlu0 %2191 }
0x2027   :  { %v2194_v50 = vmul.f32 %v2977_v46, %v2192_v12 }
0x2028   :  { %v2207_v52 = vadd.f32 %v2206_v49, %v2087_v17 }
0x2029   :  { %v2195_v53 = vadd.f32 %v2194_v50, %v2088_v19  ;;  %v2980_v19 = vld [vmem:[%s5533_s7 + $0x18] sm:$0xff] }
0x202a   :  { %2208 = vst.msk [vmem:[#allocation2] sm:$0xff] %vm540_vm0, %v2207_v52 }
0x202b   :  { %2196 = vst.msk [vmem:[#allocation3] sm:$0xff] %vm542_vm2, %v2195_v53 }
0x2031   :  { %v2225_v18 = vld [vmem:[#allocation2] sm:$0xff] }
0x2032   :  { %3364 = vmatmul.mubr.msk.f32.vlgmr.msra.gmra.mrb[8].mxu0 %vm540_vm0, %v2225_v18  ;;  %v2226_v54 = vld [vmem:[#allocation3] sm:$0xff] }
0x2033   :  { %2305 = vrot.lane.b32.xlu0 %v2226_v54, %s3991_s2  ;;  %3808 = vmatpush3.bf16.msra.mxu0 %v5089_v24 }
0x2034   :  { %3809 = vmatprep.subr.bf16.mxu0 %v3987_v0  ;;  %3401 = vmatprep.mubr.msk.f32.mxu0 %vm3989_vm1, %v3988_v21 }
0x2037   :  { %3811 = vmatpush3.bf16.msra.mxu0 %v5105_v13 }
0x2038   :  { %3812 = vmatprep.subr.bf16.mxu0 %v3987_v0 }
0x203b   :  { %3814 = vmatpush3.bf16.msra.mxu0 %v5117_v28 }
0x203c   :  { %3815 = vmatprep.subr.bf16.mxu0 %v3987_v0 }
0x203f   :  { %3817 = vmatpush3.bf16.msra.mxu0 %v5136_v39 }
0x2040   :  { %3830 = vmatprep.subr.bf16.mxu0 %v3987_v0 }
0x20a5   :  { %v2306_v3 = vpop.permute.xlu0 %2305 }
0x2105   :  { %v2296_v60 = vpop.f32.mrb[8].mxu0 }
0x2106   :  { %v2300_v61 = vadd.f32 %v2296_v60, %v2224_v59  ;;  %v3365_v62 = vpop.f32.mrb[9].mxu0 }
0x2108   :  { %3919 = vtanh.f32 %v2300_v61 }
0x2112   :  { %v3920_v30 = vpop.eup %3919 }
0x2113   :  { %2310 = vrot.lane.b32.xlu1 %v3920_v30, %s3990_s0  ;;  %v2302_v31 = vmul.f32 0.5, %v3920_v30 }
0x2115   :  { %v2303_v33 = vadd.f32 0.5, %v2302_v31 }
0x2117   :  { %v2308_v6 = vmul.f32 %v2306_v3, %v2303_v33 }
0x2185   :  { %v2311_v63 = vpop.permute.xlu1 %2310 }
0x2186   :  { %v2313_v2 = vmul.f32 %v2311_v63, %v2303_v33 }
0x2188   :  { %2315 = vrot.lane.b32.xlu1 %v2313_v2, %s3991_s2 }
0x21fa   :  { %v2316_v7 = vpop.permute.xlu1 %2315 }
0x21fb   :  { %v2318_v8 = vadd.f32 %v2316_v7, %v2308_v6  ;;  %v2486_v6 = vld [vmem:[#allocation6 + $0x20] sm:$0xf0]  ;;  %v2487_v7 = vld [vmem:[#allocation6 + $0x18] sm:$0xf] }
0x21fd   :  { %3921 = vtanh.f32 %v2318_v8  ;;  %v2327_v17 = vsub.f32 %v2318_v8, %v2306_v3  ;;  %v2489_v8 = vrot.slane %v2486_v6, 4 }
0x2207   :  { %v3922_v10 = vpop.eup %3921 }
0x2208   :  { %2321 = vrot.lane.b32.xlu0 %v3922_v10, %s3990_s0  ;;  %v2492_v10 = vrot.slane %v2487_v7, 4 }
0x227a   :  { %v2322_v11 = vpop.permute.xlu0 %2321 }
0x227b   :  { %v2324_v16 = vmul.f32 %v2322_v11, %v2303_v33 }
0x227d   :  { %2339 = vrot.lane.b32.xlu0 %v2324_v16, %s3990_s0  ;;  %2336 = vrot.lane.b32.xlu1 %v2324_v16, %s3991_s2 }
0x2281   :  { %2329 = vrot.lane.b32.xlu1 %v2327_v17, %s3992_s17 }
0x22ef   :  { %v2340_v20 = vpop.permute.xlu0 %2339  ;;  %v2337_v22 = vpop.permute.xlu1 %2336 }
0x22f0   :  { %v2342_v25 = vsel %vm542_vm2, %v2337_v22, %v2340_v20  ;;  %v5319_v34 = vmul.f32 %v2980_v19, %v2337_v22 }
0x22f1   :  { %v2343_v26 = vsub.f32 %v2342_v25, %v2225_v18 }
0x22f2   :  { %2348 = vst.msk [vmem:[%s5535_s9 + $0xc] sm:$0xf] %vm679_vm4, %v5319_v34 }
0x22f3   :  { %v2344_v32 = vmul.f32 %v2981_v23, %v2343_v26  ;;  %v2330_v4 = vpop.permute.xlu1 %2329 }
0x22f4   :  { %v2332_v29 = vmul.f32 %v2980_v19, %v2330_v4 }
0x22f5   :  { %v2345_v9 = vadd.f32 %v2344_v32, %v2225_v18 }
0x22f6   :  { %v2333_v38 = vadd.f32 %v2332_v29, %v2226_v54  ;;  %v2986_v29 = vld [vmem:[%s5533_s7 + $0x28] sm:$0xff] }
0x22f7   :  { %2346 = vst.msk [vmem:[#allocation2] sm:$0xff] %vm540_vm0, %v2345_v9 }
0x22f8   :  { %2334 = vst.msk [vmem:[#allocation3] sm:$0xff] %vm542_vm2, %v2333_v38 }
0x22fe   :  { %v2357_v15 = vld [vmem:[#allocation2] sm:$0xff] }
0x22ff   :  { %3383 = vmatmul.mubr.msk.f32.vlgmr.msra.gmra.mrb[30].mxu1 %vm540_vm0, %v2357_v15  ;;  %v2358_v41 = vld [vmem:[#allocation3] sm:$0xff] }
0x2300   :  { %2437 = vrot.lane.b32.xlu1 %v2358_v41, %s3991_s2  ;;  %3820 = vmatpush3.bf16.msra.mxu1 %v5089_v24 }
0x2301   :  { %3821 = vmatprep.subr.bf16.mxu1 %v3987_v0  ;;  %3420 = vmatprep.mubr.msk.f32.mxu1 %vm3989_vm1, %v3988_v21 }
0x2304   :  { %3823 = vmatpush3.bf16.msra.mxu1 %v5105_v13 }
0x2305   :  { %3824 = vmatprep.subr.bf16.mxu1 %v3987_v0 }
0x2308   :  { %3826 = vmatpush3.bf16.msra.mxu1 %v5117_v28 }
0x2309   :  { %3827 = vmatprep.subr.bf16.mxu1 %v3987_v0 }
0x230c   :  { %3829 = vmatpush3.bf16.msra.mxu1 %v5136_v39 }
0x2372   :  { %v2438_v48 = vpop.permute.xlu1 %2437 }
0x23d2   :  { %v2428_v40 = vpop.f32.mrb[30].mxu1 }
0x23d3   :  { %v2432_v51 = vadd.f32 %v2428_v40, %v2356_v37  ;;  %v3384_v45 = vpop.f32.mrb[31].mxu1 }
0x23d5   :  { %3923 = vtanh.f32 %v2432_v51 }
0x23df   :  { %v3924_v46 = vpop.eup %3923 }
0x23e0   :  { %2442 = vrot.lane.b32.xlu0 %v3924_v46, %s3990_s0  ;;  %v2434_v35 = vmul.f32 0.5, %v3924_v46 }
0x23e2   :  { %v2435_v1 = vadd.f32 0.5, %v2434_v35 }
0x23e4   :  { %v2440_v49 = vmul.f32 %v2438_v48, %v2435_v1 }
0x2452   :  { %v2443_v47 = vpop.permute.xlu0 %2442 }
0x2453   :  { %v2445_v14 = vmul.f32 %v2443_v47, %v2435_v1  ;;  %v2624_v47 = vld [vmem:[#allocation6 + $0x30] sm:$0xf] }
0x2455   :  { %2447 = vrot.lane.b32.xlu0 %v2445_v14, %s3991_s2  ;;  %v2625_v14 = vld [vmem:[#allocation6 + $0x8] sm:$0xf0] }
0x24c7   :  { %v2448_v12 = vpop.permute.xlu0 %2447 }
0x24c8   :  { %v2450_v50 = vadd.f32 %v2448_v12, %v2440_v49 }
0x24ca   :  { %3925 = vtanh.f32 %v2450_v50  ;;  %v2459_v54 = vsub.f32 %v2450_v50, %v2438_v48  ;;  %v2626_v48 = vsel %vm554_vm3, %v2624_v47, %v2625_v14 }
0x24d4   :  { %v3926_v52 = vpop.eup %3925 }
0x24d5   :  { %2453 = vrot.lane.b32.xlu1 %v3926_v52, %s3990_s0 }
0x2547   :  { %v2454_v53 = vpop.permute.xlu1 %2453 }
0x2548   :  { %v2456_v18 = vmul.f32 %v2454_v53, %v2435_v1 }
0x254a   :  { %2471 = vrot.lane.b32.xlu1 %v2456_v18, %s3990_s0  ;;  %2468 = vrot.lane.b32.xlu0 %v2456_v18, %s3991_s2 }
0x254e   :  { %2461 = vrot.lane.b32.xlu0 %v2459_v54, %s3992_s17 }
0x25bc   :  { %v2472_v55 = vpop.permute.xlu1 %2471  ;;  %v2469_v57 = vpop.permute.xlu0 %2468 }
0x25bd   :  { %v2474_v59 = vsel %vm542_vm2, %v2469_v57, %v2472_v55  ;;  %v5353_v60 = vmul.f32 %v2983_v27, %v2469_v57 }
0x25be   :  { %v2475_v61 = vsub.f32 %v2474_v59, %v2357_v15 }
0x25c0   :  { %v2476_v62 = vmul.f32 %v2984_v58, %v2475_v61  ;;  %v2462_v30 = vpop.permute.xlu0 %2461 }
0x25c1   :  { %v2464_v31 = vmul.f32 %v2983_v27, %v2462_v30 }
0x25c2   :  { %v2477_v33 = vadd.f32 %v2476_v62, %v2357_v15  ;;  %v2987_v15 = vld [vmem:[%s5534_s8 + $0x28] sm:$0xff] }
0x25c3   :  { %v2465_v63 = vadd.f32 %v2464_v31, %v2358_v41 }
0x25c4   :  { %2478 = vst.msk [vmem:[#allocation2] sm:$0xff] %vm540_vm0, %v2477_v33  ;;  %v2989_v33 = vld [vmem:[%s5533_s7 + $0x30] sm:$0xff] }
0x25c5   :  { %2466 = vst.msk [vmem:[#allocation3] sm:$0xff] %vm542_vm2, %v2465_v63 }
0x25cb   :  { %v2495_v2 = vld [vmem:[#allocation2] sm:$0xff] }
0x25cc   :  { %3402 = vmatmul.mubr.msk.f32.vlgmr.msra.gmra.mrb[10].mxu0 %vm540_vm0, %v2495_v2  ;;  %v2496_v3 = vld [vmem:[#allocation3] sm:$0xff] }
0x25cd   :  { %2575 = vrot.lane.b32.xlu0 %v2496_v3, %s3991_s2  ;;  %3832 = vmatpush3.bf16.msra.mxu0 %v5089_v24  ;;  %v2494_v24 = vsel %vm554_vm3, %v2489_v8, %v2492_v10 }
0x25ce   :  { %3833 = vmatprep.subr.bf16.mxu0 %v3987_v0  ;;  %3439 = vmatprep.mubr.msk.f32.mxu0 %vm3989_vm1, %v3988_v21 }
0x25d1   :  { %3835 = vmatpush3.bf16.msra.mxu0 %v5105_v13 }
0x25d2   :  { %3836 = vmatprep.subr.bf16.mxu0 %v3987_v0 }
0x25d5   :  { %3838 = vmatpush3.bf16.msra.mxu0 %v5117_v28 }
0x25d6   :  { %3839 = vmatprep.subr.bf16.mxu0 %v3987_v0 }
0x25d9   :  { %3841 = vmatpush3.bf16.msra.mxu0 %v5136_v39 }
0x263f   :  { %v2576_v0 = vpop.permute.xlu0 %2575 }
0x269f   :  { %v2566_v11 = vpop.f32.mrb[10].mxu0 }
0x26a0   :  { %v2570_v16 = vadd.f32 %v2566_v11, %v2494_v24  ;;  %v3403_v17 = vpop.f32.mrb[11].mxu0 }
0x26a2   :  { %3927 = vtanh.f32 %v2570_v16 }
0x26ac   :  { %v3928_v21 = vpop.eup %3927 }
0x26ad   :  { %2580 = vrot.lane.b32.xlu1 %v3928_v21, %s3990_s0  ;;  %v2572_v13 = vmul.f32 0.5, %v3928_v21 }
0x26af   :  { %v2573_v19 = vadd.f32 0.5, %v2572_v13 }
0x26b1   :  { %v2578_v39 = vmul.f32 %v2576_v0, %v2573_v19 }
0x271f   :  { %v2581_v28 = vpop.permute.xlu1 %2580 }
0x2720   :  { %v2583_v20 = vmul.f32 %v2581_v28, %v2573_v19  ;;  %v2757_v28 = vld [vmem:[#allocation6 + $0x8] sm:$0xf] }
0x2722   :  { %2585 = vrot.lane.b32.xlu1 %v2583_v20, %s3991_s2 }
0x2794   :  { %v2586_v22 = vpop.permute.xlu1 %2585 }
0x2795   :  { %v2588_v23 = vadd.f32 %v2586_v22, %v2578_v39 }
0x2797   :  { %3929 = vtanh.f32 %v2588_v23  ;;  %v2597_v4 = vsub.f32 %v2588_v23, %v2576_v0  ;;  %v2762_v0 = vrot.slane %v2757_v28, 4 }
0x27a1   :  { %v3930_v25 = vpop.eup %3929 }
0x27a2   :  { %2591 = vrot.lane.b32.xlu0 %v3930_v25, %s3990_s0 }
0x2814   :  { %v2592_v26 = vpop.permute.xlu0 %2591 }
0x2815   :  { %v2594_v32 = vmul.f32 %v2592_v26, %v2573_v19  ;;  %v2756_v19 = vld [vmem:[#allocation6 + $0x30] sm:$0xf0] }
0x2816   :  { %v2759_v20 = vrot.slane %v2756_v19, 4 }
0x2817   :  { %2609 = vrot.lane.b32.xlu0 %v2594_v32, %s3990_s0  ;;  %2606 = vrot.lane.b32.xlu1 %v2594_v32, %s3991_s2 }
0x2818   :  { %v2764_v39 = vsel %vm554_vm3, %v2759_v20, %v2762_v0 }
0x281b   :  { %2599 = vrot.lane.b32.xlu1 %v2597_v4, %s3992_s17 }
0x2889   :  { %v2610_v9 = vpop.permute.xlu0 %2609  ;;  %v2607_v38 = vpop.permute.xlu1 %2606 }
0x288a   :  { %v2612_v41 = vsel %vm542_vm2, %v2607_v38, %v2610_v9  ;;  %v5382_v43 = vmul.f32 %v2986_v29, %v2607_v38 }
0x288b   :  { %v2613_v44 = vsub.f32 %v2612_v41, %v2495_v2 }
0x288d   :  { %v2614_v37 = vmul.f32 %v2987_v15, %v2613_v44  ;;  %v2600_v40 = vpop.permute.xlu1 %2599 }
0x288e   :  { %v2602_v51 = vmul.f32 %v2986_v29, %v2600_v40 }
0x288f   :  { %v2615_v45 = vadd.f32 %v2614_v37, %v2495_v2 }
0x2890   :  { %v2603_v46 = vadd.f32 %v2602_v51, %v2496_v3  ;;  %v2990_v3 = vld [vmem:[%s5534_s8 + $0x30] sm:$0xff] }
0x2891   :  { %2616 = vst.msk [vmem:[#allocation2] sm:$0xff] %vm540_vm0, %v2615_v45 }
0x2892   :  { %2604 = vst.msk [vmem:[#allocation3] sm:$0xff] %vm542_vm2, %v2603_v46 }
0x2898   :  { %v2627_v35 = vld [vmem:[#allocation2] sm:$0xff] }
0x2899   :  { %3421 = vmatmul.mubr.msk.f32.vlgmr.msra.gmra.mrb[32].mxu1 %vm540_vm0, %v2627_v35  ;;  %v2628_v1 = vld [vmem:[#allocation3] sm:$0xff] }
0x289a   :  { %2707 = vrot.lane.b32.xlu1 %v2628_v1, %s3991_s2 }
0x290c   :  { %v2708_v55 = vpop.permute.xlu1 %2707 }
0x296c   :  { %v2698_v49 = vpop.f32.mrb[32].mxu1 }
0x296d   :  { %v2702_v12 = vadd.f32 %v2698_v49, %v2626_v48  ;;  %v3422_v50 = vpop.f32.mrb[33].mxu1 }
0x296f   :  { %3931 = vtanh.f32 %v2702_v12 }
0x2979   :  { %v3932_v52 = vpop.eup %3931 }
0x297a   :  { %2712 = vrot.lane.b32.xlu0 %v3932_v52, %s3990_s0  ;;  %v2704_v53 = vmul.f32 0.5, %v3932_v52 }
0x297c   :  { %v2705_v18 = vadd.f32 0.5, %v2704_v53 }
0x297e   :  { %v2710_v57 = vmul.f32 %v2708_v55, %v2705_v18 }
0x29ec   :  { %v2713_v54 = vpop.permute.xlu0 %2712 }
0x29ed   :  { %v2715_v27 = vmul.f32 %v2713_v54, %v2705_v18 }
0x29ef   :  { %2717 = vrot.lane.b32.xlu0 %v2715_v27, %s3991_s2 }
0x2a61   :  { %v2718_v58 = vpop.permute.xlu0 %2717 }
0x2a62   :  { %v2720_v59 = vadd.f32 %v2718_v58, %v2710_v57 }
0x2a64   :  { %3933 = vtanh.f32 %v2720_v59  ;;  %v2729_v31 = vsub.f32 %v2720_v59, %v2708_v55 }
0x2a6e   :  { %v3934_v61 = vpop.eup %3933 }
0x2a6f   :  { %2723 = vrot.lane.b32.xlu1 %v3934_v61, %s3990_s0 }
0x2ae1   :  { %v2724_v62 = vpop.permute.xlu1 %2723 }
0x2ae2   :  { %v2726_v30 = vmul.f32 %v2724_v62, %v2705_v18 }
0x2ae4   :  { %2741 = vrot.lane.b32.xlu1 %v2726_v30, %s3990_s0  ;;  %2738 = vrot.lane.b32.xlu0 %v2726_v30, %s3991_s2 }
0x2ae8   :  { %2731 = vrot.lane.b32.xlu0 %v2729_v31, %s3992_s17 }
0x2b56   :  { %v2742_v63 = vpop.permute.xlu1 %2741  ;;  %v2739_v2 = vpop.permute.xlu0 %2738 }
0x2b57   :  { %v2744_v6 = vsel %vm542_vm2, %v2739_v2, %v2742_v63  ;;  %v5402_v7 = vmul.f32 %v2989_v33, %v2739_v2 }
0x2b58   :  { %v2745_v8 = vsub.f32 %v2744_v6, %v2627_v35 }
0x2b5a   :  { %v2746_v10 = vmul.f32 %v2990_v3, %v2745_v8  ;;  %v2732_v24 = vpop.permute.xlu0 %2731 }
0x2b5b   :  { %v2734_v11 = vmul.f32 %v2989_v33, %v2732_v24 }
0x2b5c   :  { %v2747_v16 = vadd.f32 %v2746_v10, %v2627_v35 }
0x2b5d   :  { %v2735_v17 = vadd.f32 %v2734_v11, %v2628_v1  ;;  %v2992_v1 = vld [vmem:[%s5533_s7 + $0x38] sm:$0xff] }
0x2b5e   :  { %2748 = vst.msk [vmem:[#allocation2] sm:$0xff] %vm540_vm0, %v2747_v16 }
0x2b5f   :  { %2736 = vst.msk [vmem:[#allocation3] sm:$0xff] %vm542_vm2, %v2735_v17 }
0x2b65   :  { %v2765_v21 = vld [vmem:[#allocation2] sm:$0xff] }
0x2b66   :  { %3440 = vmatmul.mubr.msk.f32.vlgmr.msra.gmra.mrb[12].mxu0 %vm540_vm0, %v2765_v21  ;;  %v2766_v13 = vld [vmem:[#allocation3] sm:$0xff] }
0x2b67   :  { %2845 = vrot.lane.b32.xlu0 %v2766_v13, %s3991_s2 }
0x2bd9   :  { %v2846_v38 = vpop.permute.xlu0 %2845 }
0x2c39   :  { %v2836_v22 = vpop.f32.mrb[12].mxu0 }
0x2c3a   :  { %v2840_v23 = vadd.f32 %v2836_v22, %v2764_v39  ;;  %v3441_v25 = vpop.f32.mrb[13].mxu0 }
0x2c3c   :  { %3935 = vtanh.f32 %v2840_v23 }
0x2c46   :  { %v3936_v26 = vpop.eup %3935 }
0x2c47   :  { %2850 = vrot.lane.b32.xlu1 %v3936_v26, %s3990_s0  ;;  %v2842_v32 = vmul.f32 0.5, %v3936_v26 }
0x2c49   :  { %v2843_v4 = vadd.f32 0.5, %v2842_v32 }
0x2c4b   :  { %v2848_v15 = vmul.f32 %v2846_v38, %v2843_v4 }
0x2cb9   :  { %v2851_v29 = vpop.permute.xlu1 %2850 }
0x2cba   :  { %v2853_v9 = vmul.f32 %v2851_v29, %v2843_v4 }
0x2cbc   :  { %2855 = vrot.lane.b32.xlu1 %v2853_v9, %s3991_s2 }
0x2d2e   :  { %v2856_v41 = vpop.permute.xlu1 %2855 }
0x2d2f   :  { %v2858_v44 = vadd.f32 %v2856_v41, %v2848_v15 }
0x2d31   :  { %3937 = vtanh.f32 %v2858_v44  ;;  %v2867_v45 = vsub.f32 %v2858_v44, %v2846_v38 }
0x2d3b   :  { %v3938_v37 = vpop.eup %3937 }
0x2d3c   :  { %2861 = vrot.lane.b32.xlu0 %v3938_v37, %s3990_s0 }
0x2dae   :  { %v2862_v40 = vpop.permute.xlu0 %2861 }
0x2daf   :  { %v2864_v51 = vmul.f32 %v2862_v40, %v2843_v4 }
0x2db1   :  { %2879 = vrot.lane.b32.xlu0 %v2864_v51, %s3990_s0  ;;  %2876 = vrot.lane.b32.xlu1 %v2864_v51, %s3991_s2 }
0x2db5   :  { %1653 = vrot.lane.b32.xlu0 %v5119_v36, %s3992_s17  ;;  %2869 = vrot.lane.b32.xlu1 %v2867_v45, %s3992_s17 }
0x2db9   :  { %2080 = vrot.lane.b32.xlu0 %v5249_v5, %s3991_s2  ;;  %1942 = vrot.lane.b32.xlu1 %v5211_v42, %s3991_s2  ;;  %v2993_v42 = vld [vmem:[%s5534_s8 + $0x38] sm:$0xff] }
0x2dbd   :  { %2350 = vrot.lane.b32.xlu0 %v5319_v34, %s3991_s2  ;;  %2212 = vrot.lane.b32.xlu1 %v5284_v56, %s3991_s2 }
0x2dc1   :  { %2482 = vrot.lane.b32.xlu0 %v5353_v60, %s3991_s2  ;;  %2620 = vrot.lane.b32.xlu1 %v5382_v43, %s3991_s2 }
0x2dc5   :  { %2752 = vrot.lane.b32.xlu0 %v5402_v7, %s3991_s2 }
0x2e23   :  { %v2880_v36 = vpop.permute.xlu0 %2879  ;;  %v2877_v5 = vpop.permute.xlu1 %2876 }
0x2e24   :  { %v2882_v34 = vsel %vm542_vm2, %v2877_v5, %v2880_v36  ;;  %v2887_v12 = vmul.f32 %v2992_v1, %v2877_v5 }
0x2e25   :  { %v2883_v46 = vsub.f32 %v2882_v34, %v2765_v21 }
0x2e27   :  { %v2884_v35 = vmul.f32 %v2993_v42, %v2883_v46  ;;  %v1654_v56 = vpop.permute.xlu0 %1653  ;;  %v2870_v47 = vpop.permute.xlu1 %2869 }
0x2e28   :  { %1657 = vst.msk [vmem:[#allocation7 + $0x4] sm:$0xf] %vm679_vm4, %v1654_v56  ;;  %v2872_v14 = vmul.f32 %v2992_v1, %v2870_v47 }
0x2e29   :  { %v2885_v48 = vadd.f32 %v2884_v35, %v2765_v21 }
0x2e2a   :  { %v2873_v49 = vadd.f32 %v2872_v14, %v2766_v13 }
0x2e2b   :  { %2886 = vst.msk [vmem:[#allocation2] sm:$0xff] %vm540_vm0, %v2885_v48  ;;  %v2081_v50 = vpop.permute.xlu0 %2080  ;;  %v1943_v52 = vpop.permute.xlu1 %1942 }
0x2e2c   :  { %2874 = vst.msk [vmem:[#allocation3] sm:$0xff] %vm542_vm2, %v2873_v49 }
0x2e2d   :  { %2083 = vst.msk [vmem:[%s5535_s9 + $0x14] sm:$0xf0] %vm685_vm5, %v2081_v50  ;;  %1945 = vst.msk [vmem:[%s5535_s9 + $0x18] sm:$0xf0] %vm685_vm5, %v1943_v52 }
0x2e2e   :  { %2750 = vst.msk [vmem:[%s5535_s9 + $0x18] sm:$0xf] %vm679_vm4, %v5402_v7  ;;  %2888 = vst.msk [vmem:[%s5535_s9 + $0x1c] sm:$0xf] %vm679_vm4, %v2887_v12 }
0x2e2f   :  { %v2351_v53 = vpop.permute.xlu0 %2350  ;;  %v2213_v18 = vpop.permute.xlu1 %2212 }
0x2e30   :  { %2353 = vst.msk [vmem:[%s5535_s9 + $0xc] sm:$0xf0] %vm685_vm5, %v2351_v53  ;;  %2215 = vst.msk [vmem:[%s5535_s9 + $0x10] sm:$0xf0] %vm685_vm5, %v2213_v18 }
0x2e31   :  { %2480 = vst.msk [vmem:[%s5535_s9 + $0x10] sm:$0xf] %vm679_vm4, %v5353_v60  ;;  %2618 = vst.msk [vmem:[%s5535_s9 + $0x14] sm:$0xf] %vm679_vm4, %v5382_v43 }
0x2e32   :  { %v2897_v54 = vld [vmem:[#allocation2 + $0x4] sm:$0xf]  ;;  %v2894_v27 = vld [vmem:[#allocation2] sm:$0xf] }
0x2e33   :  { %v2483_v55 = vpop.permute.xlu0 %2482  ;;  %2899 = vrot.lane.b32.xlu1 %v2897_v54, %s3992_s17  ;;  %v2621_v57 = vpop.permute.xlu1 %2620  ;;  %2896 = vst.msk [vmem:[#allocation7 + $0x8] sm:$0xf] %vm679_vm4, %v2894_v27  ;;  %v2904_v58 = vld [vmem:[#allocation3] sm:$0xf]  ;;  %v2907_v59 = vld [vmem:[#allocation3 + $0x4] sm:$0xf] }
0x2e34   :  { %2485 = vst.msk [vmem:[%s5535_s9 + $0x8] sm:$0xf0] %vm685_vm5, %v2483_v55  ;;  %2623 = vst.msk [vmem:[%s5535_s9 + $0x4] sm:$0xf0] %vm685_vm5, %v2621_v57  ;;  %s3939_s17 = scalar_lea.vmem %s2930_s18, 256 }
0x2e35   :  { %2906 = vst.msk [vmem:[#allocation9 + $0x8] sm:$0xf] %vm679_vm4, %v2904_v58  ;;  %2909 = vst.msk [vmem:[#allocation9 + $0xc] sm:$0xf] %vm679_vm4, %v2907_v59  ;;  %p3940_p0 = scmp.ne.s32.totalorder %s2930_s18, %s3939_s17  ;;  %p3945_p2 = scmp.lt.s32.totalorder %s3939_s17, %s3939_s17 }
0x2e37   :  { %p3946_p3 = por %p3945_p2, %p3944_p1 }
0x2e39   :  { %p3947_p4 = pnand %p3946_p3, %p3940_p0 }
0x2e3b   :  { %3950 = shalt.err (!%p3947_p4)
}
0x2e3c   :  { %s3951_s30 = scalar_lea.hbm %s5537_s11, 256 }
0x2e3d   :  { %p3952_p5 = scmp.ne.s32.totalorder %s5537_s11, %s3951_s30  ;;  %p3955_p6 = scmp.lt.u32.totalorder %s3951_s30, %s5537_s11 }
0x2e3f   :  { %p3957_p7 = pnand %p3955_p6, %p3952_p5 }
0x2e41   :  { %3960 = shalt.err (!%p3957_p7)
}
0x2e42   :  { %s3994_s14 = smov 4   ;;  %v2753_v60 = vpop.permute.xlu0 %2752  ;;  %2890 = vrot.lane.b32.xlu1 %v2887_v12, %s3991_s2  ;;  %s3995_s19 = smov [#allocation7]  }
0x2e43   :  { %2935 = dma.vmem_to_hbm [thread:$0]  %s2930_s18, 256, %s5537_s11, [#allocation10], %s3990_s0, %s3990_s0, %s3994_s14  }
0x2e44   :  { %2755 = vst.msk [vmem:[%s5535_s9] sm:$0xf0] %vm685_vm5, %v2753_v60  ;;  %s2917_s3 = sshll.u32 %s3995_s19, 4  ;;  %s2918_s3 = int_to_ptr.vmem [resolvable:$true] %s2917_s3 }
0x2e45   :  { %s3961_s20 = scalar_lea.vmem %s2918_s3, 256  ;;  %p3966_p9 = scmp.lt.s32.totalorder %s2918_s3, %s2918_s3 }
0x2e46   :  { %p3962_p8 = scmp.ne.s32.totalorder %s2918_s3, %s3961_s20  ;;  %p3967_p10 = scmp.lt.s32.totalorder %s3961_s20, %s3961_s20 }
0x2e48   :  { %p3968_p11 = por %p3967_p10, %p3966_p9 }
0x2e4a   :  { %p3969_p12 = pnand %p3968_p11, %p3962_p8 }
0x2ea5   :  { %v2900_v43 = vpop.permute.xlu1 %2899 }
0x2ea6   :  { %2903 = vst.msk [vmem:[#allocation7 + $0xc] sm:$0xf] %vm679_vm4, %v2900_v43 }
0x2ea7   :  { %3972 = shalt.err (!%p3969_p12)
}
0x2ea8   :  { %s3973_s18 = scalar_lea.hbm %s5536_s10, 256 }
0x2ea9   :  { %p3974_p13 = scmp.ne.s32.totalorder %s5536_s10, %s3973_s18  ;;  %p3977_p0 = scmp.lt.u32.totalorder %s3973_s18, %s5536_s10 }
0x2eab   :  { %p3979_p1 = pnand %p3977_p0, %p3974_p13 }
0x2ead   :  { %3982 = shalt.err (!%p3979_p1)
}
0x2eae   :  { %2923 = dma.vmem_to_hbm [thread:$0]  %s2918_s3, 256, %s5536_s10, [#allocation8], %s3990_s0, %s3990_s0, %s3994_s14  }
0x2eb4   :  { %v2891_v61 = vpop.permute.xlu1 %2890 }
0x2eb5   :  { %2893 = vst.msk [vmem:[%s5535_s9 - $0x4] sm:$0xf0] %vm685_vm5, %v2891_v61 }
0x2eb6   :  { %3983 = dma.done.wait [#allocation8], 256  }
0x2eb7   :  { %3984 = vsyncadd [#allocation8], 4294967040 }
0x2eb8   :  { %3985 = dma.done.wait [#allocation10], 256  }
0x2eb9   :  { %3986 = vsyncadd [#allocation10], 4294967040 }
0x2eba   :  { %2944 = vsyncpa [#allocation8], 1 }
0x2ebb   :  { %2945 = vsyncpa [#allocation10], 1 }

</bundles_post_ra>
